<compile_context>
chip_gen: v6e
topology: v6e:2x2x1
jax: 0.10.0
libtpu: 0.0.40
codegen_flags: <defaults>
</compile_context>

<pallas_src>
import functools
import math

import jax
import jax.numpy as jnp
from jax import lax
from jax.experimental import pallas as pl
from jax.experimental.pallas import tpu as pltpu

RMS_EPS = 1.1920928955078125e-07  # torch.finfo(torch.float32).eps (F.rms_norm default)


def _pick_tile(T):
    # Largest power-of-two tile <= 256 that divides T (256-multiples fill v6e/v7x MXU).
    for t in (256, 128, 64, 32, 16, 8):
        if T >= t and T % t == 0:
            return t
    return T


# ---------------------------------------------------------------------------
# Fused kernel: QKV proj + RMS-norm + RoPE + blocked causal flash attention
# + output projection, one batch element per grid step.
# ---------------------------------------------------------------------------
def fused_attention_kernel(x_ref, wqkv_ref, wproj_ref, cos_ref, sin_ref, o_ref,
                           *, n_head, head_dim, tile):
    H, D = n_head, head_dim
    C = H * D
    T = x_ref.shape[1]

    x = x_ref[0]                                            # (T, C) bf16
    cos = cos_ref[...].astype(jnp.float32)[:, None, :]      # (T, 1, D/2) f32
    sin = sin_ref[...].astype(jnp.float32)[:, None, :]

    # ---- fused QKV projection: one bf16 MXU matmul, f32 accumulation ---------
    qkv = lax.dot_general(x, wqkv_ref[...], (((1,), (1,)), ((), ())),
                          preferred_element_type=jnp.float32)        # (T, 3C) f32

    def rmsnorm(u):                                         # f32 VPU/EUP math
        return u * lax.rsqrt(jnp.mean(u * u, axis=-1, keepdims=True) + RMS_EPS)

    def rope(u):                                            # rotate-half RoPE, f32
        d = D // 2
        u1, u2 = u[..., :d], u[..., d:]
        # TODO(synk): could become a pltpu.roll-based swizzle once blocked rolls over a
        # sub-128 lane group are guaranteed to lower; cost is negligible vs. the matmuls.
        return jnp.concatenate([u1 * cos + u2 * sin, -u1 * sin + u2 * cos], axis=-1)

    scale = 1.0 / math.sqrt(D)
    q = rope(rmsnorm(qkv[:, :C].reshape(T, H, D))) * scale  # fold 1/sqrt(D) into q
    k = rope(rmsnorm(qkv[:, C:2 * C].reshape(T, H, D)))
    v = qkv[:, 2 * C:].reshape(T, H, D)

    # (H, T, D) bf16 operands for the MXU (leading batch dim for the batched dots).
    q = jnp.transpose(q, (1, 0, 2)).astype(jnp.bfloat16)
    k = jnp.transpose(k, (1, 0, 2)).astype(jnp.bfloat16)
    v = jnp.transpose(v, (1, 0, 2)).astype(jnp.bfloat16)

    # Causal mask for the diagonal tile (hoisted: built once, reused for every i).
    row = lax.broadcasted_iota(jnp.int32, (tile, tile), 0)
    col = lax.broadcasted_iota(jnp.int32, (tile, tile), 1)
    diag_mask = (col <= row)[None, :, :]                    # (1, tq, tk) bool

    # ---- blocked causal attention (online softmax), entirely in VMEM ---------
    n_tiles = T // tile
    y_tiles = []
    for i in range(n_tiles):                                # static -> unrolled at trace
        qi = q[:, i * tile:(i + 1) * tile, :]               # (H, tq, D) bf16
        m = None
        for j in range(i + 1):                              # causal block skip (j > i masked)
            kj = k[:, j * tile:(j + 1) * tile, :]
            vj = v[:, j * tile:(j + 1) * tile, :]
            s = jnp.einsum('hqd,hkd->hqk', qi, kj,
                           preferred_element_type=jnp.float32)       # (H, tq, tk) f32
            if j == i:                                      # only the diagonal tile is masked
                s = jnp.where(diag_mask, s, -jnp.inf)
            if m is None:                                   # first kv tile: direct init
                m = jnp.max(s, axis=-1, keepdims=True)
                p = jnp.exp(s - m)
                l = jnp.sum(p, axis=-1, keepdims=True)
                acc = jnp.einsum('hqk,hkd->hqd', p.astype(jnp.bfloat16), vj,
                                 preferred_element_type=jnp.float32)
            else:                                           # online-softmax update (f32)
                m_new = jnp.maximum(m, jnp.max(s, axis=-1, keepdims=True))
                alpha = jnp.exp(m - m_new)
                p = jnp.exp(s - m_new)
                l = alpha * l + jnp.sum(p, axis=-1, keepdims=True)
                acc = alpha * acc + jnp.einsum('hqk,hkd->hqd', p.astype(jnp.bfloat16), vj,
                                               preferred_element_type=jnp.float32)
                m = m_new

        yi = acc * pl.reciprocal(l, approx=True)            # (H, tq, D) f32, EUP recip
        y_tiles.append(jnp.transpose(yi, (1, 0, 2)).reshape(tile, C).astype(jnp.bfloat16))

    # ---- single output projection + one lane-dense (T, C) store --------------
    y = y_tiles[0] if n_tiles == 1 else jnp.concatenate(y_tiles, axis=0)   # (T, C) bf16
    out = lax.dot_general(y, wproj_ref[...], (((1,), (1,)), ((), ())),
                          preferred_element_type=jnp.float32)              # (T, C) f32
    o_ref[0] = out.astype(o_ref.dtype)


# ---------------------------------------------------------------------------
# Wrapper
# ---------------------------------------------------------------------------
def causal_self_attention(x, wq, wk, wv, wproj, n_head):
    B, T, C = x.shape
    assert C % n_head == 0
    head_dim = C // n_head
    tile = _pick_tile(T)
    assert T % tile == 0

    # Rotary tables (bf16 cast exactly like the PyTorch Rotary module).
    inv_freq = 1.0 / (10000.0 ** (jnp.arange(0, head_dim, 2, dtype=jnp.float32) / head_dim))
    t = jnp.arange(T, dtype=jnp.float32)
    freqs = jnp.outer(t, inv_freq)                          # (T, D/2)
    cos = jnp.cos(freqs).astype(jnp.bfloat16)
    sin = jnp.sin(freqs).astype(jnp.bfloat16)

    # bf16 matmul operands (f32 accumulation inside the kernel); halves weight/x HBM traffic.
    x_bf = x.astype(jnp.bfloat16)
    wqkv = jnp.concatenate([wq, wk, wv], axis=0).astype(jnp.bfloat16)   # (3C, C) fused
    wproj_bf = wproj.astype(jnp.bfloat16)

    flops = (2 * B * T * C * 3 * C                          # QKV projection
             + 2 * B * n_head * T * T * head_dim            # QK^T + PV (~causal half of 4x)
             + 2 * B * T * C * C)                           # output projection
    cost = pl.CostEstimate(
        flops=flops,
        transcendentals=B * n_head * T * T // 2 + 2 * B * T * n_head,
        bytes_accessed=(x_bf.size * 2 + wqkv.size * 2 + wproj_bf.size * 2
                        + cos.size * 2 + sin.size * 2 + B * T * C * 4),
    )

    kernel = functools.partial(fused_attention_kernel,
                               n_head=n_head, head_dim=head_dim, tile=tile)

    return pl.pallas_call(
        kernel,
        out_shape=jax.ShapeDtypeStruct((B, T, C), x.dtype),
        grid=(B,),
        in_specs=[
            pl.BlockSpec((1, T, C), lambda b: (b, 0, 0)),              # x (bf16)
            pl.BlockSpec((3 * C, C), lambda b: (0, 0)),                # fused Wqkv (bf16)
            pl.BlockSpec((C, C), lambda b: (0, 0)),                    # Wproj (bf16)
            pl.BlockSpec((T, head_dim // 2), lambda b: (0, 0)),        # cos (bf16)
            pl.BlockSpec((T, head_dim // 2), lambda b: (0, 0)),        # sin (bf16)
        ],
        out_specs=pl.BlockSpec((1, T, C), lambda b: (b, 0, 0)),
        compiler_params=pltpu.CompilerParams(
            dimension_semantics=("parallel",),
            # NOTE(synk): tiny at these test shapes; for production T/C re-derive the tile
            # budget against 32 MiB scoped (v7x has 64 MiB physical VMEM, half of v5e/v6e).
            vmem_limit_bytes=32 * 1024 * 1024,
        ),
        cost_estimate=cost,
    )(x_bf, wqkv, wproj_bf, cos, sin)


# ---------------------------------------------------------------------------
# Pure-JAX f32 reference (mirrors the PyTorch forward) for verification.
# ---------------------------------------------------------------------------
def reference(x, wq, wk, wv, wproj, n_head):
    B, T, C = x.shape
    D = C // n_head
    q = (x @ wq.T).reshape(B, T, n_head, D)
    k = (x @ wk.T).reshape(B, T, n_head, D)
    v = (x @ wv.T).reshape(B, T, n_head, D)

    inv_freq = 1.0 / (10000.0 ** (jnp.arange(0, D, 2, dtype=jnp.float32) / D))
    t = jnp.arange(T, dtype=jnp.float32)
    freqs = jnp.outer(t, inv_freq)
    cos = jnp.cos(freqs).astype(jnp.bfloat16).astype(jnp.float32)[None, :, None, :]
    sin = jnp.sin(freqs).astype(jnp.bfloat16).astype(jnp.float32)[None, :, None, :]

    def rms(u):
        return u * lax.rsqrt(jnp.mean(u * u, axis=-1, keepdims=True) + RMS_EPS)

    def rope(u):
        d = D // 2
        u1, u2 = u[..., :d], u[..., d:]
        return jnp.concatenate([u1 * cos + u2 * sin, -u1 * sin + u2 * cos], axis=-1)

    q, k = rope(rms(q)), rope(rms(k))
    q, k, v = (a.transpose(0, 2, 1, 3) for a in (q, k, v))   # (B, H, T, D)

    s = jnp.einsum('bhtd,bhsd->bhts', q, k) / math.sqrt(D)
    mask = jnp.tril(jnp.ones((T, T), dtype=bool))
    s = jnp.where(mask[None, None], s, -jnp.inf)
    p = jax.nn.softmax(s, axis=-1)
    y = jnp.einsum('bhts,bhsd->bhtd', p, v)
    y = y.transpose(0, 2, 1, 3).reshape(B, T, C)
    return y @ wproj.T


if __name__ == "__main__":
    B, T, n_head, n_embd = 2, 16, 4, 128     # head_dim = 32
    key = jax.random.PRNGKey(0)
    kx, kq, kk, kv, kp = jax.random.split(key, 5)

    x = jax.random.normal(kx, (B, T, n_embd), dtype=jnp.float32)
    wq = jax.random.normal(kq, (n_embd, n_embd), dtype=jnp.float32) * 0.02
    wk = jax.random.normal(kk, (n_embd, n_embd), dtype=jnp.float32) * 0.02
    wv = jax.random.normal(kv, (n_embd, n_embd), dtype=jnp.float32) * 0.02
    # NOTE(synk): the module zero-inits c_proj.weight; use a deterministic nonzero init
    # so the kernel output is meaningful to verify.
    wproj = jax.random.normal(kp, (n_embd, n_embd), dtype=jnp.float32) * 0.02

    out = causal_self_attention(x, wq, wk, wv, wproj, n_head)
    out = jax.block_until_ready(out)

    ref = reference(x, wq, wk, wv, wproj, n_head)
    assert out.shape == (B, T, n_embd) and out.dtype == jnp.float32
    # bf16 matmul operands (f32 accumulation) -> compare vs. the f32 reference with a
    # bf16-appropriate tolerance.
    max_err = float(jnp.max(jnp.abs(out - ref)))
    assert jnp.allclose(out, ref, atol=2e-2, rtol=2e-2), max_err

    print("KERNEL_OK")
</pallas_src>

<mosaic_0001>
module attributes {stable_mosaic.version = 11 : i64} {
  func.func @fused_attention_kernel(%arg0: i32, %arg1: memref<1x16x128xbf16, #tpu.memory_space<vmem>>, %arg2: memref<384x128xbf16, #tpu.memory_space<vmem>>, %arg3: memref<128x128xbf16, #tpu.memory_space<vmem>>, %arg4: memref<16x16xbf16, #tpu.memory_space<vmem>>, %arg5: memref<16x16xbf16, #tpu.memory_space<vmem>>, %arg6: memref<1x16x128xf32, #tpu.memory_space<vmem>>) attributes {dimension_semantics = [#tpu.dimension_semantics<parallel>], iteration_bounds = array<i64: 2>, scalar_prefetch = 0 : i64, scratch_operands = 0 : i64, tpu.core_type = #tpu.core_type<tc>, window_params = [{transform_indices = @transform_0, window_bounds = array<i64: 1, 16, 128>}, {pipeline_mode = #tpu.pipeline_mode<synchronous>, transform_indices = @transform_1, window_bounds = array<i64: 384, 128>}, {pipeline_mode = #tpu.pipeline_mode<synchronous>, transform_indices = @transform_2, window_bounds = array<i64: 128, 128>}, {pipeline_mode = #tpu.pipeline_mode<synchronous>, transform_indices = @transform_3, window_bounds = array<i64: 16, 16>}, {pipeline_mode = #tpu.pipeline_mode<synchronous>, transform_indices = @transform_4, window_bounds = array<i64: 16, 16>}, {transform_indices = @transform_5, window_bounds = array<i64: 1, 16, 128>}]} {
    %c0 = arith.constant 0 : index
    %c0_0 = arith.constant 0 : index
    %c0_1 = arith.constant 0 : index
    %0 = vector.load %arg1[%c0, %c0_0, %c0_1] : memref<1x16x128xbf16, #tpu.memory_space<vmem>>, vector<1x16x128xbf16>
    %1 = vector.shape_cast %0 : vector<1x16x128xbf16> to vector<16x128xbf16>
    %c0_2 = arith.constant 0 : index
    %c0_3 = arith.constant 0 : index
    %2 = vector.load %arg4[%c0_2, %c0_3] : memref<16x16xbf16, #tpu.memory_space<vmem>>, vector<16x16xbf16>
    %3 = arith.extf %2 : vector<16x16xbf16> to vector<16x16xf32>
    %4 = vector.shape_cast %3 : vector<16x16xf32> to vector<16x1x16xf32>
    %c0_4 = arith.constant 0 : index
    %c0_5 = arith.constant 0 : index
    %5 = vector.load %arg5[%c0_4, %c0_5] : memref<16x16xbf16, #tpu.memory_space<vmem>>, vector<16x16xbf16>
    %6 = arith.extf %5 : vector<16x16xbf16> to vector<16x16xf32>
    %7 = vector.shape_cast %6 : vector<16x16xf32> to vector<16x1x16xf32>
    %c0_6 = arith.constant 0 : index
    %c0_7 = arith.constant 0 : index
    %8 = vector.load %arg2[%c0_6, %c0_7] : memref<384x128xbf16, #tpu.memory_space<vmem>>, vector<384x128xbf16>
    %cst = arith.constant dense<0.000000e+00> : vector<16x384xf32>
    %9 = tpu.matmul %1, %8, %cst {dimension_numbers = #tpu.dot_dimension_numbers<[1], [1], [0], [0], [0, 0, 1, 0], [], []>} : vector<16x128xbf16>, vector<384x128xbf16>, vector<16x384xf32> -> vector<16x384xf32>
    %10 = vector.extract_strided_slice %9 {offsets = [0, 0], sizes = [16, 128], strides = [1, 1]} : vector<16x384xf32> to vector<16x128xf32>
    %11 = vector.shape_cast %10 : vector<16x128xf32> to vector<16x4x32xf32>
    %12 = arith.mulf %11, %11 : vector<16x4x32xf32>
    %cst_8 = arith.constant dense<0.000000e+00> : vector<16x4xf32>
    %13 = vector.multi_reduction <add>, %12, %cst_8 [2] : vector<16x4x32xf32> to vector<16x4xf32>
    %14 = vector.shape_cast %13 : vector<16x4xf32> to vector<16x4x1xf32>
    %cst_9 = arith.constant 3.200000e+01 : f32
    %15 = vector.broadcast %cst_9 : f32 to vector<16x4x1xf32>
    %16 = arith.divf %14, %15 : vector<16x4x1xf32>
    %cst_10 = arith.constant 1.1920929E-7 : f32
    %17 = vector.broadcast %cst_10 : f32 to vector<16x4x1xf32>
    %18 = arith.addf %16, %17 : vector<16x4x1xf32>
    %19 = math.rsqrt %18 : vector<16x4x1xf32>
    %20 = vector.broadcast %19 : vector<16x4x1xf32> to vector<16x4x32xf32>
    %21 = arith.mulf %11, %20 : vector<16x4x32xf32>
    %22 = vector.extract_strided_slice %21 {offsets = [0, 0, 0], sizes = [16, 4, 16], strides = [1, 1, 1]} : vector<16x4x32xf32> to vector<16x4x16xf32>
    %23 = vector.extract_strided_slice %21 {offsets = [0, 0, 16], sizes = [16, 4, 16], strides = [1, 1, 1]} : vector<16x4x32xf32> to vector<16x4x16xf32>
    %24 = vector.broadcast %4 : vector<16x1x16xf32> to vector<16x4x16xf32>
    %25 = arith.mulf %22, %24 : vector<16x4x16xf32>
    %26 = vector.broadcast %7 : vector<16x1x16xf32> to vector<16x4x16xf32>
    %27 = arith.mulf %23, %26 : vector<16x4x16xf32>
    %28 = arith.addf %25, %27 : vector<16x4x16xf32>
    %cst_11 = arith.constant 0.000000e+00 : f32
    %29 = vector.broadcast %cst_11 : f32 to vector<16x4x16xf32>
    %30 = arith.subf %29, %22 : vector<16x4x16xf32>
    %31 = vector.broadcast %7 : vector<16x1x16xf32> to vector<16x4x16xf32>
    %32 = arith.mulf %30, %31 : vector<16x4x16xf32>
    %33 = vector.broadcast %4 : vector<16x1x16xf32> to vector<16x4x16xf32>
    %34 = arith.mulf %23, %33 : vector<16x4x16xf32>
    %35 = arith.addf %32, %34 : vector<16x4x16xf32>
    %36 = tpu.concatenate %28, %35 in 2 : vector<16x4x16xf32>, vector<16x4x16xf32> -> vector<16x4x32xf32>
    %cst_12 = arith.constant 0.176776692 : f32
    %37 = vector.broadcast %cst_12 : f32 to vector<16x4x32xf32>
    %38 = arith.mulf %36, %37 : vector<16x4x32xf32>
    %39 = vector.extract_strided_slice %9 {offsets = [0, 128], sizes = [16, 128], strides = [1, 1]} : vector<16x384xf32> to vector<16x128xf32>
    %40 = vector.shape_cast %39 : vector<16x128xf32> to vector<16x4x32xf32>
    %41 = arith.mulf %40, %40 : vector<16x4x32xf32>
    %cst_13 = arith.constant dense<0.000000e+00> : vector<16x4xf32>
    %42 = vector.multi_reduction <add>, %41, %cst_13 [2] : vector<16x4x32xf32> to vector<16x4xf32>
    %43 = vector.shape_cast %42 : vector<16x4xf32> to vector<16x4x1xf32>
    %cst_14 = arith.constant 3.200000e+01 : f32
    %44 = vector.broadcast %cst_14 : f32 to vector<16x4x1xf32>
    %45 = arith.divf %43, %44 : vector<16x4x1xf32>
    %cst_15 = arith.constant 1.1920929E-7 : f32
    %46 = vector.broadcast %cst_15 : f32 to vector<16x4x1xf32>
    %47 = arith.addf %45, %46 : vector<16x4x1xf32>
    %48 = math.rsqrt %47 : vector<16x4x1xf32>
    %49 = vector.broadcast %48 : vector<16x4x1xf32> to vector<16x4x32xf32>
    %50 = arith.mulf %40, %49 : vector<16x4x32xf32>
    %51 = vector.extract_strided_slice %50 {offsets = [0, 0, 0], sizes = [16, 4, 16], strides = [1, 1, 1]} : vector<16x4x32xf32> to vector<16x4x16xf32>
    %52 = vector.extract_strided_slice %50 {offsets = [0, 0, 16], sizes = [16, 4, 16], strides = [1, 1, 1]} : vector<16x4x32xf32> to vector<16x4x16xf32>
    %53 = vector.broadcast %4 : vector<16x1x16xf32> to vector<16x4x16xf32>
    %54 = arith.mulf %51, %53 : vector<16x4x16xf32>
    %55 = vector.broadcast %7 : vector<16x1x16xf32> to vector<16x4x16xf32>
    %56 = arith.mulf %52, %55 : vector<16x4x16xf32>
    %57 = arith.addf %54, %56 : vector<16x4x16xf32>
    %cst_16 = arith.constant 0.000000e+00 : f32
    %58 = vector.broadcast %cst_16 : f32 to vector<16x4x16xf32>
    %59 = arith.subf %58, %51 : vector<16x4x16xf32>
    %60 = vector.broadcast %7 : vector<16x1x16xf32> to vector<16x4x16xf32>
    %61 = arith.mulf %59, %60 : vector<16x4x16xf32>
    %62 = vector.broadcast %4 : vector<16x1x16xf32> to vector<16x4x16xf32>
    %63 = arith.mulf %52, %62 : vector<16x4x16xf32>
    %64 = arith.addf %61, %63 : vector<16x4x16xf32>
    %65 = tpu.concatenate %57, %64 in 2 : vector<16x4x16xf32>, vector<16x4x16xf32> -> vector<16x4x32xf32>
    %66 = vector.extract_strided_slice %9 {offsets = [0, 256], sizes = [16, 128], strides = [1, 1]} : vector<16x384xf32> to vector<16x128xf32>
    %67 = vector.shape_cast %66 : vector<16x128xf32> to vector<16x4x32xf32>
    %68 = tpu.transpose %38, [1, 0, 2] : vector<16x4x32xf32> -> vector<4x16x32xf32>
    %69 = arith.truncf %68 : vector<4x16x32xf32> to vector<4x16x32xbf16>
    %70 = tpu.transpose %65, [1, 0, 2] : vector<16x4x32xf32> -> vector<4x16x32xf32>
    %71 = arith.truncf %70 : vector<4x16x32xf32> to vector<4x16x32xbf16>
    %72 = tpu.transpose %67, [1, 0, 2] : vector<16x4x32xf32> -> vector<4x16x32xf32>
    %73 = arith.truncf %72 : vector<4x16x32xf32> to vector<4x16x32xbf16>
    %74 = tpu.iota {dimensions = array<i32: 0>} : vector<16x16xi32>
    %75 = tpu.iota {dimensions = array<i32: 1>} : vector<16x16xi32>
    %76 = arith.cmpi sle, %75, %74 : vector<16x16xi32>
    %77 = vector.shape_cast %76 : vector<16x16xi1> to vector<1x16x16xi1>
    "tpu.trace_start"() <{level = 10 : i32, message = "hqd,hkd->hqk"}> : () -> ()
    %cst_17 = arith.constant dense<0.000000e+00> : vector<4x16x16xf32>
    %78 = tpu.matmul %69, %71, %cst_17 {dimension_numbers = #tpu.dot_dimension_numbers<[2], [2], [1], [1], [0, 0, 0, 1, 1, 1], [0], [0]>} : vector<4x16x32xbf16>, vector<4x16x32xbf16>, vector<4x16x16xf32> -> vector<4x16x16xf32>
    %cst_18 = arith.constant 0xFF800000 : f32
    "tpu.trace_stop"() : () -> ()
    %79 = vector.shape_cast %77 : vector<1x16x16xi1> to vector<1x16x16xi1>
    %80 = vector.broadcast %79 : vector<1x16x16xi1> to vector<4x16x16xi1>
    %81 = vector.broadcast %cst_18 : f32 to vector<4x16x16xf32>
    %82 = arith.select %80, %78, %81 : vector<4x16x16xi1>, vector<4x16x16xf32>
    %cst_19 = arith.constant dense<0xFF800000> : vector<4x16xf32>
    %83 = vector.multi_reduction <maximumf>, %82, %cst_19 [2] : vector<4x16x16xf32> to vector<4x16xf32>
    %84 = vector.shape_cast %83 : vector<4x16xf32> to vector<4x16x1xf32>
    %85 = vector.broadcast %84 : vector<4x16x1xf32> to vector<4x16x16xf32>
    %86 = arith.subf %82, %85 : vector<4x16x16xf32>
    %87 = math.exp %86 : vector<4x16x16xf32>
    %cst_20 = arith.constant dense<0.000000e+00> : vector<4x16xf32>
    %88 = vector.multi_reduction <add>, %87, %cst_20 [2] : vector<4x16x16xf32> to vector<4x16xf32>
    %89 = vector.shape_cast %88 : vector<4x16xf32> to vector<4x16x1xf32>
    %90 = arith.truncf %87 : vector<4x16x16xf32> to vector<4x16x16xbf16>
    "tpu.trace_start"() <{level = 10 : i32, message = "hqk,hkd->hqd"}> : () -> ()
    %cst_21 = arith.constant dense<0.000000e+00> : vector<4x16x32xf32>
    %91 = tpu.matmul %90, %73, %cst_21 {dimension_numbers = #tpu.dot_dimension_numbers<[2], [1], [1], [2], [0, 0, 0, 1, 1, 2], [0], [0]>} : vector<4x16x16xbf16>, vector<4x16x32xbf16>, vector<4x16x32xf32> -> vector<4x16x32xf32>
    "tpu.trace_stop"() : () -> ()
    %92 = tpu.reciprocal %89 {approx = true} : vector<4x16x1xf32> -> vector<4x16x1xf32>
    %93 = vector.broadcast %92 : vector<4x16x1xf32> to vector<4x16x32xf32>
    %94 = arith.mulf %91, %93 : vector<4x16x32xf32>
    %95 = tpu.transpose %94, [1, 0, 2] : vector<4x16x32xf32> -> vector<16x4x32xf32>
    %96 = vector.shape_cast %95 : vector<16x4x32xf32> to vector<16x128xf32>
    %97 = arith.truncf %96 : vector<16x128xf32> to vector<16x128xbf16>
    %c0_22 = arith.constant 0 : index
    %c0_23 = arith.constant 0 : index
    %98 = vector.load %arg3[%c0_22, %c0_23] : memref<128x128xbf16, #tpu.memory_space<vmem>>, vector<128x128xbf16>
    %cst_24 = arith.constant dense<0.000000e+00> : vector<16x128xf32>
    %99 = tpu.matmul %97, %98, %cst_24 {dimension_numbers = #tpu.dot_dimension_numbers<[1], [1], [0], [0], [0, 0, 1, 0], [], []>} : vector<16x128xbf16>, vector<128x128xbf16>, vector<16x128xf32> -> vector<16x128xf32>
    %c0_25 = arith.constant 0 : index
    %c0_26 = arith.constant 0 : index
    %c0_27 = arith.constant 0 : index
    %100 = vector.load %arg6[%c0_25, %c0_26, %c0_27] : memref<1x16x128xf32, #tpu.memory_space<vmem>>, vector<1x16x128xf32>
    %101 = vector.shape_cast %100 : vector<1x16x128xf32> to vector<16x128xf32>
    %102 = vector.shape_cast %99 : vector<16x128xf32> to vector<1x16x128xf32>
    tpu.vector_store %arg6[%c0_25, %c0_26, %c0_27], %102 {strides = array<i32>} : memref<1x16x128xf32, #tpu.memory_space<vmem>>, vector<1x16x128xf32>,
    return
  }
  func.func @transform_0(%arg0: i32) -> (i32, i32, i32) {
    %c0_i32 = arith.constant 0 : i32
    %c0_i32_0 = arith.constant 0 : i32
    %c0_i32_1 = arith.constant 0 : i32
    return %arg0, %c0_i32, %c0_i32_0 : i32, i32, i32
  }
  func.func @transform_1(%arg0: i32) -> (i32, i32) {
    %c0_i32 = arith.constant 0 : i32
    %c0_i32_0 = arith.constant 0 : i32
    %c0_i32_1 = arith.constant 0 : i32
    return %c0_i32, %c0_i32_0 : i32, i32
  }
  func.func @transform_2(%arg0: i32) -> (i32, i32) {
    %c0_i32 = arith.constant 0 : i32
    %c0_i32_0 = arith.constant 0 : i32
    %c0_i32_1 = arith.constant 0 : i32
    return %c0_i32, %c0_i32_0 : i32, i32
  }
  func.func @transform_3(%arg0: i32) -> (i32, i32) {
    %c0_i32 = arith.constant 0 : i32
    %c0_i32_0 = arith.constant 0 : i32
    %c0_i32_1 = arith.constant 0 : i32
    return %c0_i32, %c0_i32_0 : i32, i32
  }
  func.func @transform_4(%arg0: i32) -> (i32, i32) {
    %c0_i32 = arith.constant 0 : i32
    %c0_i32_0 = arith.constant 0 : i32
    %c0_i32_1 = arith.constant 0 : i32
    return %c0_i32, %c0_i32_0 : i32, i32
  }
  func.func @transform_5(%arg0: i32) -> (i32, i32, i32) {
    %c0_i32 = arith.constant 0 : i32
    %c0_i32_0 = arith.constant 0 : i32
    %c0_i32_1 = arith.constant 0 : i32
    return %arg0, %c0_i32, %c0_i32_0 : i32, i32, i32
  }
}

</mosaic_0001>

<bundles_post_ra>
// kernel: tpu_custom_call.1
= control target key start
LH: loop header
LB: loop body
LE: loop exit
PB: predicated region body
PF: predicated region fallthrough
CT: control target
= control target key end

     0   :  { %10 = vsyncpa [#allocation3], 0  ;;  %s6286_s0 = inlined_call_operand.hbm [shape: bf16[2,16,128], index: 0, kind: input, shape index: {}]   ;;  %s6287_s1 = inlined_call_operand.hbm [shape: bf16[384,128], index: 1, kind: input, shape index: {}]   ;;  %s6288_s2 = inlined_call_operand.hbm [shape: bf16[128,128], index: 2, kind: input, shape index: {}]   ;;  %s6289_s3 = inlined_call_operand.hbm [shape: bf16[16,16], index: 3, kind: input, shape index: {}]   ;;  %s6290_s4 = inlined_call_operand.hbm [shape: bf16[16,16], index: 4, kind: input, shape index: {}]   ;;  %s6291_s5 = inlined_call_operand.hbm [shape: f32[2,16,128], index: 5, kind: output, shape index: {}]  }
   0x1   :  { %12 = vsyncpa [#allocation3 + $0x1], 0 }
   0x2   :  { %13 = vsyncpa [#allocation6], 0 }
   0x3   :  { %14 = vsyncpa [#allocation9], 0 }
   0x4   :  { %15 = vsyncpa [#allocation4], 0 }
   0x5   :  { %17 = vsyncpa [#allocation4 + $0x1], 0  ;;  %s4609_s18 = smov 0   ;;  %s4611_s19 = smov 0  }
   0x6   :  { %s4613_s20 = smov 0   ;;  %s4615_s21 = smov 0  }
   0x7 LB: > { %s4630_s22 = sadd.s32 4294967295, %s4557_s21   ;;  %s3866_s23 = sadd.s32 4294967294, %s4557_s21   ;;  %s4557_s21 = sphi %s4615_s21, %s6542_s21   ;;  %s4553_s20 = sphi %s4613_s20, %s6541_s20   ;;  %s4549_s19 = sphi %s4611_s19, %s6540_s19   ;;  %s4545_s18 = sphi %s4609_s18, %s6539_s18  }
   0x8   : > { %p43_p0 = scmp.ne.s32.totalorder %s4549_s19, %s4545_s18  ;;  %p6292_p1 = scmp.eq.s32.totalorder %s4630_s22, 0 }
   0x9   : > { %p151_p2 = scmp.eq.s32.totalorder %s4630_s22, 1  ;;  %p157_p3 = scmp.eq.s32.totalorder %s3866_s23, 1 }
   0xa   : > { %p4639_p4 = por %p6292_p1, %p43_p0  ;;  %p3867_p5 = scmp.ge.s32.totalorder %s4557_s21, 1 }
   0xb   : > { %p4644_p6 = por %p157_p3, %p43_p0  ;;  %p164_p7 = scmp.lt.s32.totalorder %s4557_s21, 3 }
   0xc   : > { %s6389_s24 = scalar_select %p4639_p4, 1, 0 }
   0xd   : > { %s6390_s25 = scalar_select %p4644_p6, 1, 0 }
   0xe   : > { %p4649_p8 = pnand %p3867_p5, %p164_p7  ;;  %s4559_s27 = smov [#allocation5]  }
   0xf   : > { %s176_s28 = sshll.u32 %s4559_s27, 4  ;;  %s4560_s30 = smov [#allocation8]   ;;  %s177_s28 = int_to_ptr.vmem [resolvable:$true] %s176_s28 }
  0x10   : > { %s6391_s26 = scalar_select %p4649_p8, 1, 0 }
  0x11   : > { %p4107_p9 = pneg %p4649_p8  ;;  %s202_s6 = sshll.u32 %s4560_s30, 4  ;;  %s203_s6 = int_to_ptr.vmem [resolvable:$true] %s202_s6 }
  0x12   : > { %s4561_s7 = smov [#allocation7]   ;;  %s4364_s9 = scalar_lea.vmem %s177_s28, 3072 }
  0x13   : > { %p4658_p11 = pnand %p4107_p9, %p6292_p1  ;;  %s189_s8 = sshll.u32 %s4561_s7, 4  ;;  %s190_s8 = int_to_ptr.vmem [resolvable:$true] %s189_s8 }
  0x14   : > { %p4365_p13 = scmp.ne.s32.totalorder %s177_s28, %s4364_s9  ;;  %p4372_p5 = scmp.lt.s32.totalorder %s177_s28, %s177_s28 }
  0x15   : > { %p4355_p12 = pneg %p4658_p11  ;;  %p4373_p7 = scmp.lt.s32.totalorder %s4364_s9, %s4364_s9 }
  0x17   : > { %p4367_p0 = pnand %p4365_p13, %p4355_p12  ;;  %p4374_p9 = por %p4373_p7, %p4372_p5 }
  0x19   : > { %p4368_p3 = pneg %p4367_p0 }
  0x1b   : > { %p4375_p10 = pnand %p4374_p9, %p4368_p3 }
  0x1d   : > { %4378 = shalt.err (!%p4375_p10)
}
  0x1e   : > { %s6293_s10 = smov 64   ;;  %s4563_s11 = smov 4  }
  0x1f   : > { %4110 = dma.hbm_to_vmem [thread:$0]  (!%p4658_p11), %s6287_s1, 3072, %s177_s28, [#allocation6], %s6293_s10, %s6293_s10, %s4563_s11  }
  0x20   : > { %s4390_s14 = scalar_lea.vmem %s203_s6, 128  ;;  %p4398_p3 = scmp.lt.s32.totalorder %s203_s6, %s203_s6 }
  0x21   : > { %p4391_p13 = scmp.ne.s32.totalorder %s203_s6, %s4390_s14  ;;  %p4399_p10 = scmp.lt.s32.totalorder %s4390_s14, %s4390_s14 }
  0x23   : > { %p4393_p0 = pnand %p4391_p13, %p4355_p12  ;;  %p4400_p7 = por %p4399_p10, %p4398_p3 }
  0x25   : > { %p4394_p5 = pneg %p4393_p0 }
  0x27   : > { %p4401_p9 = pnand %p4400_p7, %p4394_p5 }
  0x29   : > { %4404 = shalt.err (!%p4401_p9)
}
  0x2a   : > { %4116 = dma.hbm_to_vmem [thread:$0]  (!%p4658_p11), %s6289_s3, 128, %s203_s6, [#allocation9], %s6293_s10, %s6293_s10, %s4563_s11  }
  0x2b   : > { %s4416_s17 = scalar_lea.vmem %s190_s8, 1024  ;;  %p4424_p3 = scmp.lt.s32.totalorder %s190_s8, %s190_s8 }
  0x2c   : > { %p4417_p1 = scmp.ne.s32.totalorder %s190_s8, %s4416_s17  ;;  %p4425_p5 = scmp.lt.s32.totalorder %s4416_s17, %s4416_s17 }
  0x2e   : > { %p4419_p13 = pnand %p4417_p1, %p4355_p12  ;;  %p4426_p10 = por %p4425_p5, %p4424_p3 }
  0x30   : > { %p4420_p0 = pneg %p4419_p13 }
  0x32   : > { %p4427_p7 = pnand %p4426_p10, %p4420_p0 }
  0x34   : > { %4430 = shalt.err (!%p4427_p7)
}
  0x35   : > { %4113 = dma.hbm_to_vmem [thread:$0]  (!%p4658_p11), %s6288_s2, 1024, %s190_s8, [#allocation6], %s6293_s10, %s6293_s10, %s4563_s11  }
  0x36   : > { %s4564_s28 = smov [#allocation10]  }
  0x37   : > { %s215_s30 = sshll.u32 %s4564_s28, 4  ;;  %s216_s30 = int_to_ptr.vmem [resolvable:$true] %s215_s30 }
  0x38   : > { %s4442_s6 = scalar_lea.vmem %s216_s30, 128  ;;  %p4450_p0 = scmp.lt.s32.totalorder %s216_s30, %s216_s30 }
  0x39   : > { %p4443_p1 = scmp.ne.s32.totalorder %s216_s30, %s4442_s6  ;;  %p4451_p3 = scmp.lt.s32.totalorder %s4442_s6, %s4442_s6 }
  0x3b   : > { %p4445_p9 = pnand %p4443_p1, %p4355_p12  ;;  %p4452_p5 = por %p4451_p3, %p4450_p0 }
  0x3d   : > { %p4446_p13 = pneg %p4445_p9 }
  0x3f   : > { %p4453_p10 = pnand %p4452_p5, %p4446_p13 }
  0x41   : > { %4456 = shalt.err (!%p4453_p10)
}
  0x42   : > { %4119 = dma.hbm_to_vmem [thread:$0]  (!%p4658_p11), %s6290_s4, 128, %s216_s30, [#allocation9], %s6293_s10, %s6293_s10, %s4563_s11  }
  0x43   : > { %s4709_s9 = sadd.s32 1, %s4557_s21   ;;  %s30_s29 = sadd.s32 1, %s4553_s20 }
  0x44   : > { %s27_s12 = ssub.s32 %s4557_s21, %s4709_s9  ;;  %p37_p12 = scmp.ne.s32.totalorder %s4553_s20, %s4549_s19 }
  0x45   : > { %p28_p7 = scmp.eq.s32.totalorder %s27_s12, 0  ;;  %p38_p1 = scmp.eq.s32.totalorder %s4557_s21, 0 }
  0x46   : > { %p4719_p9 = por %p151_p2, %p37_p12  ;;  %p4132_p13 = scmp.lt.s32.totalorder %s4557_s21, 2 }
  0x47   : > { %s4725_s14 = scalar_select %p28_p7, %s4553_s20, %s30_s29  }
  0x48   : > { %s6393_s13 = scalar_select %p4719_p9, 1, 0 }
  0x49   : > { %p39_p0 = por %p38_p1, %p37_p12  ;;  %s229_s15 = sand.u32 1, %s4553_s20  }
  0x4a   : > { %s3873_s16 = sshll.u32 %s229_s15, 3  ;;  %s3937_s17 = sshll.u32 %s4557_s21, 7 }
  0x4b   : > { %s4732_s28 = scalar_lea.hbm %s6286_s0, %s3937_s17  ;;  %s233_s30 = scalar_lea.vmem [#allocation2], %s3873_s16 }
  0x4c   : > { %s240_s6 = sshll.u32 %s233_s30, 4  ;;  %p4736_p2 = pnand %p4132_p13, %p39_p0  ;;  %s4734_s6 = int_to_ptr.vmem [resolvable:$true] %s240_s6 }
  0x4d   : > { %s4740_s8 = scalar_lea.sflag [#allocation3], %s229_s15  ;;  %s4457_s29 = scalar_lea.hbm %s4732_s28, 128 }
  0x4e   : > { %p4458_p11 = scmp.ne.s32.totalorder %s4732_s28, %s4457_s29  ;;  %p4459_p3 = pneg %p4736_p2 }
  0x4f   : > { %s4462_s16 = scalar_lea.hbm %s6286_s0, 256  ;;  %p4463_p12 = scmp.lt.s32.totalorder %s4732_s28, %s6286_s0 }
  0x50   : > { %p4460_p5 = pnand %p4459_p3, %p4458_p11  ;;  %p4464_p7 = scmp.lt.s32.totalorder %s4462_s16, %s4457_s29 }
  0x52   : > { %p4461_p10 = pneg %p4460_p5  ;;  %p4465_p1 = por %p4464_p7, %p4463_p12 }
  0x54   : > { %p4466_p13 = pnand %p4465_p1, %p4461_p10 }
  0x56   : > { %4469 = shalt.err (!%p4466_p13)
}
  0x57   : > { %s4470_s15 = scalar_lea.vmem %s4734_s6, 128  ;;  %s4565_s30 = smov [#allocation2]  }
  0x58   : > { %p4471_p0 = scmp.ne.s32.totalorder %s4734_s6, %s4470_s15  ;;  %s4475_s10 = sshll.u32 %s4565_s30, 4  ;;  %s4476_s10 = int_to_ptr.vmem [resolvable:$false] %s4475_s10 }
  0x59   : > { %s4477_s12 = scalar_lea.vmem %s4476_s10, 256  ;;  %p4478_p5 = scmp.lt.s32.totalorder %s4734_s6, %s4476_s10 }
  0x5a   : > { %p4473_p6 = pnand %p4471_p0, %p4459_p3  ;;  %p4479_p9 = scmp.lt.s32.totalorder %s4477_s12, %s4470_s15 }
  0x5c   : > { %p4474_p11 = pneg %p4473_p6  ;;  %p4480_p4 = por %p4479_p9, %p4478_p5 }
  0x5e   : > { %p4481_p8 = pnand %p4480_p4, %p4474_p11 }
  0x60   : > { %4484 = shalt.err (!%p4481_p8)
}
  0x61   : > { %s6395_s29 = smov 64   ;;  %p6396_p6 = scmp.ne.s32.totalorder %s6391_s26, 0 }
  0x62   : > { %4123 = dma.hbm_to_vmem [thread:$0]  (!%p4736_p2), %s4732_s28, 128, %s4734_s6, %s4740_s8, %s6395_s29, %s6395_s29, %s4563_s11  }
  0x63   : > { %252 = sbr.rel (%p6396_p6) target bundleno = 2027 (0x7eb), region = 40 }
  0x68   : > { %s4767_s17 = sand.u32 1, %s4549_s19   ;;  %p6397_p4 = scmp.ne.s32.totalorder %s6389_s24, 0 }
  0x69   : > { %s3877_s10 = sshll.u32 %s4767_s17, 3  ;;  %s255_s16 = scalar_lea.sflag [#allocation3], %s4767_s17 }
  0x6a   : > { %s4771_s23 = scalar_lea.vmem [#allocation2], %s3877_s10 }
  0x6b   : > { %4528 = dma.done.wait (%p6397_p4), %s255_s16, 128  }
  0x6c   : > { %4530 = vsyncadd (%p6397_p4), %s255_s16, 4294967168  ;;  %p6398_p8 = scmp.eq.s32.totalorder %s4630_s22, 0 }
  0x6e   : > { %4532 = dma.done.wait (%p6398_p8), [#allocation6], 4096   ;;  %p6399_p9 = pmov %p6398_p8 }
  0x6f   : > { %p6400_p2 = pmov %p6398_p8 }
  0x70   : > { %4534 = vsyncadd (%p6399_p9), [#allocation6], 4294963200 }
  0x71   : > { %4536 = dma.done.wait (%p6400_p2), [#allocation9], 256   ;;  %p6401_p3 = pmov %p6400_p2 }
  0x72   : > { %v4223_v0 = vld [vmem:[#allocation5 + $0x78] sm:$0xff]   ;;  %v4225_v2 = vld [vmem:[#allocation5 + $0x70] sm:$0xff]   ;;  %v4227_v4 = vld [vmem:[#allocation5 + $0x68] sm:$0xff]   ;;  %v4566_v5 = vmov 1966171168   ;;  %v6297_v7 = vlaneseq  ;;  %s4567_s24 = smov 16  }
  0x73   : > { %4538 = vsyncadd (%p6401_p3), [#allocation9], 4294967040  ;;  %v4224_v1 = vld [vmem:[#allocation5 + $0x38] sm:$0xff]   ;;  %3947 = vmatprep.subr.bf16.mxu0 %v4223_v0  ;;  %v4226_v3 = vld [vmem:[#allocation5 + $0x30] sm:$0xff]   ;;  %v312_v6 = vunpack.c.l.s4 %v4566_v5  ;;  %s4568_s26 = smov 96   ;;  %s4569_s11 = smov 64  }
  0x74   : > { %3948 = vmatpush3.bf16.xpose.msra.mxu0 %v4224_v1  ;;  %v4786_v9 = vshrl.u32 %v6297_v7, 7  ;;  %v4228_v10 = vld [vmem:[#allocation5 + $0x28] sm:$0xff]   ;;  %v4229_v11 = vld [vmem:[#allocation5 + $0x60] sm:$0xff]   ;;  %v4789_v12 = vld [vmem:[%s4771_s23] sm:$0xff]   ;;  %s4571_s28 = smov 32   ;;  %vm966_vm0 = vcmask 257024  }
  0x75   : > { %3949 = vmatprep.subr.bf16.mxu0 %v4225_v2  ;;  %v313_v8 = vunpack.c.0.s8 %v312_v6  ;;  %v3940_v14 = vld [vmem:[#allocation8] sm:$0xff]   ;;  %3963 = vmatprep.mubr.bf16.mxu0 %v4789_v12  ;;  %v4231_v21 = vld [vmem:[#allocation5 + $0x58] sm:$0xff]   ;;  %v4801_v25 = vld [vmem:[#allocation10] sm:$0xff]   ;;  %s4574_s6 = smov 112   ;;  %vm4575_vm1 = vmmov 0   ;;  %vm1640_vm2 = vcmask 130048  }
  0x76   : > { %6402 = vst [vmem:[#allocation16_spill] sm:$0xff] %v4786_v9  ;;  %v4795_v15 = vsub.s32 0, %v4786_v9  ;;  %v3941_v16 = vunpack.c.l.bf16 %v3940_v14  ;;  %v4230_v19 = vld [vmem:[#allocation5 + $0x20] sm:$0xff]   ;;  %v3942_v20 = vunpack.c.h.bf16 %v3940_v14  ;;  %v3945_v38 = vunpack.c.l.bf16 %v4801_v25  ;;  %v4232_v44 = vld [vmem:[#allocation5 + $0x18] sm:$0xff]   ;;  %v4233_v45 = vld [vmem:[#allocation5 + $0x50] sm:$0xff]   ;;  %s3882_s7 = sshll.u32 %s4767_s17, 4 }
  0x77   : > { %v4792_v13 = vsub.s32 %v313_v8, %v4786_v9  ;;  %v4234_v60 = vld [vmem:[#allocation5 + $0x10] sm:$0xff]   ;;  %v4235_v61 = vld [vmem:[#allocation5 + $0x48] sm:$0xff]   ;;  %vm2860_vm3 = vcmask 261120   ;;  %vm3627_vm6 = vcmask 523264   ;;  %vm3630_vm7 = vcmask 785408   ;;  %s300_s8 = scalar_lea.vmem [#allocation11], %s3882_s7 }
  0x78   : > { %v310_v17 = vcombine.high %v3941_v16, %v3941_v16  ;;  %v359_v30 = vcombine.high %v3942_v20, %v3942_v20  ;;  %v414_v48 = vcombine.high %v3945_v38, %v3945_v38  ;;  %v4236_v14 = vld [vmem:[#allocation5 + $0x8] sm:$0xff]   ;;  %s3755_s27 = sshll.u32 %s300_s8, 4  ;;  %s3938_s15 = sshll.u32 %s4630_s22, 8  ;;  %s6238_s27 = int_to_ptr.vmem [resolvable:$true] %s3755_s27 }
  0x79   : > { %v317_v18 = vrot.slane %v3941_v16, %v4792_v13  ;;  %v366_v34 = vrot.slane %v3942_v20, %v4792_v13  ;;  %v421_v53 = vrot.slane %v3945_v38, %v4792_v13  ;;  %v4237_v16 = vld [vmem:[#allocation5 + $0x40] sm:$0xff]   ;;  %s6243_s29 = scalar_lea.hbm %s6291_s5, %s3938_s15  ;;  %s3742_s10 = scalar_lea.sflag [#allocation4], %s4767_s17 }
  0x7a   : > { %v324_v22 = vrot.slane %v310_v17, %v4792_v13  ;;  %v373_v43 = vrot.slane %v359_v30, %v4792_v13  ;;  %v428_v56 = vrot.slane %v414_v48, %v4792_v13  ;;  %s4485_s16 = scalar_lea.vmem %s6238_s27, 256  ;;  %p6536_p12 = scmp.ne.s32.totalorder %s6393_s13, 0 }
  0x7b   : > { %v333_v23 = vrot.slane %v317_v18, %v4792_v13  ;;  %v325_v24 = vcombine.high %v317_v18, %v317_v18  ;;  %v374_v37 = vcombine.high %v366_v34, %v366_v34  ;;  %v382_v51 = vrot.slane %v366_v34, %v4792_v13  ;;  %p4486_p10 = scmp.ne.s32.totalorder %s6238_s27, %s4485_s16  ;;  %s4576_s22 = smov [#allocation11]  }
  0x7c   : > { %3950 = vmatpush3.bf16.xpose.msra.mxu0 %v4226_v3  ;;  %v340_v26 = vrot.slane %v324_v22, %v4792_v13  ;;  %v326_v29 = vcombine.high %v324_v22, %v324_v22  ;;  %v389_v52 = vrot.slane %v373_v43, %v4792_v13  ;;  %v437_v0 = vrot.slane %v421_v53, %v4792_v13 }
  0x7d   : > { %3951 = vmatprep.subr.bf16.mxu0 %v4227_v4  ;;  %v4805_v27 = vrot.slane %v333_v23, %v4795_v15  ;;  %v347_v28 = vrot.slane %v325_v24, %v4792_v13  ;;  %v355_v32 = vcombine.high %v333_v23, %v333_v23  ;;  %v396_v47 = vrot.slane %v374_v37, %v4792_v13  ;;  %p4487_p7 = pnand %p4486_p10, %p6536_p12 }
  0x7e   : > { %v4809_v31 = vrot.slane %v340_v26, %v4795_v15  ;;  %v354_v35 = vrot.slane %v326_v29, %v4792_v13  ;;  %v356_v50 = vcombine.high %v340_v26, %v340_v26  ;;  %v4855_v58 = vrot.slane %v382_v51, %v4795_v15 }
  0x7f   : > { %6403 = vst [vmem:[#allocation17_spill] sm:$0xff] %v4805_v27  ;;  %v4812_v33 = vrot.slane %v347_v28, %v4795_v15  ;;  %v4826_v41 = vrot.slane %v355_v32, %v4795_v15  ;;  %v357_v42 = vcombine.high %v347_v28, %v347_v28  ;;  %v4846_v54 = vrot.slane %v396_v47, %v4795_v15  ;;  %v4238_v32 = vld [vmem:[#allocation5] sm:$0xff]   ;;  %p4488_p1 = pneg %p4487_p7 }
  0x80   : > { %6404 = vst [vmem:[#allocation18_spill] sm:$0xff] %v4809_v31  ;;  %v4188_v36 = vpack.i.bf16 %v4809_v31, %v4805_v27  ;;  %v4822_v39 = vrot.slane %v354_v35, %v4795_v15  ;;  %v358_v40 = vcombine.high %v354_v35, %v354_v35  ;;  %v406_v55 = vcombine.high %v396_v47, %v396_v47 }
  0x81   : > { %6405 = vst [vmem:[#allocation19_spill] sm:$0xff] %v4812_v33  ;;  %1434 = vrot.lane.b32.xlu0 %v4812_v33, %s4567_s24  ;;  %6407 = vst [vmem:[#allocation21_spill] sm:$0xff] %v4826_v41  ;;  %v4838_v49 = vrot.slane %v357_v42, %v4795_v15  ;;  %v4852_v57 = vrot.slane %v356_v50, %v4795_v15  ;;  %v4858_v59 = vrot.slane %v389_v52, %v4795_v15 }
  0x82   : > { %6406 = vst [vmem:[#allocation20_spill] sm:$0xff] %v4822_v39  ;;  %4189 = vrot.lane.b32.xlu1 %v4188_v36, %s4567_s24  ;;  %v4832_v46 = vrot.slane %v358_v40, %v4795_v15  ;;  %6410 = vst [vmem:[#allocation24_spill] sm:$0xff] %v4846_v54  ;;  %v4863_v62 = vrot.slane %v406_v55, %v4795_v15  ;;  %v405_v63 = vcombine.high %v389_v52, %v389_v52 }
  0x83   : > { %6409 = vst [vmem:[#allocation23_spill] sm:$0xff] %v4838_v49  ;;  %6411 = vst [vmem:[#allocation25_spill] sm:$0xff] %v4852_v57  ;;  %v444_v1 = vrot.slane %v428_v56, %v4792_v13  ;;  %v4193_v2 = vpack.i.bf16 %v4858_v59, %v4855_v58  ;;  %v404_v3 = vcombine.high %v382_v51, %v382_v51  ;;  %v3946_v23 = vunpack.c.h.bf16 %v4801_v25 }
  0x84   : > { %3952 = vmatpush3.bf16.xpose.msra.mxu0 %v4228_v10  ;;  %6408 = vst [vmem:[#allocation22_spill] sm:$0xff] %v4832_v46  ;;  %6412 = vst [vmem:[#allocation26_spill] sm:$0xff] %v4855_v58  ;;  %v375_v4 = vcombine.high %v373_v43, %v373_v43  ;;  %v4874_v5 = vrot.slane %v405_v63, %v4795_v15  ;;  %v4877_v6 = vrot.slane %v437_v0, %v4795_v15 }
  0x85   : > { %3953 = vmatprep.subr.bf16.mxu0 %v4229_v11  ;;  %1442 = vrot.lane.b32.xlu0 %v4822_v39, %s4567_s24  ;;  %6413 = vst [vmem:[#allocation27_spill] sm:$0xff] %v4858_v59  ;;  %6414 = vst [vmem:[#allocation28_spill] sm:$0xff] %v4863_v62  ;;  %v4880_v8 = vrot.slane %v444_v1, %v4795_v15  ;;  %v4884_v10 = vrot.slane %v404_v3, %v4795_v15 }
  0x86   : > { %1436 = vrot.lane.b32.xlu1 %v4826_v41, %s4567_s24  ;;  %6415 = vst [vmem:[#allocation29_spill] sm:$0xff] %v4874_v5  ;;  %6416 = vst [vmem:[#allocation30_spill] sm:$0xff] %v4877_v6  ;;  %v403_v11 = vrot.slane %v375_v4, %v4792_v13  ;;  %v459_v18 = vcombine.high %v437_v0, %v437_v0  ;;  %v429_v22 = vcombine.high %v421_v53, %v421_v53 }
  0x87   : > { %6417 = vst [vmem:[#allocation31_spill] sm:$0xff] %v4880_v8  ;;  %6418 = vst [vmem:[#allocation32_spill] sm:$0xff] %v4884_v10  ;;  %v4198_v17 = vpack.i.bf16 %v4880_v8, %v4877_v6  ;;  %v463_v30 = vcombine.high %v3946_v23, %v3946_v23  ;;  %v470_v25 = vrot.slane %v3946_v23, %v4792_v13 }
  0x88   : > { %v4894_v20 = vrot.slane %v403_v11, %v4795_v15  ;;  %v4899_v24 = vrot.slane %v459_v18, %v4795_v15  ;;  %v451_v29 = vrot.slane %v429_v22, %v4792_v13 }
  0x89   : > { %1446 = vrot.lane.b32.xlu0 %v4832_v46, %s4567_s24  ;;  %v478_v36 = vcombine.high %v470_v25, %v470_v25  ;;  %v477_v40 = vrot.slane %v463_v30, %v4792_v13  ;;  %v486_v47 = vrot.slane %v470_v25, %v4792_v13 }
  0x8a   : > { %1438 = vrot.lane.b32.xlu1 %v4838_v49, %s4567_s24  ;;  %6419 = vst [vmem:[#allocation33_spill] sm:$0xff] %v4894_v20  ;;  %6420 = vst [vmem:[#allocation34_spill] sm:$0xff] %v4899_v24  ;;  %v4917_v37 = vrot.slane %v451_v29, %v4795_v15  ;;  %v461_v38 = vcombine.high %v451_v29, %v451_v29 }
  0x8b   : > { %v500_v43 = vrot.slane %v478_v36, %v4792_v13  ;;  %v493_v48 = vrot.slane %v477_v40, %v4792_v13  ;;  %v4945_v53 = vrot.slane %v486_v47, %v4795_v15  ;;  %v479_v63 = vcombine.high %v477_v40, %v477_v40 }
  0x8c   : > { %3954 = vmatpush3.bf16.xpose.msra.mxu0 %v4230_v19  ;;  %v430_v19 = vcombine.high %v428_v56, %v428_v56  ;;  %6423 = vst [vmem:[#allocation37_spill] sm:$0xff] %v4917_v37 }
  0x8d   : > { %3955 = vmatprep.subr.bf16.mxu0 %v4231_v21  ;;  %1450 = vrot.lane.b32.xlu0 %v4846_v54, %s4567_s24  ;;  %v407_v21 = vcombine.high %v403_v11, %v403_v11  ;;  %v4936_v50 = vrot.slane %v500_v43, %v4795_v15  ;;  %v510_v51 = vcombine.high %v500_v43, %v500_v43 }
  0x8e   : > { %1444 = vrot.lane.b32.xlu1 %v4852_v57, %s4567_s24  ;;  %v458_v26 = vrot.slane %v430_v19, %v4792_v13  ;;  %6428 = vst [vmem:[#allocation42_spill] sm:$0xff] %v4945_v53  ;;  %v4948_v55 = vrot.slane %v493_v48, %v4795_v15 }
  0x8f   : > { %v4905_v28 = vrot.slane %v407_v21, %v4795_v15  ;;  %6426 = vst [vmem:[#allocation40_spill] sm:$0xff] %v4936_v50  ;;  %v4953_v56 = vrot.slane %v510_v51, %v4795_v15 }
  0x90   : > { %v4912_v34 = vrot.slane %v458_v26, %v4795_v15  ;;  %v462_v35 = vcombine.high %v458_v26, %v458_v26  ;;  %6429 = vst [vmem:[#allocation43_spill] sm:$0xff] %v4948_v55 }
  0x91   : > { %1454 = vrot.lane.b32.xlu0 %v4863_v62, %s4567_s24  ;;  %6421 = vst [vmem:[#allocation35_spill] sm:$0xff] %v4905_v28  ;;  %6430 = vst [vmem:[#allocation44_spill] sm:$0xff] %v4953_v56 }
  0x92   : > { %4194 = vrot.lane.b32.xlu1 %v4193_v2, %s4567_s24  ;;  %6422 = vst [vmem:[#allocation36_spill] sm:$0xff] %v4912_v34  ;;  %v4923_v42 = vrot.slane %v462_v35, %v4795_v15  ;;  %v507_v2 = vrot.slane %v479_v63, %v4792_v13 }
  0x94   : > { %3956 = vmatpush3.bf16.xpose.msra.mxu0 %v4232_v44  ;;  %6424 = vst [vmem:[#allocation38_spill] sm:$0xff] %v4923_v42  ;;  %v4929_v44 = vrot.slane %v461_v38, %v4795_v15  ;;  %v4974_v3 = vrot.slane %v507_v2, %v4795_v15  ;;  %v511_v4 = vcombine.high %v507_v2, %v507_v2 }
  0x95   : > { %3957 = vmatprep.subr.bf16.mxu0 %v4233_v45  ;;  %1460 = vrot.lane.b32.xlu0 %v4874_v5, %s4567_s24  ;;  %v460_v45 = vcombine.high %v444_v1, %v444_v1 }
  0x96   : > { %1452 = vrot.lane.b32.xlu1 %v4884_v10, %s4567_s24  ;;  %6425 = vst [vmem:[#allocation39_spill] sm:$0xff] %v4929_v44  ;;  %6433 = vst [vmem:[#allocation47_spill] sm:$0xff] %v4974_v3  ;;  %v4979_v11 = vrot.slane %v511_v4, %v4795_v15 }
  0x97   : > { %v4942_v52 = vrot.slane %v460_v45, %v4795_v15 }
  0x98   : > { %6434 = vst [vmem:[#allocation48_spill] sm:$0xff] %v4979_v11 }
  0x99   : > { %4199 = vrot.lane.b32.xlu0 %v4198_v17, %s4567_s24  ;;  %6427 = vst [vmem:[#allocation41_spill] sm:$0xff] %v4942_v52 }
  0x9a   : > { %1458 = vrot.lane.b32.xlu1 %v4894_v20, %s4567_s24 }
  0x9c   : > { %3958 = vmatpush3.bf16.xpose.msra.mxu0 %v4234_v60  ;;  %v509_v60 = vcombine.high %v493_v48, %v493_v48 }
  0x9d   : > { %3959 = vmatprep.subr.bf16.mxu0 %v4235_v61  ;;  %1260 = vrot.lane.b32.xlu0 %v4899_v24, %s4567_s24  ;;  %v508_v61 = vcombine.high %v486_v47, %v486_v47 }
  0x9e   : > { %1462 = vrot.lane.b32.xlu1 %v4905_v28, %s4567_s24  ;;  %v4962_v0 = vrot.slane %v509_v60, %v4795_v15 }
  0x9f   : > { %v4966_v1 = vrot.slane %v508_v61, %v4795_v15 }
  0xa0   : > { %6431 = vst [vmem:[#allocation45_spill] sm:$0xff] %v4962_v0 }
  0xa1   : > { %1266 = vrot.lane.b32.xlu0 %v4912_v34, %s4567_s24  ;;  %6432 = vst [vmem:[#allocation46_spill] sm:$0xff] %v4966_v1 }
  0xa2   : > { %1258 = vrot.lane.b32.xlu1 %v4917_v37, %s4567_s24 }
  0xa4   : > { %3960 = vmatpush3.bf16.xpose.msra.mxu0 %v4236_v14 }
  0xa5   : > { %3961 = vmatprep.subr.bf16.mxu0 %v4237_v16  ;;  %1270 = vrot.lane.b32.xlu0 %v4923_v42, %s4567_s24  ;;  %v6298_v16 = vmov 0.0  }
  0xa6   : > { %1262 = vrot.lane.b32.xlu1 %v4929_v44, %s4567_s24  ;;  %3999 = vmatprep.subr.bf16.mxu1 %v6298_v16 }
  0xa9   : > { %1274 = vrot.lane.b32.xlu0 %v4936_v50, %s4567_s24 }
  0xaa   : > { %1268 = vrot.lane.b32.xlu1 %v4942_v52, %s4567_s24 }
  0xac   : > { %3962 = vmatpush3.bf16.xpose.msra.mxu0 %v4238_v32 }
  0xad   : > { %1278 = vrot.lane.b32.xlu0 %v4953_v56, %s4567_s24  ;;  %4067 = vmatprep.subr.bf16.mxu0 %v6298_v16 }
  0xb1   : > { %1284 = vrot.lane.b32.xlu0 %v4962_v0, %s4567_s24 }
  0xb3   : > { %3964 = vmatmul.mubr.bf16.vlgmr.msra.gmra.mxu0 %v4789_v12  ;;  %v4203_v12 = vpack.i.bf16 %v4948_v55, %v4945_v53  ;;  %v4573_v55 = vmov 1934713408  }
  0xb4   : > { %v849_v20 = vunpack.c.l.s4 %v4573_v55 }
  0xb5   : > { %4204 = vrot.lane.b32.xlu1 %v4203_v12, %s4567_s24 }
  0xb6   : > { %v850_v5 = vunpack.c.0.s8 %v849_v20 }
  0xb8   : > { %v5078_v39 = vsub.s32 %v850_v5, %v4786_v9 }
  0xb9   : > { %1276 = vrot.lane.b32.xlu1 %v4966_v1, %s4567_s24 }
  0xba   : > { %6442 = vst [vmem:[#allocation56_spill] sm:$0xff] %v5078_v39 }
  0xbd   : > { %1282 = vrot.lane.b32.xlu1 %v4974_v3, %s4567_s24  ;;  %v4572_v3 = vmov 1983009808  }
  0xbe   : > { %v817_v0 = vunpack.c.l.s4 %v4572_v3 }
  0xc0   : > { %v818_v54 = vunpack.c.0.s8 %v817_v0 }
  0xc1   : > { %1286 = vrot.lane.b32.xlu1 %v4979_v11, %s4567_s24 }
  0xc2   : > { %v5075_v58 = vsub.s32 %v818_v54, %v4786_v9 }
  0xc4   : > { %6441 = vst [vmem:[#allocation55_spill] sm:$0xff] %v5075_v58 }
  0xf3   : > { %v5019_v19 = vpop.permute.xlu0 %1434 }
  0xf4   : > { %v5017_v18 = vpop.permute.xlu1 %4189 }
  0xf7   : > { %v5023_v22 = vpop.permute.xlu0 %1442 }
  0xf8   : > { %v5021_v21 = vpop.permute.xlu1 %1436 }
  0xfb   : > { %v5027_v26 = vpop.permute.xlu0 %1446 }
  0xfc   : > { %v5025_v23 = vpop.permute.xlu1 %1438 }
  0xff   : > { %v5031_v30 = vpop.permute.xlu0 %1450 }
 0x100   : > { %v5029_v29 = vpop.permute.xlu1 %1444 }
 0x103   : > { %v5035_v32 = vpop.permute.xlu0 %1454 }
 0x104   : > { %v5033_v25 = vpop.permute.xlu1 %4194 }
 0x107   : > { %v5039_v36 = vpop.permute.xlu0 %1460 }
 0x108   : > { %v5037_v35 = vpop.permute.xlu1 %1452 }
 0x10b   : > { %v5043_v40 = vpop.permute.xlu0 %4199 }
 0x10c   : > { %v5041_v38 = vpop.permute.xlu1 %1458 }
 0x10f   : > { %v5047_v45 = vpop.permute.xlu0 %1260 }
 0x110   : > { %v5045_v43 = vpop.permute.xlu1 %1462 }
 0x111   : > { %6435 = vst [vmem:[#allocation49_spill] sm:$0xff] %v5045_v43 }
 0x113   : > { %v5051_v48 = vpop.permute.xlu0 %1266 }
 0x114   : > { %v5049_v47 = vpop.permute.xlu1 %1258 }
 0x117   : > { %v5055_v60 = vpop.permute.xlu0 %1270 }
 0x118   : > { %v5053_v51 = vpop.permute.xlu1 %1262 }
 0x11b   : > { %v5059_v61 = vpop.permute.xlu0 %1274 }
 0x11c   : > { %v5057_v12 = vpop.permute.xlu1 %1268  ;;  %6436 = vst [vmem:[#allocation50_spill] sm:$0xff] %v5059_v61 }
 0x11f   : > { %v5063_v2 = vpop.permute.xlu0 %1278 }
 0x120   : > { %6437 = vst [vmem:[#allocation51_spill] sm:$0xff] %v5063_v2 }
 0x123   : > { %v5067_v7 = vpop.permute.xlu0 %1284 }
 0x124   : > { %6438 = vst [vmem:[#allocation52_spill] sm:$0xff] %v5067_v7 }
 0x127   : > { %v5061_v63 = vpop.permute.xlu1 %4204 }
 0x12b   : > { %v5065_v4 = vpop.permute.xlu1 %1276 }
 0x12f   : > { %v5069_v16 = vpop.permute.xlu1 %1282 }
 0x130   : > { %6439 = vst [vmem:[#allocation53_spill] sm:$0xff] %v5069_v16 }
 0x133   : > { %v5071_v28 = vpop.permute.xlu1 %1286 }
 0x134   : > { %6440 = vst [vmem:[#allocation54_spill] sm:$0xff] %v5071_v28 }
 0x173   : > { %v4983_v13 = vpop.f32.mrf.mxu0 }
 0x174   : > { %796 = vrot.lane.b32.xlu0 %v4983_v13, %s4568_s26 }
 0x175   : > { %v4987_v14 = vpop.f32.mrf.mxu0 }
 0x176   : > { %1681 = vrot.lane.b32.xlu1 %v4987_v14, %s4569_s11 }
 0x177   : > { %v4993_v15 = vpop.f32.mrf.mxu0 }
 0x178   : > { %802 = vrot.lane.b32.xlu0 %v4983_v13, %s4569_s11 }
 0x179   : > { %v5009_v17 = vpop.f32.mrf.mxu0 }
 0x17a   : > { %798 = vrot.lane.b32.xlu1 %v4993_v15, %s4568_s26 }
 0x17c   : > { %808 = vrot.lane.b32.xlu0 %v4983_v13, %s4571_s28 }
 0x17e   : > { %804 = vrot.lane.b32.xlu1 %v4993_v15, %s4569_s11 }
 0x180   : > { %1675 = vrot.lane.b32.xlu0 %v4987_v14, %s4568_s26 }
 0x182   : > { %810 = vrot.lane.b32.xlu1 %v4993_v15, %s4571_s28 }
 0x184   : > { %1687 = vrot.lane.b32.xlu0 %v4987_v14, %s4571_s28 }
 0x186   : > { %1683 = vrot.lane.b32.xlu1 %v5009_v17, %s4569_s11 }
 0x188   : > { %1677 = vrot.lane.b32.xlu0 %v5009_v17, %s4568_s26 }
 0x18a   : > { %1689 = vrot.lane.b32.xlu1 %v5009_v17, %s4571_s28 }
 0x1e6   : > { %v797_v11 = vpop.permute.xlu0 %796 }
 0x1e8   : > { %v1682_v59 = vpop.permute.xlu1 %1681 }
 0x1e9   : > { %v1693_v5 = vcombine.low %v4987_v14, %v1682_v59 }
 0x1ea   : > { %v803_v62 = vpop.permute.xlu0 %802 }
 0x1eb   : > { %v814_v10 = vcombine.low %v4983_v13, %v803_v62  ;;  %v815_v3 = vcombine.high %v4983_v13, %v803_v62 }
 0x1ec   : > { %v5083_v20 = vpop.permute.xlu1 %798 }
 0x1ed   : > { %v822_v1 = vrot.slane %v814_v10, %v5075_v58  ;;  %v829_v54 = vrot.slane %v815_v3, %v5075_v58 }
 0x1ee   : > { %v809_v56 = vpop.permute.xlu0 %808 }
 0x1ef   : > { %v830_v50 = vcombine.low %v797_v11, %v809_v56  ;;  %v831_v46 = vcombine.high %v797_v11, %v809_v56 }
 0x1f1   : > { %v838_v55 = vrot.slane %v830_v50, %v5075_v58  ;;  %v845_v49 = vrot.slane %v831_v46, %v5075_v58  ;;  %v1694_v46 = vcombine.high %v4987_v14, %v1682_v59 }
 0x1f2   : > { %v1676_v0 = vpop.permute.xlu0 %1675 }
 0x1f3   : > { %v846_v53 = vcombine.low %v822_v1, %v838_v55  ;;  %v847_v33 = vcombine.high %v822_v1, %v838_v55  ;;  %v862_v62 = vcombine.low %v829_v54, %v845_v49  ;;  %v5097_v1 = vpop.permute.xlu1 %804  ;;  %v863_v3 = vcombine.high %v829_v54, %v845_v49 }
 0x1f4   : > { %v1708_v59 = vrot.slane %v1694_v46, %v5075_v58 }
 0x1f5   : > { %v5088_v56 = vrot.slane %v846_v53, %v5078_v39  ;;  %v5092_v50 = vrot.slane %v847_v33, %v5078_v39  ;;  %v1701_v53 = vrot.slane %v1693_v5, %v5075_v58 }
 0x1f6   : > { %v1688_v11 = vpop.permute.xlu0 %1687 }
 0x1f7   : > { %v1709_v13 = vcombine.low %v1676_v0, %v1688_v11  ;;  %v1710_v10 = vcombine.high %v1676_v0, %v1688_v11  ;;  %v950_v9 = vmul.f32 %v5088_v56, %v5088_v56  ;;  %v952_v33 = vmul.f32 %v5092_v50, %v5092_v50  ;;  %v811_v54 = vpop.permute.xlu1 %810 }
 0x1f8   : > { %v5106_v11 = vrot.slane %v862_v62, %v5078_v39  ;;  %v5119_v62 = vrot.slane %v863_v3, %v5078_v39 }
 0x1f9   : > { %v1717_v55 = vrot.slane %v1709_v13, %v5075_v58  ;;  %v1724_v57 = vrot.slane %v1710_v10, %v5075_v58  ;;  %v967_v0 = vsel %vm966_vm0, %v950_v9, 0.0  ;;  %v973_v9 = vsel %vm966_vm0, %v952_v33, 0.0 }
 0x1fa   : > { %968 = vadd.xlane.f32.xlu1 %v967_v0  ;;  %v954_v13 = vmul.f32 %v5106_v11, %v5106_v11  ;;  %v956_v3 = vmul.f32 %v5119_v62, %v5119_v62 }
 0x1fb   : > { %v1725_v31 = vcombine.low %v1701_v53, %v1717_v55  ;;  %v1726_v41 = vcombine.high %v1701_v53, %v1717_v55  ;;  %v1741_v5 = vcombine.low %v1708_v59, %v1724_v57  ;;  %v6443_v53 = vmov 0.0   ;;  %v5155_v34 = vpop.permute.xlu1 %1683 }
 0x1fc   : > { %v5129_v55 = vcombine.high %v5088_v56, %v6443_v53  ;;  %v1742_v0 = vcombine.high %v1708_v59, %v1724_v57  ;;  %v979_v33 = vsel %vm966_vm0, %v954_v13, 0.0  ;;  %v5144_v57 = vcombine.high %v5092_v50, %v6443_v53  ;;  %4015 = vmatprep.mubr.msk.bf16.mxu1 %vm4575_vm1, %v6443_v53  ;;  %4083 = vmatprep.mubr.msk.bf16.mxu0 %vm4575_vm1, %v6443_v53 }
 0x1fd   : > { %v5110_v14 = vrot.slane %v1725_v31, %v5078_v39  ;;  %v5113_v49 = vrot.slane %v1726_v41, %v5078_v39  ;;  %v898_v31 = vcombine.low %v5083_v20, %v811_v54  ;;  %v985_v13 = vsel %vm966_vm0, %v956_v3, 0.0 }
 0x1fe   : > { %974 = vadd.xlane.f32.xlu1 %v973_v9  ;;  %v5135_v9 = vrot.slane %v1741_v5, %v5078_v39  ;;  %v951_v42 = vmul.f32 %v5129_v55, %v5129_v55 }
 0x1ff   : > { %v1829_v10 = vmul.f32 %v5110_v14, %v5110_v14  ;;  %v1831_v41 = vmul.f32 %v5113_v49, %v5113_v49  ;;  %v906_v59 = vrot.slane %v898_v31, %v5075_v58  ;;  %v953_v31 = vmul.f32 %v5144_v57, %v5144_v57 }
 0x200   : > { %v1833_v5 = vmul.f32 %v5135_v9, %v5135_v9  ;;  %v970_v44 = vsel %vm966_vm0, %v951_v42, 0.0  ;;  %v883_v42 = vcombine.high %v4993_v15, %v5097_v1 }
 0x201   : > { %v1845_v46 = vsel %vm966_vm0, %v1829_v10, 0.0  ;;  %v882_v10 = vcombine.low %v4993_v15, %v5097_v1  ;;  %v1851_v27 = vsel %vm966_vm0, %v1831_v41, 0.0 }
 0x202   : > { %1846 = vadd.xlane.f32.xlu0 %v1845_v46  ;;  %980 = vadd.xlane.f32.xlu1 %v979_v33  ;;  %v5151_v46 = vrot.slane %v1742_v0, %v5078_v39  ;;  %v899_v33 = vcombine.high %v5083_v20, %v811_v54  ;;  %v1857_v0 = vsel %vm966_vm0, %v1833_v5, 0.0  ;;  %v5169_v20 = vcombine.high %v5110_v14, %v6443_v53 }
 0x203   : > { %v890_v41 = vrot.slane %v882_v10, %v5075_v58  ;;  %v897_v1 = vrot.slane %v883_v42, %v5075_v58 }
 0x204   : > { %v1835_v10 = vmul.f32 %v5151_v46, %v5151_v46  ;;  %v913_v54 = vrot.slane %v899_v33, %v5075_v58  ;;  %v1830_v8 = vmul.f32 %v5169_v20, %v5169_v20  ;;  %v1690_v33 = vpop.permute.xlu1 %1689 }
 0x205   : > { %v914_v3 = vcombine.low %v890_v41, %v906_v59  ;;  %v915_v5 = vcombine.high %v890_v41, %v906_v59  ;;  %v5193_v41 = vcombine.high %v5113_v49, %v6443_v53 }
 0x206   : > { %1852 = vadd.xlane.f32.xlu0 %v1851_v27  ;;  %986 = vadd.xlane.f32.xlu1 %v985_v13  ;;  %v5162_v27 = vcombine.high %v5106_v11, %v6443_v53  ;;  %v976_v13 = vsel %vm966_vm0, %v953_v31, 0.0  ;;  %v1863_v52 = vsel %vm966_vm0, %v1835_v10, 0.0  ;;  %v930_v31 = vcombine.low %v897_v1, %v913_v54 }
 0x207   : > { %v5185_v15 = vrot.slane %v914_v3, %v5078_v39  ;;  %v931_v42 = vcombine.high %v897_v1, %v913_v54  ;;  %v1832_v28 = vmul.f32 %v5193_v41, %v5193_v41 }
 0x208   : > { %v955_v37 = vmul.f32 %v5162_v27, %v5162_v27 }
 0x209   : > { %v958_v3 = vmul.f32 %v5185_v15, %v5185_v15 }
 0x20a   : > { %971 = vadd.xlane.f32.xlu0 %v970_v44  ;;  %1858 = vadd.xlane.f32.xlu1 %v1857_v0  ;;  %v5179_v44 = vcombine.high %v5119_v62, %v6443_v53  ;;  %v1678_v0 = vpop.permute.xlu0 %1677  ;;  %v982_v24 = vsel %vm966_vm0, %v955_v37, 0.0  ;;  %v1761_v37 = vcombine.low %v5009_v17, %v5155_v34 }
 0x20b   : > { %v1777_v10 = vcombine.low %v1678_v0, %v1690_v33  ;;  %v991_v16 = vsel %vm966_vm0, %v958_v3, 0.0  ;;  %v1778_v1 = vcombine.high %v1678_v0, %v1690_v33 }
 0x20c   : > { %v957_v59 = vmul.f32 %v5179_v44, %v5179_v44  ;;  %v1769_v54 = vrot.slane %v1761_v37, %v5075_v58 }
 0x20d   : > { %v1792_v33 = vrot.slane %v1778_v1, %v5075_v58 }
 0x20e   : > { %977 = vadd.xlane.f32.xlu0 %v976_v13  ;;  %1864 = vadd.xlane.f32.xlu1 %v1863_v52  ;;  %v1848_v13 = vsel %vm966_vm0, %v1830_v8, 0.0  ;;  %v5199_v52 = vrot.slane %v915_v5, %v5078_v39  ;;  %v988_v6 = vsel %vm966_vm0, %v957_v59, 0.0  ;;  %v5208_v8 = vcombine.high %v5135_v9, %v6443_v53 }
 0x20f   : > { %v1854_v59 = vsel %vm966_vm0, %v1832_v28, 0.0  ;;  %v1762_v28 = vcombine.high %v5009_v17, %v5155_v34 }
 0x210   : > { %v960_v5 = vmul.f32 %v5199_v52, %v5199_v52  ;;  %v1834_v2 = vmul.f32 %v5208_v8, %v5208_v8 }
 0x211   : > { %v1776_v17 = vrot.slane %v1762_v28, %v5075_v58 }
 0x212   : > { %983 = vadd.xlane.f32.xlu0 %v982_v24  ;;  %1849 = vadd.xlane.f32.xlu1 %v1848_v13  ;;  %v1785_v24 = vrot.slane %v1777_v10, %v5075_v58  ;;  %v5215_v13 = vrot.slane %v930_v31, %v5078_v39  ;;  %v5223_v10 = vcombine.high %v5151_v46, %v6443_v53  ;;  %v997_v3 = vsel %vm966_vm0, %v960_v5, 0.0 }
 0x213   : > { %v1860_v0 = vsel %vm966_vm0, %v1834_v2, 0.0  ;;  %v5239_v5 = vcombine.high %v5185_v15, %v6443_v53 }
 0x214   : > { %v962_v31 = vmul.f32 %v5215_v13, %v5215_v13  ;;  %v1836_v37 = vmul.f32 %v5223_v10, %v5223_v10 }
 0x215   : > { %v959_v1 = vmul.f32 %v5239_v5, %v5239_v5 }
 0x216   : > { %989 = vadd.xlane.f32.xlu0 %v988_v6  ;;  %992 = vadd.xlane.f32.xlu1 %v991_v16  ;;  %v1793_v6 = vcombine.low %v1769_v54, %v1785_v24  ;;  %v5229_v16 = vrot.slane %v931_v42, %v5078_v39  ;;  %v1003_v61 = vsel %vm966_vm0, %v962_v31, 0.0  ;;  %v1866_v2 = vsel %vm966_vm0, %v1836_v37, 0.0 }
 0x217   : > { %v994_v31 = vsel %vm966_vm0, %v959_v1, 0.0  ;;  %v1810_v37 = vcombine.high %v1776_v17, %v1792_v33 }
 0x218   : > { %v964_v42 = vmul.f32 %v5229_v16, %v5229_v16  ;;  %v5245_v34 = vrot.slane %v1793_v6, %v5078_v39  ;;  %v5279_v58 = vcombine.high %v5229_v16, %v6443_v53 }
 0x21a   : > { %1855 = vadd.xlane.f32.xlu0 %v1854_v59  ;;  %998 = vadd.xlane.f32.xlu1 %v997_v3  ;;  %v1794_v59 = vcombine.high %v1769_v54, %v1785_v24  ;;  %6444 = vst [vmem:[#allocation57_spill] sm:$0xff] %v5245_v34  ;;  %v5253_v24 = vcombine.high %v5199_v52, %v6443_v53  ;;  %v1009_v3 = vsel %vm966_vm0, %v964_v42, 0.0 }
 0x21b   : > { %v1809_v54 = vcombine.low %v1776_v17, %v1792_v33  ;;  %v1837_v6 = vmul.f32 %v5245_v34, %v5245_v34 }
 0x21c   : > { %v961_v28 = vmul.f32 %v5253_v24, %v5253_v24 }
 0x21d   : > { %v1869_v42 = vsel %vm966_vm0, %v1837_v6, 0.0  ;;  %v5285_v6 = vrot.slane %v1810_v37, %v5078_v39 }
 0x21e   : > { %1861 = vadd.xlane.f32.xlu0 %v1860_v0  ;;  %1004 = vadd.xlane.f32.xlu1 %v1003_v61  ;;  %v5259_v61 = vrot.slane %v1794_v59, %v5078_v39  ;;  %v5266_v0 = vcombine.high %v5215_v13, %v6443_v53  ;;  %v5272_v59 = vrot.slane %v1809_v54, %v5078_v39  ;;  %v1000_v1 = vsel %vm966_vm0, %v961_v28, 0.0 }
 0x21f   : > { %6447 = vst [vmem:[#allocation60_spill] sm:$0xff] %v5285_v6  ;;  %v5292_v28 = vcombine.high %v5245_v34, %v6443_v53 }
 0x220   : > { %6445 = vst [vmem:[#allocation58_spill] sm:$0xff] %v5259_v61  ;;  %6446 = vst [vmem:[#allocation59_spill] sm:$0xff] %v5272_v59  ;;  %v1841_v17 = vmul.f32 %v5272_v59, %v5272_v59 }
 0x221   : > { %6448 = vst [vmem:[#allocation61_spill] sm:$0xff] %v5292_v28 }
 0x222   : > { %1867 = vadd.xlane.f32.xlu0 %v1866_v2  ;;  %1010 = vadd.xlane.f32.xlu1 %v1009_v3  ;;  %v1839_v2 = vmul.f32 %v5259_v61, %v5259_v61  ;;  %v963_v3 = vmul.f32 %v5266_v0, %v5266_v0 }
 0x224   : > { %v1875_v33 = vsel %vm966_vm0, %v1839_v2, 0.0  ;;  %v1006_v54 = vsel %vm966_vm0, %v963_v3, 0.0  ;;  %v1843_v2 = vmul.f32 %v5285_v6, %v5285_v6  ;;  %v5302_v3 = vcombine.high %v5259_v61, %v6443_v53 }
 0x226   : > { %995 = vadd.xlane.f32.xlu0 %v994_v31  ;;  %1870 = vadd.xlane.f32.xlu1 %v1869_v42  ;;  %v965_v31 = vmul.f32 %v5279_v58, %v5279_v58  ;;  %v1881_v42 = vsel %vm966_vm0, %v1841_v17, 0.0  ;;  %6449 = vst [vmem:[#allocation62_spill] sm:$0xff] %v5302_v3  ;;  %v1840_v17 = vmul.f32 %v5302_v3, %v5302_v3 }
 0x228   : > { %v1012_v37 = vsel %vm966_vm0, %v965_v31, 0.0  ;;  %v1878_v31 = vsel %vm966_vm0, %v1840_v17, 0.0 }
 0x22a   : > { %1001 = vadd.xlane.f32.xlu0 %v1000_v1  ;;  %1876 = vadd.xlane.f32.xlu1 %v1875_v33  ;;  %v1838_v1 = vmul.f32 %v5292_v28, %v5292_v28  ;;  %v1887_v33 = vsel %vm966_vm0, %v1843_v2, 0.0 }
 0x22e   : > { %1007 = vadd.xlane.f32.xlu0 %v1006_v54  ;;  %1882 = vadd.xlane.f32.xlu1 %v1881_v42  ;;  %v1872_v54 = vsel %vm966_vm0, %v1838_v1, 0.0  ;;  %v5310_v42 = vcombine.high %v5272_v59, %v6443_v53 }
 0x230   : > { %6450 = vst [vmem:[#allocation63_spill] sm:$0xff] %v5310_v42  ;;  %v1842_v39 = vmul.f32 %v5310_v42, %v5310_v42 }
 0x232   : > { %1013 = vadd.xlane.f32.xlu0 %v1012_v37  ;;  %1888 = vadd.xlane.f32.xlu1 %v1887_v33  ;;  %v5317_v37 = vcombine.high %v5285_v6, %v6443_v53  ;;  %v1884_v2 = vsel %vm966_vm0, %v1842_v39, 0.0 }
 0x234   : > { %6451 = vst [vmem:[#allocation64_spill] sm:$0xff] %v5317_v37  ;;  %v1844_v1 = vmul.f32 %v5317_v37, %v5317_v37 }
 0x236   : > { %1873 = vadd.xlane.f32.xlu0 %v1872_v54  ;;  %v1890_v33 = vsel %vm966_vm0, %v1844_v1, 0.0 }
 0x23a   : > { %1879 = vadd.xlane.f32.xlu0 %v1878_v31 }
 0x23e   : > { %1885 = vadd.xlane.f32.xlu0 %v1884_v2 }
 0x242   : > { %1891 = vadd.xlane.f32.xlu0 %v1890_v33 }
 0x283   : > { %v969_v54 = vpop.xlane.xlu1 %968 }
 0x284   : > { %v1016_v3 = vmul.f32 0.03125, %v969_v54 }
 0x286   : > { %v1032_v17 = vadd.f32 1.1920929e-07, %v1016_v3  ;;  %v6384_v3 = vunpack.i.l.bf16 %v5017_v18 }
 0x287   : > { %v975_v28 = vpop.xlane.xlu1 %974 }
 0x288   : > { %4256 = vrsqrt.f32 %v1032_v17  ;;  %v1018_v42 = vmul.f32 0.03125, %v975_v28 }
 0x28a   : > { %v1034_v59 = vadd.f32 1.1920929e-07, %v1018_v42 }
 0x28b   : > { %v1847_v61 = vpop.xlane.xlu0 %1846  ;;  %v981_v6 = vpop.xlane.xlu1 %980 }
 0x28c   : > { %4258 = vrsqrt.f32 %v1034_v59  ;;  %v1020_v31 = vmul.f32 0.03125, %v981_v6 }
 0x28e   : > { %v1036_v34 = vadd.f32 1.1920929e-07, %v1020_v31  ;;  %v1893_v31 = vmul.f32 0.03125, %v1847_v61 }
 0x28f   : > { %v1853_v39 = vpop.xlane.xlu0 %1852  ;;  %v987_v7 = vpop.xlane.xlu1 %986 }
 0x290   : > { %4260 = vrsqrt.f32 %v1036_v34  ;;  %v1022_v37 = vmul.f32 0.03125, %v987_v7 }
 0x292   : > { %v1038_v2 = vadd.f32 1.1920929e-07, %v1022_v37 }
 0x293   : > { %v972_v43 = vpop.xlane.xlu0 %971 }
 0x294   : > { %v1017_v1 = vmul.f32 0.03125, %v972_v43  ;;  %4262 = vrsqrt.f32 %v1038_v2 }
 0x295   : > { %v4257_v33 = vpop.eup %4256 }
 0x296   : > { %v1033_v54 = vadd.f32 1.1920929e-07, %v1017_v1  ;;  %v5325_v28 = vmul.f32 %v4257_v33, %v5088_v56  ;;  %v1859_v56 = vpop.xlane.xlu1 %1858 }
 0x297   : > { %v978_v17 = vpop.xlane.xlu0 %977 }
 0x298   : > { %4264 = vrsqrt.f32 %v1033_v54  ;;  %v1019_v59 = vmul.f32 0.03125, %v978_v17  ;;  %v1480_v6 = vmul.f32 %v6384_v3, %v5325_v28  ;;  %v4192_v54 = vunpack.i.h.bf16 %v5017_v18 }
 0x299   : > { %v4259_v34 = vpop.eup %4258 }
 0x29a   : > { %v1035_v7 = vadd.f32 1.1920929e-07, %v1019_v59  ;;  %1512 = vrot.lane.b32.xlu0 %v1480_v6, %s4574_s6  ;;  %v5332_v42 = vmul.f32 %v4259_v34, %v5092_v50  ;;  %v1909_v6 = vadd.f32 1.1920929e-07, %v1893_v31  ;;  %v1895_v34 = vmul.f32 0.03125, %v1853_v39  ;;  %v1865_v3 = vpop.xlane.xlu1 %1864 }
 0x29b   : > { %v984_v43 = vpop.xlane.xlu0 %983 }
 0x29c   : > { %4266 = vrsqrt.f32 %v1035_v7  ;;  %v1021_v37 = vmul.f32 0.03125, %v984_v43  ;;  %v1482_v2 = vmul.f32 %v5021_v21, %v5332_v42 }
 0x29d   : > { %v4261_v1 = vpop.eup %4260 }
 0x29e   : > { %v1037_v33 = vadd.f32 1.1920929e-07, %v1021_v37  ;;  %1516 = vrot.lane.b32.xlu0 %v1482_v2, %s4574_s6  ;;  %v5339_v59 = vmul.f32 %v4261_v1, %v5106_v11  ;;  %v1911_v11 = vadd.f32 1.1920929e-07, %v1895_v34  ;;  %v1897_v1 = vmul.f32 0.03125, %v1859_v56 }
 0x29f   : > { %v990_v17 = vpop.xlane.xlu0 %989 }
 0x2a0   : > { %4268 = vrsqrt.f32 %v1037_v33  ;;  %v1023_v50 = vmul.f32 0.03125, %v990_v17  ;;  %v1484_v61 = vmul.f32 %v4192_v54, %v5339_v59  ;;  %v4201_v33 = vunpack.i.l.bf16 %v5043_v40 }
 0x2a1   : > { %v4263_v7 = vpop.eup %4262 }
 0x2a2   : > { %v1039_v43 = vadd.f32 1.1920929e-07, %v1023_v50  ;;  %1520 = vrot.lane.b32.xlu0 %v1484_v61, %s4574_s6  ;;  %v5346_v37 = vmul.f32 %v4263_v7, %v5119_v62  ;;  %v1913_v50 = vadd.f32 1.1920929e-07, %v1897_v1  ;;  %v1899_v61 = vmul.f32 0.03125, %v1865_v3 }
 0x2a3   : > { %v1856_v34 = vpop.xlane.xlu0 %1855  ;;  %v1304_v56 = vmul.f32 %v4201_v33, %v5325_v28 }
 0x2a4   : > { %4270 = vrsqrt.f32 %v1039_v43  ;;  %v1486_v39 = vmul.f32 %v5029_v29, %v5346_v37  ;;  %v1915_v3 = vadd.f32 1.1920929e-07, %v1899_v61 }
 0x2a5   : > { %v4265_v2 = vpop.eup %4264  ;;  %4272 = vrsqrt.f32 %v1909_v6  ;;  %v1850_v6 = vpop.xlane.xlu1 %1849 }
 0x2a6   : > { %v5351_v31 = vmul.f32 %v4265_v2, %v5129_v55  ;;  %1524 = vrot.lane.b32.xlu0 %v1486_v39, %s4574_s6  ;;  %4274 = vrsqrt.f32 %v1911_v11  ;;  %v1894_v7 = vmul.f32 0.03125, %v1850_v6  ;;  %v1306_v11 = vmul.f32 %v5047_v45, %v5332_v42 }
 0x2a7   : > { %4276 = vrsqrt.f32 %v1913_v50  ;;  %v1862_v39 = vpop.xlane.xlu0 %1861 }
 0x2a8   : > { %v1481_v17 = vmul.f32 %v5019_v19, %v5351_v31  ;;  %4278 = vrsqrt.f32 %v1915_v3 }
 0x2a9   : > { %v4267_v62 = vpop.eup %4266 }
 0x2aa   : > { %1514 = vrot.lane.b32.xlu1 %v1481_v17, %s4574_s6  ;;  %v5362_v55 = vmul.f32 %v4267_v62, %v5144_v57  ;;  %1336 = vrot.lane.b32.xlu0 %v1304_v56, %s4574_s6  ;;  %v6385_v57 = vunpack.i.h.bf16 %v5043_v40  ;;  %v1910_v17 = vadd.f32 1.1920929e-07, %v1894_v7  ;;  %v1896_v62 = vmul.f32 0.03125, %v1856_v34  ;;  %v993_v7 = vpop.xlane.xlu1 %992 }
 0x2ab   : > { %v1868_v3 = vpop.xlane.xlu0 %1867 }
 0x2ac   : > { %v1483_v43 = vmul.f32 %v5025_v23, %v5362_v55  ;;  %v1308_v61 = vmul.f32 %v6385_v57, %v5339_v59  ;;  %4280 = vrsqrt.f32 %v1910_v17  ;;  %v1912_v34 = vadd.f32 1.1920929e-07, %v1896_v62 }
 0x2ad   : > { %v4269_v2 = vpop.eup %4268  ;;  %v1900_v17 = vmul.f32 0.03125, %v1868_v3  ;;  %v6452_v62 = vunpack.i.l.bf16 %v5017_v18 }
 0x2ae   : > { %1518 = vrot.lane.b32.xlu1 %v1483_v43, %s4574_s6  ;;  %v5371_v1 = vmul.f32 %v4269_v2, %v5162_v27  ;;  %1340 = vrot.lane.b32.xlu0 %v1306_v11, %s4574_s6  ;;  %v1898_v43 = vmul.f32 0.03125, %v1862_v39  ;;  %v1310_v11 = vmul.f32 %v5057_v12, %v5346_v37  ;;  %4282 = vrsqrt.f32 %v1912_v34 }
 0x2af   : > { %v1305_v39 = vmul.f32 %v5049_v47, %v5351_v31  ;;  %v1916_v34 = vadd.f32 1.1920929e-07, %v1900_v17 }
 0x2b0   : > { %v1485_v6 = vmul.f32 %v5023_v22, %v5371_v1 }
 0x2b1   : > { %v4271_v50 = vpop.eup %4270 }
 0x2b2   : > { %v4273_v56 = vpop.eup %4272  ;;  %1522 = vrot.lane.b32.xlu1 %v1485_v6, %s4574_s6  ;;  %v5382_v27 = vmul.f32 %v4271_v50, %v5179_v44  ;;  %1344 = vrot.lane.b32.xlu0 %v1308_v61, %s4574_s6  ;;  %v1914_v44 = vadd.f32 1.1920929e-07, %v1898_v43  ;;  %v1307_v43 = vmul.f32 %v5053_v51, %v5362_v55 }
 0x2b3   : > { %v5390_v57 = vmul.f32 %v4273_v56, %v5110_v14  ;;  %v4275_v6 = vpop.eup %4274  ;;  %v999_v56 = vpop.xlane.xlu1 %998 }
 0x2b4   : > { %v1487_v2 = vmul.f32 %v5027_v26, %v5382_v27  ;;  %v5400_v61 = vmul.f32 %v4275_v6, %v5113_v49  ;;  %v4277_v14 = vpop.eup %4276  ;;  %4284 = vrsqrt.f32 %v1914_v44  ;;  %v4240_v6 = vld [vmem:[#allocation5 + $0xb8] sm:$0xff]   ;;  %v1309_v44 = vmul.f32 %v5051_v48, %v5371_v1 }
 0x2b5   : > { %v2101_v50 = vmul.f32 %v6452_v62, %v5390_v57  ;;  %v4279_v49 = vpop.eup %4278  ;;  %4286 = vrsqrt.f32 %v1916_v34  ;;  %4000 = vmatpush3.bf16.xpose.msra.mxu1 %v4240_v6  ;;  %v1026_v62 = vmul.f32 0.03125, %v999_v56 }
 0x2b6   : > { %1526 = vrot.lane.b32.xlu1 %v1487_v2, %s4574_s6  ;;  %1348 = vrot.lane.b32.xlu0 %v1310_v11, %s4574_s6  ;;  %v1024_v2 = vmul.f32 0.03125, %v993_v7  ;;  %v2103_v3 = vmul.f32 %v5400_v61, %v5021_v21  ;;  %v5409_v11 = vmul.f32 %v4277_v14, %v5135_v9  ;;  %v5419_v9 = vmul.f32 %v4279_v49, %v5151_v46 }
 0x2b7   : > { %4001 = vmatprep.subr.bf16.mxu1 %v6443_v53  ;;  %v1311_v14 = vmul.f32 %v5055_v60, %v5382_v27  ;;  %v1042_v18 = vadd.f32 1.1920929e-07, %v1026_v62 }
 0x2b8   : > { %v1040_v7 = vadd.f32 1.1920929e-07, %v1024_v2  ;;  %v2105_v21 = vmul.f32 %v4192_v54, %v5409_v11  ;;  %v2107_v46 = vmul.f32 %v5419_v9, %v5029_v29  ;;  %v4241_v2 = vld [vmem:[#allocation5 + $0xb0] sm:$0xff]   ;;  %v1973_v29 = vmul.f32 %v4201_v33, %v5390_v57  ;;  %v4242_v33 = vld [vmem:[#allocation5 + $0xa8] sm:$0xff]  }
 0x2b9   : > { %v4281_v17 = vpop.eup %4280 }
 0x2ba   : > { %1338 = vrot.lane.b32.xlu1 %v1305_v39, %s4574_s6  ;;  %2133 = vrot.lane.b32.xlu0 %v2101_v50, %s4574_s6  ;;  %v1005_v39 = vpop.xlane.xlu1 %1004  ;;  %v996_v50 = vpop.xlane.xlu0 %995  ;;  %v5427_v34 = vmul.f32 %v4281_v17, %v5169_v20  ;;  %4288 = vrsqrt.f32 %v1040_v7 }
 0x2bb   : > { %v4283_v56 = vpop.eup %4282  ;;  %v1028_v54 = vmul.f32 0.03125, %v1005_v39  ;;  %4290 = vrsqrt.f32 %v1042_v18  ;;  %v6453_v18 = vunpack.i.h.bf16 %v5043_v40 }
 0x2bc   : > { %v5436_v49 = vmul.f32 %v4283_v56, %v5193_v41 }
 0x2bd   : > { %4002 = vmatpush3.bf16.xpose.msra.mxu1 %v4241_v2  ;;  %v1044_v6 = vadd.f32 1.1920929e-07, %v1028_v54 }
 0x2be   : > { %1342 = vrot.lane.b32.xlu1 %v1307_v43, %s4574_s6  ;;  %2137 = vrot.lane.b32.xlu0 %v2103_v3, %s4574_s6  ;;  %v1011_v43 = vpop.xlane.xlu1 %1010  ;;  %v2102_v3 = vmul.f32 %v5427_v34, %v5019_v19  ;;  %v1025_v19 = vmul.f32 0.03125, %v996_v50  ;;  %v2104_v41 = vmul.f32 %v5436_v49, %v5025_v23 }
 0x2bf   : > { %v1030_v39 = vmul.f32 0.03125, %v1011_v43  ;;  %4003 = vmatprep.subr.bf16.mxu1 %v6443_v53  ;;  %4292 = vrsqrt.f32 %v1044_v6  ;;  %v4243_v6 = vld [vmem:[#allocation5 + $0xa0] sm:$0xff]  }
 0x2c0   : > { %v1041_v56 = vadd.f32 1.1920929e-07, %v1025_v19 }
 0x2c1   : > { %v4285_v20 = vpop.eup %4284  ;;  %v1046_v62 = vadd.f32 1.1920929e-07, %v1030_v39  ;;  %v4196_v39 = vunpack.i.l.bf16 %v5033_v25 }
 0x2c2   : > { %1346 = vrot.lane.b32.xlu1 %v1309_v44, %s4574_s6  ;;  %2141 = vrot.lane.b32.xlu0 %v2105_v21, %s4574_s6  ;;  %v1002_v44 = vpop.xlane.xlu0 %1001  ;;  %v5447_v17 = vmul.f32 %v4285_v20, %v5208_v8  ;;  %v4287_v7 = vpop.eup %4286  ;;  %v1975_v21 = vmul.f32 %v5400_v61, %v5047_v45  ;;  %v1977_v45 = vmul.f32 %v6453_v18, %v5409_v11 }
 0x2c3   : > { %v1027_v50 = vmul.f32 0.03125, %v1002_v44  ;;  %v5456_v8 = vmul.f32 %v4287_v7, %v5223_v10  ;;  %4294 = vrsqrt.f32 %v1046_v62 }
 0x2c4   : > { %v2106_v23 = vmul.f32 %v5447_v17, %v5023_v22  ;;  %4296 = vrsqrt.f32 %v1041_v56  ;;  %v4197_v56 = vunpack.i.h.bf16 %v5033_v25 }
 0x2c5   : > { %4004 = vmatpush3.bf16.xpose.msra.mxu1 %v4242_v33  ;;  %v1043_v43 = vadd.f32 1.1920929e-07, %v1027_v50  ;;  %v2108_v10 = vmul.f32 %v5456_v8, %v5027_v26  ;;  %v1974_v26 = vmul.f32 %v5427_v34, %v5049_v47  ;;  %v1976_v47 = vmul.f32 %v5436_v49, %v5053_v51 }
 0x2c6   : > { %1350 = vrot.lane.b32.xlu1 %v1311_v14, %s4574_s6  ;;  %2145 = vrot.lane.b32.xlu0 %v2107_v46, %s4574_s6  ;;  %v1008_v14 = vpop.xlane.xlu0 %1007  ;;  %v1871_v46 = vpop.xlane.xlu1 %1870  ;;  %v1978_v51 = vmul.f32 %v5447_v17, %v5051_v48  ;;  %v1980_v48 = vmul.f32 %v5456_v8, %v5055_v60 }
 0x2c7   : > { %4005 = vmatprep.subr.bf16.mxu1 %v6443_v53  ;;  %v4289_v54 = vpop.eup %4288  ;;  %v1029_v22 = vmul.f32 0.03125, %v1008_v14  ;;  %4298 = vrsqrt.f32 %v1043_v43  ;;  %v1901_v62 = vmul.f32 0.03125, %v1871_v46  ;;  %v4244_v14 = vld [vmem:[#allocation5 + $0x98] sm:$0xff]  }
 0x2c8   : > { %v5469_v40 = vmul.f32 %v4289_v54, %v5185_v15  ;;  %v4291_v20 = vpop.eup %4290 }
 0x2c9   : > { %v1045_v44 = vadd.f32 1.1920929e-07, %v1029_v22  ;;  %v5480_v15 = vmul.f32 %v4291_v20, %v5199_v52  ;;  %v1917_v18 = vadd.f32 1.1920929e-07, %v1901_v62  ;;  %v4245_v20 = vld [vmem:[#allocation5 + $0x90] sm:$0xff]  }
 0x2ca   : > { %2135 = vrot.lane.b32.xlu1 %v2102_v3, %s4574_s6  ;;  %2005 = vrot.lane.b32.xlu0 %v1973_v29, %s4574_s6  ;;  %v1014_v2 = vpop.xlane.xlu0 %1013  ;;  %v1979_v3 = vmul.f32 %v5419_v9, %v5057_v12  ;;  %v1488_v12 = vmul.f32 %v4196_v39, %v5469_v40 }
 0x2cb   : > { %v1031_v29 = vmul.f32 0.03125, %v1014_v2  ;;  %4300 = vrsqrt.f32 %v1045_v44 }
 0x2cc   : > { %v4293_v19 = vpop.eup %4292 }
 0x2cd   : > { %4006 = vmatpush3.bf16.xpose.msra.mxu1 %v4243_v6  ;;  %v1047_v7 = vadd.f32 1.1920929e-07, %v1031_v29  ;;  %v5490_v52 = vmul.f32 %v4293_v19, %v5215_v13  ;;  %v4206_v6 = vunpack.i.l.bf16 %v5061_v63 }
 0x2ce   : > { %2139 = vrot.lane.b32.xlu1 %v2104_v41, %s4574_s6  ;;  %2009 = vrot.lane.b32.xlu0 %v1975_v21, %s4574_s6  ;;  %v1877_v41 = vpop.xlane.xlu1 %1876  ;;  %v1490_v21 = vmul.f32 %v5037_v35, %v5480_v15  ;;  %v1874_v46 = vpop.xlane.xlu0 %1873 }
 0x2cf   : > { %4007 = vmatprep.subr.bf16.mxu1 %v6443_v53  ;;  %4302 = vrsqrt.f32 %v1047_v7  ;;  %v1492_v13 = vmul.f32 %v4197_v56, %v5490_v52  ;;  %v1312_v19 = vmul.f32 %v4206_v6, %v5469_v40 }
 0x2d0   : > { %v4295_v33 = vpop.eup %4294  ;;  %4304 = vrsqrt.f32 %v1917_v18 }
 0x2d1   : > { %v5501_v54 = vmul.f32 %v4295_v33, %v5229_v16  ;;  %v4246_v33 = vld [vmem:[#allocation5 + $0x88] sm:$0xff]  }
 0x2d2   : > { %2143 = vrot.lane.b32.xlu1 %v2106_v23, %s4574_s6  ;;  %2013 = vrot.lane.b32.xlu0 %v1977_v45, %s4574_s6  ;;  %v1883_v50 = vpop.xlane.xlu1 %1882  ;;  %v4297_v23 = vpop.eup %4296  ;;  %v1903_v45 = vmul.f32 0.03125, %v1877_v41  ;;  %v1902_v41 = vmul.f32 0.03125, %v1874_v46 }
 0x2d3   : > { %v5509_v43 = vmul.f32 %v4297_v23, %v5239_v5  ;;  %v1905_v2 = vmul.f32 0.03125, %v1883_v50  ;;  %v1494_v16 = vmul.f32 %v5039_v36, %v5501_v54 }
 0x2d4   : > { %v4299_v22 = vpop.eup %4298 }
 0x2d5   : > { %4008 = vmatpush3.bf16.xpose.msra.mxu1 %v4244_v14  ;;  %v1489_v60 = vmul.f32 %v5031_v30, %v5509_v43  ;;  %v5519_v5 = vmul.f32 %v4299_v22, %v5253_v24  ;;  %v1921_v29 = vadd.f32 1.1920929e-07, %v1905_v2  ;;  %v4207_v14 = vunpack.i.h.bf16 %v5061_v63  ;;  %v6454_v22 = vld [vmem:[#allocation49_spill] sm:$0xff]  ;;  %v6455_v2 = vld [vmem:[#allocation52_spill] sm:$0xff] }
 0x2d6   : > { %2147 = vrot.lane.b32.xlu1 %v2108_v10, %s4574_s6  ;;  %2017 = vrot.lane.b32.xlu0 %v1979_v3, %s4574_s6  ;;  %v1919_v10 = vadd.f32 1.1920929e-07, %v1903_v45  ;;  %v1889_v3 = vpop.xlane.xlu1 %1888  ;;  %v1402_v63 = vsub.f32 0.0, %v5332_v42 }
 0x2d7   : > { %4009 = vmatprep.subr.bf16.mxu1 %v6443_v53  ;;  %v1491_v24 = vmul.f32 %v5035_v32, %v5519_v5  ;;  %v1316_v45 = vmul.f32 %v4207_v14, %v5490_v52 }
 0x2d8   : > { %v4301_v44 = vpop.eup %4300  ;;  %4306 = vrsqrt.f32 %v1919_v10 }
 0x2d9   : > { %v5530_v7 = vmul.f32 %v4301_v44, %v5266_v0  ;;  %4308 = vrsqrt.f32 %v1921_v29  ;;  %v4247_v44 = vld [vmem:[#allocation5 + $0x80] sm:$0xff]  }
 0x2da   : > { %2007 = vrot.lane.b32.xlu1 %v1974_v26, %s4574_s6  ;;  %1528 = vrot.lane.b32.xlu0 %v1488_v12, %s4574_s6  ;;  %v1907_v26 = vmul.f32 0.03125, %v1889_v3  ;;  %v1880_v12 = vpop.xlane.xlu0 %1879  ;;  %v6456_v3 = vld [vmem:[#allocation57_spill] sm:$0xff] }
 0x2db   : > { %v1904_v23 = vmul.f32 0.03125, %v1880_v12  ;;  %v1493_v0 = vmul.f32 %v5041_v38, %v5530_v7  ;;  %v6457_v12 = vld [vmem:[#allocation50_spill] sm:$0xff] }
 0x2dc   : > { %v1923_v62 = vadd.f32 1.1920929e-07, %v1907_v26 }
 0x2dd   : > { %4010 = vmatpush3.bf16.xpose.msra.mxu1 %v4245_v20  ;;  %v1920_v46 = vadd.f32 1.1920929e-07, %v1904_v23 }
 0x2de   : > { %2011 = vrot.lane.b32.xlu1 %v1976_v47, %s4574_s6  ;;  %1532 = vrot.lane.b32.xlu0 %v1490_v21, %s4574_s6  ;;  %v4303_v47 = vpop.eup %4302  ;;  %v1314_v21 = vmul.f32 %v5065_v4, %v5480_v15  ;;  %v1886_v50 = vpop.xlane.xlu0 %1885  ;;  %4310 = vrsqrt.f32 %v1923_v62 }
 0x2df   : > { %4011 = vmatprep.subr.bf16.mxu1 %v6443_v53  ;;  %v5540_v18 = vmul.f32 %v4303_v47, %v5279_v58 }
 0x2e1   : > { %v1495_v58 = vmul.f32 %v6454_v22, %v5540_v18 }
 0x2e2   : > { %2015 = vrot.lane.b32.xlu1 %v1978_v51, %s4574_s6  ;;  %1536 = vrot.lane.b32.xlu0 %v1492_v13, %s4574_s6  ;;  %v1918_v51 = vadd.f32 1.1920929e-07, %v1902_v41  ;;  %v4305_v13 = vpop.eup %4304  ;;  %v1892_v10 = vpop.xlane.xlu0 %1891 }
 0x2e3   : > { %v5553_v20 = vmul.f32 %v4305_v13, %v6456_v3  ;;  %v1908_v26 = vmul.f32 0.03125, %v1892_v10  ;;  %v6462_v13 = vld [vmem:[#allocation53_spill] sm:$0xff] }
 0x2e4   : > { %4312 = vrsqrt.f32 %v1918_v51  ;;  %v6460_v51 = vld [vmem:[#allocation59_spill] sm:$0xff] }
 0x2e5   : > { %4012 = vmatpush3.bf16.xpose.msra.mxu1 %v4246_v33  ;;  %4314 = vrsqrt.f32 %v1920_v46  ;;  %v2109_v41 = vmul.f32 %v4196_v39, %v5553_v20  ;;  %v6459_v33 = vld [vmem:[#allocation51_spill] sm:$0xff]  ;;  %v1317_v46 = vmul.f32 %v6462_v13, %v5530_v7 }
 0x2e6   : > { %2019 = vrot.lane.b32.xlu1 %v1980_v48, %s4574_s6  ;;  %1540 = vrot.lane.b32.xlu0 %v1494_v16, %s4574_s6  ;;  %v1906_v48 = vmul.f32 0.03125, %v1886_v50  ;;  %v1318_v16 = vmul.f32 %v6455_v2, %v5501_v54  ;;  %v1315_v39 = vmul.f32 %v6459_v33, %v5519_v5 }
 0x2e7   : > { %4013 = vmatprep.subr.bf16.mxu1 %v6443_v53 }
 0x2e8   : > { %v1922_v29 = vadd.f32 1.1920929e-07, %v1906_v48 }
 0x2ea   : > { %1530 = vrot.lane.b32.xlu1 %v1489_v60, %s4574_s6  ;;  %1352 = vrot.lane.b32.xlu0 %v1312_v19, %s4574_s6  ;;  %v4307_v60 = vpop.eup %4306  ;;  %v1313_v19 = vmul.f32 %v6457_v12, %v5509_v43  ;;  %4316 = vrsqrt.f32 %v1922_v29 }
 0x2eb   : > { %v4309_v62 = vpop.eup %4308 }
 0x2ec   : > { %v5577_v23 = vmul.f32 %v4309_v62, %v6460_v51  ;;  %v6468_v62 = vld [vmem:[#allocation63_spill] sm:$0xff]  ;;  %v6469_v51 = vld [vmem:[#allocation64_spill] sm:$0xff] }
 0x2ed   : > { %4014 = vmatpush3.bf16.xpose.msra.mxu1 %v4247_v44 }
 0x2ee   : > { %1534 = vrot.lane.b32.xlu1 %v1491_v24, %s4574_s6  ;;  %1356 = vrot.lane.b32.xlu0 %v1314_v21, %s4574_s6  ;;  %v6458_v24 = vld [vmem:[#allocation58_spill] sm:$0xff]  ;;  %v1924_v21 = vadd.f32 1.1920929e-07, %v1908_v26  ;;  %6461 = vst [vmem:[#allocation49_spill] sm:$0xff] %v5577_v23 }
 0x2ef   : > { %v5563_v47 = vmul.f32 %v4307_v60, %v6458_v24  ;;  %4019 = vmatprep.subr.bf16.mxu1 %v6443_v53  ;;  %v6466_v60 = vld [vmem:[#allocation61_spill] sm:$0xff]  ;;  %v1981_v24 = vmul.f32 %v4206_v6, %v5553_v20 }
 0x2f0   : > { %4318 = vrsqrt.f32 %v1924_v21 }
 0x2f1   : > { %v2111_v50 = vmul.f32 %v5563_v47, %v5037_v35  ;;  %v2113_v35 = vmul.f32 %v4197_v56, %v5577_v23  ;;  %v6467_v56 = vld [vmem:[#allocation62_spill] sm:$0xff] }
 0x2f2   : > { %1538 = vrot.lane.b32.xlu1 %v1493_v0, %s4574_s6  ;;  %1360 = vrot.lane.b32.xlu0 %v1316_v45, %s4574_s6  ;;  %v4311_v0 = vpop.eup %4310  ;;  %v4352_v45 = vld [vmem:[%s4771_s23] sm:$0xff]   ;;  %s4489_s23 = sshll.u32 %s4576_s22, 4  ;;  %s4490_s23 = int_to_ptr.vmem [resolvable:$false] %s4489_s23 }
 0x2f3   : > { %v4313_v48 = vpop.eup %4312  ;;  %p4492_p13 = scmp.lt.s32.totalorder %s6238_s27, %s4490_s23 }
 0x2f4   : > { %4016 = vmatmul.mubr.bf16.vlgmr.msra.gmra.mxu1 %v4352_v45  ;;  %v5597_v44 = vmul.f32 %v4313_v48, %v6466_v60  ;;  %v4315_v29 = vpop.eup %4314 }
 0x2f5   : > { %4021 = vmatprep.mubr.msk.bf16.mxu1 %vm4575_vm1, %v6443_v53 }
 0x2f6   : > { %1542 = vrot.lane.b32.xlu1 %v1495_v58, %s4574_s6  ;;  %1364 = vrot.lane.b32.xlu0 %v1318_v16, %s4574_s6  ;;  %v6463_v58 = vld [vmem:[#allocation60_spill] sm:$0xff]  ;;  %v6465_v16 = vld [vmem:[#allocation54_spill] sm:$0xff]  ;;  %v2110_v25 = vmul.f32 %v5597_v44, %v5031_v30 }
 0x2f7   : > { %v5590_v10 = vmul.f32 %v4311_v0, %v6463_v58  ;;  %v1319_v3 = vmul.f32 %v6465_v16, %v5540_v18 }
 0x2f9   : > { %6464 = vst [vmem:[#allocation52_spill] sm:$0xff] %v5590_v10  ;;  %v2115_v26 = vmul.f32 %v5590_v10, %v5039_v36 }
 0x2fa   : > { %1354 = vrot.lane.b32.xlu1 %v1313_v19, %s4574_s6  ;;  %2149 = vrot.lane.b32.xlu0 %v2109_v41, %s4574_s6  ;;  %v5606_v19 = vmul.f32 %v4315_v29, %v6467_v56  ;;  %v4317_v41 = vpop.eup %4316 }
 0x2fb   : > { %v5616_v21 = vmul.f32 %v4317_v41, %v6468_v62 }
 0x2fc   : > { %v2112_v36 = vmul.f32 %v5606_v19, %v5035_v32  ;;  %v1985_v32 = vmul.f32 %v4207_v14, %v5577_v23  ;;  %v1982_v14 = vmul.f32 %v5597_v44, %v6457_v12  ;;  %v6472_v12 = vld [vmem:[#allocation31_spill] sm:$0xff] }
 0x2fd   : > { %v2114_v6 = vmul.f32 %v5616_v21, %v5041_v38  ;;  %v1987_v38 = vmul.f32 %v5590_v10, %v6455_v2 }
 0x2fe   : > { %1358 = vrot.lane.b32.xlu1 %v1315_v39, %s4574_s6  ;;  %2153 = vrot.lane.b32.xlu0 %v2111_v50, %s4574_s6  ;;  %v4319_v39 = vpop.eup %4318  ;;  %v1983_v50 = vmul.f32 %v5563_v47, %v5065_v4 }
 0x2ff   : > { %v5625_v0 = vmul.f32 %v4319_v39, %v6469_v51  ;;  %v1986_v39 = vmul.f32 %v5616_v21, %v6462_v13 }
 0x301   : > { %v2116_v4 = vmul.f32 %v5625_v0, %v6454_v22  ;;  %v6471_v22 = vld [vmem:[#allocation34_spill] sm:$0xff] }
 0x302   : > { %1362 = vrot.lane.b32.xlu1 %v1317_v46, %s4574_s6  ;;  %2157 = vrot.lane.b32.xlu0 %v2113_v35, %s4574_s6  ;;  %v1400_v46 = vsub.f32 0.0, %v5325_v28  ;;  %v6470_v35 = vld [vmem:[#allocation30_spill] sm:$0xff]  ;;  %v1418_v29 = vmul.f32 %v1402_v63, %v6471_v22 }
 0x304   : > { %v1416_v58 = vmul.f32 %v1400_v46, %v6470_v35 }
 0x306   : > { %1366 = vrot.lane.b32.xlu1 %v1319_v3, %s4574_s6  ;;  %2161 = vrot.lane.b32.xlu0 %v2115_v26, %s4574_s6  ;;  %v1404_v26 = vsub.f32 0.0, %v5339_v59 }
 0x30a   : > { %2151 = vrot.lane.b32.xlu1 %v2110_v25, %s4574_s6  ;;  %2021 = vrot.lane.b32.xlu0 %v1981_v24, %s4574_s6  ;;  %v1984_v25 = vmul.f32 %v5606_v19, %v6459_v33  ;;  %v1420_v24 = vmul.f32 %v1404_v26, %v6472_v12  ;;  %v1401_v33 = vsub.f32 0.0, %v5351_v31 }
 0x30c   : > { %v1513_v30 = vpop.permute.xlu0 %1512 }
 0x30d   : > { %v1560_v3 = vadd.f32 %v1513_v30, %v1416_v58 }
 0x30e   : > { %2155 = vrot.lane.b32.xlu1 %v2112_v36, %s4574_s6  ;;  %2025 = vrot.lane.b32.xlu0 %v1983_v50, %s4574_s6  ;;  %v1406_v36 = vsub.f32 0.0, %v5346_v37 }
 0x310   : > { %v1517_v45 = vpop.permute.xlu0 %1516 }
 0x311   : > { %v1562_v56 = vadd.f32 %v1517_v45, %v1418_v29  ;;  %v6475_v29 = vld [vmem:[#allocation39_spill] sm:$0xff] }
 0x312   : > { %2159 = vrot.lane.b32.xlu1 %v2114_v6, %s4574_s6  ;;  %2029 = vrot.lane.b32.xlu0 %v1985_v32, %s4574_s6  ;;  %v6473_v6 = vld [vmem:[#allocation41_spill] sm:$0xff]  ;;  %v1988_v32 = vmul.f32 %v5625_v0, %v6465_v16  ;;  %v1405_v16 = vsub.f32 0.0, %v5371_v1 }
 0x313   : > { %v1422_v51 = vmul.f32 %v1406_v36, %v6473_v6 }
 0x314   : > { %v1521_v48 = vpop.permute.xlu0 %1520 }
 0x315   : > { %v1564_v30 = vadd.f32 %v1521_v48, %v1420_v24  ;;  %v1403_v48 = vsub.f32 0.0, %v5362_v55  ;;  %v2071_v24 = vsub.f32 0.0, %v5400_v61 }
 0x316   : > { %2163 = vrot.lane.b32.xlu1 %v2116_v4, %s4574_s6  ;;  %2033 = vrot.lane.b32.xlu0 %v1987_v38, %s4574_s6  ;;  %v6474_v38 = vld [vmem:[#allocation37_spill] sm:$0xff] }
 0x317   : > { %v1417_v13 = vmul.f32 %v1401_v33, %v6474_v38  ;;  %v1419_v26 = vmul.f32 %v1403_v48, %v6475_v29 }
 0x318   : > { %v1525_v60 = vpop.permute.xlu0 %1524 }
 0x319   : > { %v1566_v46 = vadd.f32 %v1525_v60, %v1422_v51 }
 0x31a   : > { %2023 = vrot.lane.b32.xlu1 %v1982_v14, %s4574_s6  ;;  %1592 = vrot.lane.b32.xlu0 %v1560_v3, %s4567_s24  ;;  %v2069_v14 = vsub.f32 0.0, %v5390_v57 }
 0x31c   : > { %v1515_v2 = vpop.permute.xlu1 %1514  ;;  %v5649_v41 = vpop.permute.xlu0 %1336 }
 0x31d   : > { %v1561_v58 = vadd.f32 %v1515_v2, %v1417_v13  ;;  %v6476_v2 = vld [vmem:[#allocation36_spill] sm:$0xff]  ;;  %v6477_v13 = vld [vmem:[#allocation38_spill] sm:$0xff] }
 0x31e   : > { %2027 = vrot.lane.b32.xlu1 %v1984_v25, %s4574_s6  ;;  %1596 = vrot.lane.b32.xlu0 %v1562_v56, %s4567_s24  ;;  %v2085_v56 = vmul.f32 %v2069_v14, %v6470_v35 }
 0x320   : > { %v1519_v62 = vpop.permute.xlu1 %1518  ;;  %v5657_v50 = vpop.permute.xlu0 %1340 }
 0x321   : > { %v1563_v60 = vadd.f32 %v1519_v62, %v1419_v26  ;;  %v2087_v62 = vmul.f32 %v2071_v24, %v6471_v22  ;;  %v2070_v22 = vsub.f32 0.0, %v5427_v34 }
 0x322   : > { %2031 = vrot.lane.b32.xlu1 %v1986_v39, %s4574_s6  ;;  %1600 = vrot.lane.b32.xlu0 %v1564_v30, %s4567_s24  ;;  %v1421_v39 = vmul.f32 %v1405_v16, %v6476_v2  ;;  %v1407_v30 = vsub.f32 0.0, %v5382_v27  ;;  %v2075_v16 = vsub.f32 0.0, %v5419_v9 }
 0x324   : > { %v1523_v45 = vpop.permute.xlu1 %1522  ;;  %v5665_v4 = vpop.permute.xlu0 %1344  ;;  %v1423_v48 = vmul.f32 %v1407_v30, %v6477_v13  ;;  %v2086_v30 = vmul.f32 %v2070_v22, %v6474_v38  ;;  %v6479_v38 = vld [vmem:[#allocation21_spill] sm:$0xff]  ;;  %v2076_v22 = vsub.f32 0.0, %v5456_v8 }
 0x325   : > { %v1565_v51 = vadd.f32 %v1523_v45, %v1421_v39 }
 0x326   : > { %2035 = vrot.lane.b32.xlu1 %v1988_v32, %s4574_s6  ;;  %1604 = vrot.lane.b32.xlu0 %v1566_v46, %s4567_s24  ;;  %v2073_v46 = vsub.f32 0.0, %v5409_v11 }
 0x328   : > { %v1527_v63 = vpop.permute.xlu1 %1526  ;;  %v5672_v3 = vpop.permute.xlu0 %1348  ;;  %v2089_v45 = vmul.f32 %v2073_v46, %v6472_v12  ;;  %v2072_v12 = vsub.f32 0.0, %v5436_v49 }
 0x329   : > { %v1567_v14 = vadd.f32 %v1527_v63, %v1423_v48  ;;  %v2091_v63 = vmul.f32 %v2075_v16, %v6473_v6 }
 0x32a   : > { %1594 = vrot.lane.b32.xlu1 %v1561_v58, %s4567_s24  ;;  %v2088_v6 = vmul.f32 %v2072_v12, %v6475_v29 }
 0x32c   : > { %v5677_v25 = vpop.permute.xlu1 %1338  ;;  %v2134_v36 = vpop.permute.xlu0 %2133 }
 0x32d   : > { %v2181_v33 = vadd.f32 %v2134_v36, %v2085_v56 }
 0x32e   : > { %1598 = vrot.lane.b32.xlu1 %v1563_v60, %s4567_s24 }
 0x32f   : > { %2213 = vrot.lane.b32.xlu0 %v2181_v33, %s4567_s24 }
 0x330   : > { %v5685_v32 = vpop.permute.xlu1 %1342  ;;  %v2138_v35 = vpop.permute.xlu0 %2137 }
 0x331   : > { %v2183_v58 = vadd.f32 %v2138_v35, %v2087_v62 }
 0x332   : > { %1602 = vrot.lane.b32.xlu1 %v1565_v51, %s4567_s24  ;;  %v6478_v51 = vld [vmem:[#allocation17_spill] sm:$0xff] }
 0x333   : > { %2217 = vrot.lane.b32.xlu0 %v2183_v58, %s4567_s24  ;;  %v1957_v62 = vmul.f32 %v5390_v57, %v6478_v51  ;;  %v2074_v58 = vsub.f32 0.0, %v5447_v17 }
 0x334   : > { %v5692_v26 = vpop.permute.xlu1 %1346  ;;  %v2142_v60 = vpop.permute.xlu0 %2141 }
 0x335   : > { %v2185_v56 = vadd.f32 %v2142_v60, %v2089_v45  ;;  %v1959_v45 = vmul.f32 %v5400_v61, %v6479_v38  ;;  %v2090_v57 = vmul.f32 %v2074_v58, %v6476_v2  ;;  %v2092_v61 = vmul.f32 %v2076_v22, %v6477_v13 }
 0x336   : > { %1606 = vrot.lane.b32.xlu1 %v1567_v14, %s4567_s24  ;;  %v1408_v2 = vsub.f32 0.0, %v5469_v40  ;;  %v1410_v13 = vsub.f32 0.0, %v5480_v15 }
 0x337   : > { %2221 = vrot.lane.b32.xlu0 %v2185_v56, %s4567_s24 }
 0x338   : > { %v5699_v24 = vpop.permute.xlu1 %1350  ;;  %v2146_v36 = vpop.permute.xlu0 %2145 }
 0x339   : > { %v2187_v39 = vadd.f32 %v2146_v36, %v2091_v63  ;;  %v6480_v36 = vld [vmem:[#allocation18_spill] sm:$0xff] }
 0x33a   : > { %v1961_v29 = vmul.f32 %v5409_v11, %v6480_v36  ;;  %v6484_v11 = vld [vmem:[#allocation19_spill] sm:$0xff] }
 0x33b   : > { %2225 = vrot.lane.b32.xlu0 %v2187_v39, %s4567_s24 }
 0x33c   : > { %v2136_v33 = vpop.permute.xlu1 %2135  ;;  %v2006_v35 = vpop.permute.xlu0 %2005 }
 0x33d   : > { %v2182_v46 = vadd.f32 %v2136_v33, %v2086_v30  ;;  %v5707_v48 = vadd.f32 %v2006_v35, %v1957_v62  ;;  %v6482_v62 = vld [vmem:[#allocation25_spill] sm:$0xff] }
 0x33f   : > { %2215 = vrot.lane.b32.xlu1 %v2182_v46, %s4567_s24  ;;  %v1963_v46 = vmul.f32 %v5419_v9, %v6482_v62 }
 0x340   : > { %v2140_v14 = vpop.permute.xlu1 %2139  ;;  %v2010_v60 = vpop.permute.xlu0 %2009 }
 0x341   : > { %v2184_v16 = vadd.f32 %v2140_v14, %v2088_v6  ;;  %v5714_v56 = vadd.f32 %v2010_v60, %v1959_v45  ;;  %v1958_v14 = vmul.f32 %v5427_v34, %v6484_v11 }
 0x343   : > { %2219 = vrot.lane.b32.xlu1 %v2184_v16, %s4567_s24  ;;  %v6485_v16 = vld [vmem:[#allocation42_spill] sm:$0xff] }
 0x344   : > { %v2144_v63 = vpop.permute.xlu1 %2143  ;;  %v2014_v30 = vpop.permute.xlu0 %2013  ;;  %v1424_v60 = vmul.f32 %v1408_v2, %v6485_v16 }
 0x345   : > { %v2186_v39 = vadd.f32 %v2144_v63, %v2090_v57  ;;  %v5721_v12 = vadd.f32 %v2014_v30, %v1961_v29  ;;  %v6487_v63 = vld [vmem:[#allocation23_spill] sm:$0xff]  ;;  %v6488_v30 = vld [vmem:[#allocation46_spill] sm:$0xff] }
 0x346   : > { %v1960_v29 = vmul.f32 %v5436_v49, %v6487_v63  ;;  %v6492_v49 = vld [vmem:[#allocation22_spill] sm:$0xff] }
 0x347   : > { %6481 = vst [vmem:[#allocation57_spill] sm:$0xff] %v5721_v12  ;;  %2223 = vrot.lane.b32.xlu1 %v2186_v39, %s4567_s24 }
 0x348   : > { %v2148_v33 = vpop.permute.xlu1 %2147  ;;  %v2018_v6 = vpop.permute.xlu0 %2017 }
 0x349   : > { %v2188_v35 = vadd.f32 %v2148_v33, %v2092_v61  ;;  %v5728_v58 = vadd.f32 %v2018_v6, %v1963_v46  ;;  %v1426_v61 = vmul.f32 %v1410_v13, %v6488_v30 }
 0x34b   : > { %6483 = vst [vmem:[#allocation50_spill] sm:$0xff] %v5728_v58  ;;  %2227 = vrot.lane.b32.xlu1 %v2188_v35, %s4567_s24  ;;  %v6490_v35 = vld [vmem:[#allocation20_spill] sm:$0xff] }
 0x34c   : > { %v2008_v45 = vpop.permute.xlu1 %2007  ;;  %v1529_v22 = vpop.permute.xlu0 %1528  ;;  %v1962_v2 = vmul.f32 %v5447_v17, %v6490_v35  ;;  %v1411_v17 = vsub.f32 0.0, %v5519_v5 }
 0x34d   : > { %v5735_v57 = vadd.f32 %v2008_v45, %v1958_v14  ;;  %v1568_v9 = vadd.f32 %v1529_v22, %v1424_v60  ;;  %v1964_v60 = vmul.f32 %v5456_v8, %v6492_v49  ;;  %v1409_v22 = vsub.f32 0.0, %v5509_v43  ;;  %v6497_v8 = vld [vmem:[#allocation44_spill] sm:$0xff] }
 0x34f   : > { %6486 = vst [vmem:[#allocation58_spill] sm:$0xff] %v5735_v57  ;;  %1608 = vrot.lane.b32.xlu0 %v1568_v9, %s4567_s24 }
 0x350   : > { %v2012_v39 = vpop.permute.xlu1 %2011  ;;  %v1533_v34 = vpop.permute.xlu0 %1532 }
 0x351   : > { %v5741_v33 = vadd.f32 %v2012_v39, %v1960_v29  ;;  %v1570_v46 = vadd.f32 %v1533_v34, %v1426_v61  ;;  %v6494_v39 = vld [vmem:[#allocation40_spill] sm:$0xff] }
 0x352   : > { %v1425_v61 = vmul.f32 %v1409_v22, %v6494_v39 }
 0x353   : > { %6489 = vst [vmem:[#allocation51_spill] sm:$0xff] %v5741_v33  ;;  %1612 = vrot.lane.b32.xlu0 %v1570_v46, %s4567_s24  ;;  %v6495_v46 = vld [vmem:[#allocation26_spill] sm:$0xff]  ;;  %v1427_v33 = vmul.f32 %v1411_v17, %v6497_v8  ;;  %v6502_v17 = vld [vmem:[#allocation29_spill] sm:$0xff] }
 0x354   : > { %v2016_v6 = vpop.permute.xlu1 %2015  ;;  %v5748_v45 = vpop.permute.xlu0 %1536 }
 0x355   : > { %v5746_v14 = vadd.f32 %v2016_v6, %v1962_v2  ;;  %v1168_v2 = vmul.f32 %v6495_v46, %v5469_v40  ;;  %v6500_v40 = vld [vmem:[#allocation27_spill] sm:$0xff] }
 0x357   : > { %6491 = vst [vmem:[#allocation59_spill] sm:$0xff] %v5746_v14 }
 0x358   : > { %v2020_v13 = vpop.permute.xlu1 %2019  ;;  %v5755_v29 = vpop.permute.xlu0 %1540 }
 0x359   : > { %v5753_v9 = vadd.f32 %v2020_v13, %v1964_v60  ;;  %v6498_v13 = vld [vmem:[#allocation32_spill] sm:$0xff] }
 0x35b   : > { %6493 = vst [vmem:[#allocation53_spill] sm:$0xff] %v5753_v9  ;;  %v1170_v9 = vmul.f32 %v6498_v13, %v5480_v15  ;;  %v2077_v15 = vsub.f32 0.0, %v5553_v20 }
 0x35c   : > { %v1531_v34 = vpop.permute.xlu1 %1530  ;;  %v1353_v53 = vpop.permute.xlu0 %1352 }
 0x35d   : > { %v1569_v6 = vadd.f32 %v1531_v34, %v1425_v61  ;;  %v5761_v14 = vadd.f32 %v1353_v53, %v1168_v2  ;;  %v1172_v53 = vmul.f32 %v6500_v40, %v5490_v52  ;;  %v2093_v13 = vmul.f32 %v2077_v15, %v6485_v16  ;;  %v6506_v15 = vld [vmem:[#allocation33_spill] sm:$0xff] }
 0x35e   : > { %v2079_v40 = vsub.f32 0.0, %v5563_v47 }
 0x35f   : > { %6496 = vst [vmem:[#allocation60_spill] sm:$0xff] %v5761_v14  ;;  %1610 = vrot.lane.b32.xlu1 %v1569_v6, %s4567_s24  ;;  %v1174_v6 = vmul.f32 %v6502_v17, %v5501_v54 }
 0x360   : > { %v1535_v60 = vpop.permute.xlu1 %1534  ;;  %v1357_v22 = vpop.permute.xlu0 %1356 }
 0x361   : > { %v1571_v57 = vadd.f32 %v1535_v60, %v1427_v33  ;;  %v5767_v58 = vadd.f32 %v1357_v22, %v1170_v9 }
 0x363   : > { %6499 = vst [vmem:[#allocation54_spill] sm:$0xff] %v5767_v58  ;;  %1614 = vrot.lane.b32.xlu1 %v1571_v57, %s4567_s24  ;;  %v6504_v57 = vld [vmem:[#allocation24_spill] sm:$0xff] }
 0x364   : > { %v5770_v12 = vpop.permute.xlu1 %1538  ;;  %v1361_v61 = vpop.permute.xlu0 %1360  ;;  %v1169_v60 = vmul.f32 %v6504_v57, %v5509_v43  ;;  %v6505_v58 = vld [vmem:[#allocation28_spill] sm:$0xff] }
 0x365   : > { %v5774_v34 = vadd.f32 %v1361_v61, %v1172_v53  ;;  %v1171_v17 = vmul.f32 %v6505_v58, %v5519_v5  ;;  %v2083_v5 = vsub.f32 0.0, %v5590_v10 }
 0x367   : > { %6501 = vst [vmem:[#allocation61_spill] sm:$0xff] %v5774_v34 }
 0x368   : > { %v5776_v2 = vpop.permute.xlu1 %1542  ;;  %v1365_v33 = vpop.permute.xlu0 %1364 }
 0x369   : > { %v5781_v9 = vadd.f32 %v1365_v33, %v1174_v6  ;;  %v2095_v6 = vmul.f32 %v2079_v40, %v6488_v30  ;;  %v2081_v33 = vsub.f32 0.0, %v5577_v23  ;;  %v6509_v40 = vld [vmem:[#allocation35_spill] sm:$0xff] }
 0x36b   : > { %6503 = vst [vmem:[#allocation62_spill] sm:$0xff] %v5781_v9 }
 0x36c   : > { %v1355_v22 = vpop.permute.xlu1 %1354  ;;  %v2150_v61 = vpop.permute.xlu0 %2149 }
 0x36d   : > { %v5787_v53 = vadd.f32 %v1355_v22, %v1169_v60  ;;  %v2189_v34 = vadd.f32 %v2150_v61, %v2093_v13  ;;  %v1173_v60 = vmul.f32 %v6506_v15, %v5530_v7  ;;  %v6507_v22 = vld [vmem:[#allocation43_spill] sm:$0xff] }
 0x36e   : > { %v2097_v61 = vmul.f32 %v2081_v33, %v6507_v22 }
 0x36f   : > { %2229 = vrot.lane.b32.xlu0 %v2189_v34, %s4567_s24 }
 0x370   : > { %v1359_v14 = vpop.permute.xlu1 %1358  ;;  %v2154_v9 = vpop.permute.xlu0 %2153 }
 0x371   : > { %v5794_v43 = vadd.f32 %v1359_v14, %v1171_v17  ;;  %v2191_v16 = vadd.f32 %v2154_v9, %v2095_v6  ;;  %v1175_v14 = vmul.f32 %v6509_v40, %v5540_v18  ;;  %v2078_v17 = vsub.f32 0.0, %v5597_v44 }
 0x372   : > { %v1412_v9 = vsub.f32 0.0, %v5490_v52 }
 0x373   : > { %2233 = vrot.lane.b32.xlu0 %v2191_v16, %s4567_s24  ;;  %v6510_v16 = vld [vmem:[#allocation45_spill] sm:$0xff] }
 0x374   : > { %v1363_v13 = vpop.permute.xlu1 %1362  ;;  %v2158_v58 = vpop.permute.xlu0 %2157  ;;  %v2099_v15 = vmul.f32 %v2083_v5, %v6510_v16 }
 0x375   : > { %v5801_v34 = vadd.f32 %v1363_v13, %v1173_v60  ;;  %v2193_v30 = vadd.f32 %v2158_v58, %v2097_v61  ;;  %v2094_v60 = vmul.f32 %v2078_v17, %v6494_v39  ;;  %v2080_v58 = vsub.f32 0.0, %v5606_v19 }
 0x376   : > { %v1428_v13 = vmul.f32 %v1412_v9, %v6507_v22  ;;  %v1414_v61 = vsub.f32 0.0, %v5501_v54 }
 0x377   : > { %6508 = vst [vmem:[#allocation63_spill] sm:$0xff] %v5801_v34  ;;  %2237 = vrot.lane.b32.xlu0 %v2193_v30, %s4567_s24  ;;  %v1965_v30 = vmul.f32 %v5553_v20, %v6495_v46  ;;  %v2096_v39 = vmul.f32 %v2080_v58, %v6497_v8 }
 0x378   : > { %v1367_v6 = vpop.permute.xlu1 %1366  ;;  %v2162_v33 = vpop.permute.xlu0 %2161  ;;  %v1430_v54 = vmul.f32 %v1414_v61, %v6510_v16  ;;  %v1413_v16 = vsub.f32 0.0, %v5530_v7  ;;  %v1160_v7 = vmul.f32 %v6478_v51, %v5325_v28 }
 0x379   : > { %v5809_v23 = vadd.f32 %v1367_v6, %v1175_v14  ;;  %v2195_v10 = vadd.f32 %v2162_v33, %v2099_v15  ;;  %v1572_v14 = vadd.f32 %v5748_v45, %v1428_v13  ;;  %v2082_v15 = vsub.f32 0.0, %v5616_v21  ;;  %v6511_v45 = vld [vmem:[#allocation47_spill] sm:$0xff] }
 0x37a   : > { %v1574_v20 = vadd.f32 %v5755_v29, %v1430_v54 }
 0x37b   : > { %2241 = vrot.lane.b32.xlu0 %v2195_v10, %s4567_s24  ;;  %v2098_v46 = vmul.f32 %v2082_v15, %v6511_v45 }
 0x37c   : > { %v2152_v52 = vpop.permute.xlu1 %2151  ;;  %v2022_v5 = vpop.permute.xlu0 %2021 }
 0x37d   : > { %v2190_v34 = vadd.f32 %v2152_v52, %v2094_v60  ;;  %v5819_v6 = vadd.f32 %v2022_v5, %v1965_v30  ;;  %v6512_v60 = vld [vmem:[#allocation48_spill] sm:$0xff]  ;;  %v1429_v52 = vmul.f32 %v1413_v16, %v6511_v45  ;;  %v1415_v30 = vsub.f32 0.0, %v5540_v18 }
 0x37e   : > { %v1966_v5 = vmul.f32 %v5597_v44, %v6504_v57  ;;  %v1162_v18 = vmul.f32 %v6479_v38, %v5332_v42  ;;  %v1164_v42 = vmul.f32 %v6480_v36, %v5339_v59  ;;  %v1161_v59 = vmul.f32 %v6484_v11, %v5351_v31 }
 0x37f   : > { %2231 = vrot.lane.b32.xlu1 %v2190_v34, %s4567_s24  ;;  %1616 = vrot.lane.b32.xlu0 %v1572_v14, %s4567_s24  ;;  %v2084_v34 = vsub.f32 0.0, %v5625_v0  ;;  %v1165_v31 = vmul.f32 %v6490_v35, %v5371_v1 }
 0x380   : > { %v2156_v10 = vpop.permute.xlu1 %2155  ;;  %v5826_v17 = vpop.permute.xlu0 %2025  ;;  %v1386_v44 = vadd.f32 %v5657_v50, %v1162_v18 }
 0x381   : > { %v2192_v22 = vadd.f32 %v2156_v10, %v2096_v39  ;;  %v2100_v58 = vmul.f32 %v2084_v34, %v6512_v60  ;;  %v1573_v39 = vadd.f32 %v5770_v12, %v1429_v52  ;;  %v1384_v10 = vadd.f32 %v5649_v41, %v1160_v7 }
 0x382   : > { %v1388_v34 = vadd.f32 %v5665_v4, %v1164_v42  ;;  %v1385_v4 = vadd.f32 %v5677_v25, %v1161_v59  ;;  %v1389_v25 = vadd.f32 %v5692_v26, %v1165_v31 }
 0x383   : > { %2235 = vrot.lane.b32.xlu1 %v2192_v22, %s4567_s24  ;;  %1620 = vrot.lane.b32.xlu0 %v1574_v20, %s4567_s24  ;;  %v1431_v22 = vmul.f32 %v1415_v30, %v6512_v60 }
 0x384   : > { %v2160_v8 = vpop.permute.xlu1 %2159  ;;  %v5833_v33 = vpop.permute.xlu0 %2029 }
 0x385   : > { %v2194_v9 = vadd.f32 %v2160_v8, %v2098_v46  ;;  %v1575_v12 = vadd.f32 %v5776_v2, %v1431_v22  ;;  %v1166_v8 = vmul.f32 %v6482_v62, %v5346_v37  ;;  %v1163_v37 = vmul.f32 %v6487_v63, %v5362_v55  ;;  %v6513_v63 = vld [vmem:[#allocation55_spill] sm:$0xff] }
 0x386   : > { %v1167_v55 = vmul.f32 %v6492_v49, %v5382_v27 }
 0x387   : > { %2239 = vrot.lane.b32.xlu1 %v2194_v9, %s4567_s24  ;;  %v1390_v2 = vadd.f32 %v5672_v3, %v1166_v8  ;;  %v1387_v3 = vadd.f32 %v5685_v32, %v1163_v37 }
 0x388   : > { %v2164_v13 = vpop.permute.xlu1 %2163  ;;  %v5838_v61 = vpop.permute.xlu0 %2033  ;;  %v1391_v22 = vadd.f32 %v5699_v24, %v1167_v55 }
 0x389   : > { %v2196_v29 = vadd.f32 %v2164_v13, %v2100_v58 }
 0x38b   : > { %2243 = vrot.lane.b32.xlu1 %v2196_v29, %s4567_s24 }
 0x38c   : > { %v2024_v14 = vpop.permute.xlu1 %2023  ;;  %v1593_v54 = vpop.permute.xlu0 %1592 }
 0x38d   : > { %v5848_v15 = vadd.f32 %v2024_v14, %v1966_v5  ;;  %v1641_v28 = vsel %vm1640_vm2, %v1384_v10, %v1593_v54 }
 0x38e   : > { %v1657_v45 = vmul.f32 0.17677669, %v1641_v28 }
 0x38f   : > { %1618 = vrot.lane.b32.xlu1 %v1573_v39, %s4567_s24 }
 0x390   : > { %v5857_v51 = vpop.permute.xlu1 %2027  ;;  %v1597_v57 = vpop.permute.xlu0 %1596 }
 0x391   : > { %v1643_v20 = vsel %vm1640_vm2, %v1386_v44, %v1597_v57 }
 0x392   : > { %v1659_v41 = vmul.f32 0.17677669, %v1643_v20 }
 0x393   : > { %1622 = vrot.lane.b32.xlu1 %v1575_v12, %s4567_s24  ;;  %s4491_s24 = scalar_lea.vmem %s4490_s23, 512 }
 0x394   : > { %v5864_v38 = vpop.permute.xlu1 %2031  ;;  %v2433_v46 = vcombine.low %v1657_v45, %v1659_v41  ;;  %v1601_v50 = vpop.permute.xlu0 %1600  ;;  %p4493_p0 = scmp.lt.s32.totalorder %s4491_s24, %s4485_s16 }
 0x395   : > { %v1645_v9 = vsel %vm1640_vm2, %v1388_v34, %v1601_v50  ;;  %v6515_v34 = vld [vmem:[#allocation50_spill] sm:$0xff] }
 0x396   : > { %v1661_v36 = vmul.f32 0.17677669, %v1645_v9  ;;  %v2440_v32 = vrot.slane %v2433_v46, %v6513_v63  ;;  %v6514_v46 = vld [vmem:[#allocation57_spill] sm:$0xff]  ;;  %p4494_p11 = por %p4493_p0, %p4492_p13 }
 0x398   : > { %v5871_v16 = vpop.permute.xlu1 %2035  ;;  %v1605_v60 = vpop.permute.xlu0 %1604  ;;  %p4495_p5 = pnand %p4494_p11, %p4488_p1 }
 0x399   : > { %v1647_v58 = vsel %vm1640_vm2, %v1390_v2, %v1605_v60 }
 0x39a   : > { %v1663_v13 = vmul.f32 0.17677669, %v1647_v58  ;;  %v6516_v58 = vld [vmem:[#allocation56_spill] sm:$0xff] }
 0x39c   : > { %v1595_v29 = vpop.permute.xlu1 %1594  ;;  %v2449_v62 = vcombine.low %v1661_v36, %v1663_v13 }
 0x39d   : > { %v1642_v52 = vsel %vm1640_vm2, %v1385_v4, %v1595_v29 }
 0x39e   : > { %v1658_v7 = vmul.f32 0.17677669, %v1642_v52  ;;  %v2456_v24 = vrot.slane %v2449_v62, %v6513_v63 }
 0x3a0   : > { %v1599_v30 = vpop.permute.xlu1 %1598 }
 0x3a1   : > { %v1644_v5 = vsel %vm1640_vm2, %v1387_v3, %v1599_v30  ;;  %v2214_v39 = vpop.permute.xlu0 %2213  ;;  %v6517_v30 = vld [vmem:[#allocation58_spill] sm:$0xff] }
 0x3a2   : > { %v1660_v14 = vmul.f32 0.17677669, %v1644_v5  ;;  %v2261_v44 = vsel %vm1640_vm2, %v5707_v48, %v2214_v39 }
 0x3a4   : > { %v2441_v11 = vcombine.low %v1658_v7, %v1660_v14  ;;  %v1603_v54 = vpop.permute.xlu1 %1602  ;;  %v6518_v7 = vld [vmem:[#allocation51_spill] sm:$0xff] }
 0x3a5   : > { %v2218_v18 = vpop.permute.xlu0 %2217  ;;  %v1646_v28 = vsel %vm1640_vm2, %v1389_v25, %v1603_v54 }
 0x3a6   : > { %v2448_v10 = vrot.slane %v2441_v11, %v6513_v63  ;;  %v2263_v1 = vsel %vm1640_vm2, %v5714_v56, %v2218_v18  ;;  %v1662_v49 = vmul.f32 0.17677669, %v1646_v28 }
 0x3a7   : > { %v2573_v12 = vcombine.low %v2261_v44, %v2263_v1 }
 0x3a8   : > { %v2465_v35 = vcombine.low %v2440_v32, %v2448_v10  ;;  %v2466_v26 = vcombine.high %v2440_v32, %v2448_v10  ;;  %v1607_v57 = vpop.permute.xlu1 %1606  ;;  %v6519_v10 = vld [vmem:[#allocation59_spill] sm:$0xff] }
 0x3a9   : > { %v1648_v27 = vsel %vm1640_vm2, %v1391_v22, %v1607_v57  ;;  %v2222_v45 = vpop.permute.xlu0 %2221  ;;  %v2580_v31 = vrot.slane %v2573_v12, %v6513_v63  ;;  %v6520_v22 = vld [vmem:[#allocation53_spill] sm:$0xff] }
 0x3aa   : > { %v1664_v20 = vmul.f32 0.17677669, %v1648_v27  ;;  %v2265_v50 = vsel %vm1640_vm2, %v6514_v46, %v2222_v45  ;;  %v5903_v59 = vrot.slane %v2465_v35, %v6516_v58  ;;  %v5906_v36 = vrot.slane %v2466_v26, %v6516_v58 }
 0x3ac   : > { %v2457_v41 = vcombine.low %v1662_v49, %v1664_v20 }
 0x3ad   : > { %v2226_v48 = vpop.permute.xlu0 %2225 }
 0x3ae   : > { %v2464_v42 = vrot.slane %v2457_v41, %v6513_v63  ;;  %v2267_v56 = vsel %vm1640_vm2, %v6515_v34, %v2226_v48  ;;  %v6521_v48 = vld [vmem:[#allocation60_spill] sm:$0xff] }
 0x3af   : > { %v2589_v9 = vcombine.low %v2265_v50, %v2267_v56  ;;  %v6522_v56 = vld [vmem:[#allocation54_spill] sm:$0xff] }
 0x3b0   : > { %v2481_v8 = vcombine.low %v2456_v24, %v2464_v42  ;;  %v2482_v2 = vcombine.high %v2456_v24, %v2464_v42 }
 0x3b1   : > { %v2216_v60 = vpop.permute.xlu1 %2215  ;;  %v2596_v35 = vrot.slane %v2589_v9, %v6513_v63 }
 0x3b2   : > { %v5909_v13 = vrot.slane %v2481_v8, %v6516_v58  ;;  %v5912_v29 = vrot.slane %v2482_v2, %v6516_v58  ;;  %v2262_v5 = vsel %vm1640_vm2, %v6517_v30, %v2216_v60 }
 0x3b4   : > { %v2497_v4 = vcombine.low %v5903_v59, %v5909_v13  ;;  %v2498_v37 = vcombine.high %v5903_v59, %v5909_v13  ;;  %v2499_v62 = vcombine.low %v5906_v36, %v5912_v29  ;;  %v2500_v3 = vcombine.high %v5906_v36, %v5912_v29  ;;  %v5932_v1 = vpop.f32.mrf.mxu1 }
 0x3b5   : > { %v2220_v52 = vpop.permute.xlu1 %2219  ;;  %2279 = vrot.lane.b32.xlu1 %v5932_v1, %s4568_s26  ;;  %v6534_v13 = vlaneseq }
 0x3b6   : > { %v2264_v14 = vsel %vm1640_vm2, %v6518_v7, %v2220_v52  ;;  %v4017_v12 = vpop.f32.mrf.mxu1 }
 0x3b7   : > { %v2581_v39 = vcombine.low %v2262_v5, %v2264_v14  ;;  %v2857_v29 = vand.u32 127, %v6534_v13 }
 0x3b8   : > { %v5938_v20 = vpop.f32.mrf.mxu1 }
 0x3b9   : > { %v2588_v11 = vrot.slane %v2581_v39, %v6513_v63  ;;  %v2224_v54 = vpop.permute.xlu1 %2223  ;;  %2285 = vrot.lane.b32.xlu1 %v5932_v1, %s4569_s11  ;;  %2281 = vrot.lane.b32.xlu0 %v5938_v20, %s4568_s26 }
 0x3ba   : > { %v2266_v18 = vsel %vm1640_vm2, %v6519_v10, %v2224_v54  ;;  %v4018_v50 = vpop.f32.mrf.mxu1 }
 0x3bb   : > { %v2605_v25 = vcombine.low %v2580_v31, %v2588_v11  ;;  %v2606_v55 = vcombine.high %v2580_v31, %v2588_v11  ;;  %v6526_v50 = vld [vmem:[#allocation29_spill] sm:$0xff] }
 0x3bd   : > { %v2228_v32 = vpop.permute.xlu1 %2227  ;;  %v5941_v45 = vrot.slane %v2605_v25, %v6516_v58  ;;  %v5948_v41 = vrot.slane %v2606_v55, %v6516_v58  ;;  %2287 = vrot.lane.b32.xlu1 %v5938_v20, %s4569_s11 }
 0x3be   : > { %v2268_v44 = vsel %vm1640_vm2, %v6520_v22, %v2228_v32 }
 0x3bf   : > { %v2597_v28 = vcombine.low %v2266_v18, %v2268_v44  ;;  %v6523_v44 = vld [vmem:[#allocation32_spill] sm:$0xff] }
 0x3c1   : > { %v2604_v26 = vrot.slane %v2597_v28, %v6513_v63  ;;  %v1609_v57 = vpop.permute.xlu0 %1608  ;;  %v1967_v28 = vmul.f32 %v5563_v47, %v6523_v44 }
 0x3c2   : > { %v1649_v46 = vsel %vm1640_vm2, %v6521_v48, %v1609_v57  ;;  %v6525_v48 = vld [vmem:[#allocation49_spill] sm:$0xff] }
 0x3c3   : > { %v2621_v27 = vcombine.low %v2596_v35, %v2604_v26  ;;  %v2622_v49 = vcombine.high %v2596_v35, %v2604_v26  ;;  %v1665_v52 = vmul.f32 0.17677669, %v1649_v46 }
 0x3c5   : > { %v5951_v24 = vrot.slane %v2621_v27, %v6516_v58  ;;  %v5954_v42 = vrot.slane %v2622_v49, %v6516_v58  ;;  %v1613_v34 = vpop.permute.xlu0 %1612  ;;  %v6524_v49 = vld [vmem:[#allocation27_spill] sm:$0xff] }
 0x3c6   : > { %v1651_v8 = vsel %vm1640_vm2, %v6522_v56, %v1613_v34  ;;  %v1969_v46 = vmul.f32 %v6525_v48, %v6524_v49  ;;  %v6527_v34 = vld [vmem:[#allocation52_spill] sm:$0xff] }
 0x3c7   : > { %v2637_v2 = vcombine.low %v5941_v45, %v5951_v24  ;;  %v2638_v9 = vcombine.high %v5941_v45, %v5951_v24  ;;  %v2639_v60 = vcombine.low %v5948_v41, %v5954_v42  ;;  %v1667_v30 = vmul.f32 0.17677669, %v1651_v8 }
 0x3c8   : > { %v2640_v5 = vcombine.high %v5948_v41, %v5954_v42  ;;  %v1971_v56 = vmul.f32 %v6527_v34, %v6526_v50  ;;  %v2065_v8 = vadd.f32 %v5833_v33, %v1969_v46 }
 0x3c9   : > { %v2501_v7 = vcombine.low %v1665_v52, %v1667_v30 }
 0x3ca   : > { %v2067_v47 = vadd.f32 %v5838_v61, %v1971_v56 }
 0x3cb   : > { %v5975_v32 = vrot.slane %v2501_v7, %v6513_v63 }
 0x3d1   : > { %v1611_v14 = vpop.permute.xlu1 %1610 }
 0x3d2   : > { %v1650_v39 = vsel %vm1640_vm2, %v5787_v53, %v1611_v14  ;;  %v6528_v14 = vld [vmem:[#allocation28_spill] sm:$0xff] }
 0x3d3   : > { %v1666_v54 = vmul.f32 0.17677669, %v1650_v39  ;;  %v1968_v39 = vmul.f32 %v5606_v19, %v6528_v14 }
 0x3d5   : > { %v1615_v31 = vpop.permute.xlu1 %1614 }
 0x3d6   : > { %v1652_v11 = vsel %vm1640_vm2, %v5794_v43, %v1615_v31  ;;  %v2063_v43 = vadd.f32 %v5826_v17, %v1967_v28  ;;  %v6530_v28 = vld [vmem:[#allocation62_spill] sm:$0xff] }
 0x3d7   : > { %v1668_v25 = vmul.f32 0.17677669, %v1652_v11  ;;  %v2064_v11 = vadd.f32 %v5857_v51, %v1968_v39 }
 0x3d9   : > { %v2509_v55 = vcombine.low %v1666_v54, %v1668_v25  ;;  %v6529_v54 = vld [vmem:[#allocation61_spill] sm:$0xff] }
 0x3db   : > { %v5978_v10 = vrot.slane %v2509_v55, %v6513_v63 }
 0x3dd   : > { %v2533_v18 = vcombine.low %v5975_v32, %v5978_v10  ;;  %v2534_v22 = vcombine.high %v5975_v32, %v5978_v10 }
 0x3df   : > { %v2541_v45 = vrot.slane %v2533_v18, %v6516_v58  ;;  %v2548_v41 = vrot.slane %v2534_v22, %v6516_v58 }
 0x3e1   : > { %v2230_v53 = vpop.permute.xlu0 %2229 }
 0x3e2   : > { %v2269_v26 = vsel %vm1640_vm2, %v5819_v6, %v2230_v53 }
 0x3e5   : > { %v2234_v35 = vpop.permute.xlu0 %2233 }
 0x3e6   : > { %v2271_v12 = vsel %vm1640_vm2, %v2063_v43, %v2234_v35 }
 0x3e7   : > { %v2641_v57 = vcombine.low %v2269_v26, %v2271_v12 }
 0x3e9   : > { %v2238_v27 = vpop.permute.xlu0 %2237  ;;  %v2648_v19 = vrot.slane %v2641_v57, %v6513_v63 }
 0x3ea   : > { %v2273_v17 = vsel %vm1640_vm2, %v2065_v8, %v2238_v27  ;;  %v6531_v27 = vld [vmem:[#allocation33_spill] sm:$0xff] }
 0x3eb   : > { %v1970_v49 = vmul.f32 %v5616_v21, %v6531_v27  ;;  %v6533_v27 = vmov 0.0  }
 0x3ed   : > { %v2242_v52 = vpop.permute.xlu0 %2241  ;;  %v2066_v34 = vadd.f32 %v5864_v38, %v1970_v49 }
 0x3ee   : > { %v2275_v30 = vsel %vm1640_vm2, %v2067_v47, %v2242_v52 }
 0x3ef   : > { %v2657_v6 = vcombine.low %v2273_v17, %v2275_v30 }
 0x3f1   : > { %v2232_v7 = vpop.permute.xlu1 %2231  ;;  %v1617_v31 = vpop.permute.xlu0 %1616  ;;  %v2664_v17 = vrot.slane %v2657_v6, %v6513_v63 }
 0x3f2   : > { %v1653_v25 = vsel %vm1640_vm2, %v6529_v54, %v1617_v31  ;;  %v2270_v33 = vsel %vm1640_vm2, %v5848_v15, %v2232_v7  ;;  %v1972_v15 = vmul.f32 %v5625_v0, %v6509_v40  ;;  %v6532_v40 = vld [vmem:[#allocation63_spill] sm:$0xff] }
 0x3f3   : > { %v1669_v35 = vmul.f32 0.17677669, %v1653_v25 }
 0x3f4   : > { %v2068_v56 = vadd.f32 %v5871_v16, %v1972_v15 }
 0x3f5   : > { %v2236_v55 = vpop.permute.xlu1 %2235  ;;  %v1621_v53 = vpop.permute.xlu0 %1620 }
 0x3f6   : > { %v2272_v61 = vsel %vm1640_vm2, %v2064_v11, %v2236_v55  ;;  %v1655_v43 = vsel %vm1640_vm2, %v6530_v28, %v1621_v53 }
 0x3f7   : > { %v2649_v44 = vcombine.low %v2270_v33, %v2272_v61  ;;  %v1671_v26 = vmul.f32 0.17677669, %v1655_v43 }
 0x3f9   : > { %v2656_v51 = vrot.slane %v2649_v44, %v6513_v63  ;;  %v2240_v12 = vpop.permute.xlu1 %2239  ;;  %v2517_v48 = vcombine.low %v1669_v35, %v1671_v26 }
 0x3fa   : > { %v2274_v47 = vsel %vm1640_vm2, %v2066_v34, %v2240_v12 }
 0x3fb   : > { %v2673_v46 = vcombine.low %v2648_v19, %v2656_v51  ;;  %v2674_v50 = vcombine.high %v2648_v19, %v2656_v51  ;;  %v2524_v26 = vrot.slane %v2517_v48, %v6513_v63 }
 0x3fd   : > { %v2244_v8 = vpop.permute.xlu1 %2243  ;;  %v2681_v38 = vrot.slane %v2673_v46, %v6516_v58  ;;  %v2688_v16 = vrot.slane %v2674_v50, %v6516_v58 }
 0x3fe   : > { %v2276_v57 = vsel %vm1640_vm2, %v2068_v56, %v2244_v8 }
 0x3ff   : > { %v2665_v52 = vcombine.low %v2274_v47, %v2276_v57 }
 0x401   : > { %v2672_v21 = vrot.slane %v2665_v52, %v6513_v63  ;;  %v1619_v30 = vpop.permute.xlu1 %1618 }
 0x402   : > { %v1654_v14 = vsel %vm1640_vm2, %v6532_v40, %v1619_v30 }
 0x403   : > { %v2689_v7 = vcombine.low %v2664_v17, %v2672_v21  ;;  %v2690_v0 = vcombine.high %v2664_v17, %v2672_v21  ;;  %v1670_v54 = vmul.f32 0.17677669, %v1654_v14 }
 0x405   : > { %v2697_v39 = vrot.slane %v2689_v7, %v6516_v58  ;;  %v2704_v31 = vrot.slane %v2690_v0, %v6516_v58  ;;  %v1623_v11 = vpop.permute.xlu1 %1622 }
 0x406   : > { %v1656_v6 = vsel %vm1640_vm2, %v5809_v23, %v1623_v11 }
 0x407   : > { %v1672_v25 = vmul.f32 0.17677669, %v1656_v6  ;;  %v2705_v55 = vcombine.low %v2681_v38, %v2697_v39  ;;  %v2706_v33 = vcombine.high %v2681_v38, %v2697_v39  ;;  %v2707_v61 = vcombine.low %v2688_v16, %v2704_v31 }
 0x408   : > { %v2708_v53 = vcombine.high %v2688_v16, %v2704_v31 }
 0x409   : > { %v2525_v44 = vcombine.low %v1670_v54, %v1672_v25  ;;  %v2709_v28 = vpack.c.bf16 %v2705_v55, %v2637_v2  ;;  %v2710_v43 = vpack.c.bf16 %v2706_v33, %v2638_v9  ;;  %v2711_v35 = vpack.c.bf16 %v2707_v61, %v2639_v60 }
 0x40a   : > { %v2712_v23 = vpack.c.bf16 %v2708_v53, %v2640_v5 }
 0x40b   : > { %v2532_v19 = vrot.slane %v2525_v44, %v6513_v63  ;;  %v2865_v51 = vsel %vm2860_vm3, %v2709_v28, 0  ;;  %v2912_v22 = vsel %vm2860_vm3, %v2710_v43, 0  ;;  %v2959_v59 = vsel %vm2860_vm3, %v2711_v35, 0 }
 0x40c   : > { %4020 = vmatpush3.bf16.xpose.msra.mxu1 %v2865_v51  ;;  %v3006_v36 = vsel %vm2860_vm3, %v2712_v23, 0 }
 0x40d   : > { %v2549_v2 = vcombine.low %v2524_v26, %v2532_v19  ;;  %v2550_v12 = vcombine.high %v2524_v26, %v2532_v19  ;;  %4025 = vmatprep.subr.bf16.mxu1 %v6533_v27 }
 0x40f   : > { %v2557_v24 = vrot.slane %v2549_v2, %v6516_v58  ;;  %v2564_v42 = vrot.slane %v2550_v12, %v6516_v58 }
 0x411   : > { %v2565_v9 = vcombine.low %v2541_v45, %v2557_v24  ;;  %v2566_v60 = vcombine.high %v2541_v45, %v2557_v24  ;;  %v2567_v5 = vcombine.low %v2548_v41, %v2564_v42  ;;  %v2568_v49 = vcombine.high %v2548_v41, %v2564_v42 }
 0x413   : > { %v2569_v15 = vpack.c.bf16 %v2565_v9, %v2497_v4  ;;  %v2570_v18 = vpack.c.bf16 %v2566_v60, %v2498_v37  ;;  %v2571_v32 = vpack.c.bf16 %v2567_v5, %v2499_v62  ;;  %v2572_v10 = vpack.c.bf16 %v2568_v49, %v2500_v3  ;;  %v6535_v4 = vld [vmem:[#allocation16_spill] sm:$0xff] }
 0x414   : > { %vm2858_vm4 = vcmp.le.s32.totalorder %v2857_v29, %v6535_v4  ;;  %v2855_v37 = vadd.s32 8, %v6535_v4 }
 0x415   : > { %4022 = vmatmul.mubr.msk.bf16.vlgmr.msra.gmra.mxu1 %vm2860_vm3, %v2569_v15 }
 0x416   : > { %4026 = vmatpush3.bf16.xpose.msra.mxu1 %v2912_v22  ;;  %4027 = vmatprep.mubr.msk.bf16.mxu1 %vm4575_vm1, %v6533_v27  ;;  %vm2859_vm5 = vcmp.le.s32.totalorder %v2857_v29, %v2855_v37 }
 0x417   : > { %4031 = vmatprep.subr.bf16.mxu1 %v6533_v27 }
 0x41d   : > { %4028 = vmatmul.mubr.msk.bf16.vlgmr.msra.gmra.mxu1 %vm2860_vm3, %v2570_v18 }
 0x41e   : > { %4032 = vmatpush3.bf16.xpose.msra.mxu1 %v2959_v59  ;;  %4033 = vmatprep.mubr.msk.bf16.mxu1 %vm4575_vm1, %v6533_v27 }
 0x41f   : > { %4037 = vmatprep.subr.bf16.mxu1 %v6533_v27 }
 0x425   : > { %4034 = vmatmul.mubr.msk.bf16.vlgmr.msra.gmra.mxu1 %vm2860_vm3, %v2571_v32 }
 0x426   : > { %4038 = vmatpush3.bf16.xpose.msra.mxu1 %v3006_v36  ;;  %4039 = vmatprep.mubr.msk.bf16.mxu1 %vm4575_vm1, %v6533_v27 }
 0x427   : > { %4043 = vmatprep.subr.bf16.mxu1 %v6533_v27  ;;  %v2280_v43 = vpop.permute.xlu1 %2279 }
 0x42b   : > { %v2286_v35 = vpop.permute.xlu1 %2285  ;;  %v2282_v23 = vpop.permute.xlu0 %2281 }
 0x42c   : > { %v2297_v37 = vcombine.low %v5932_v1, %v2286_v35 }
 0x42d   : > { %4040 = vmatmul.mubr.msk.bf16.vlgmr.msra.gmra.mxu1 %vm2860_vm3, %v2572_v10 }
 0x42e   : > { %4045 = vmatprep.mubr.msk.bf16.mxu1 %vm4575_vm1, %v6533_v27 }
 0x42f   : > { %v2288_v26 = vpop.permute.xlu1 %2287 }
 0x430   : > { %v2365_v41 = vcombine.low %v5938_v20, %v2288_v26  ;;  %v2366_v24 = vcombine.high %v5938_v20, %v2288_v26 }
 0x432   : > { %v2373_v18 = vrot.slane %v2365_v41, %v6513_v63  ;;  %v2380_v32 = vrot.slane %v2366_v24, %v6513_v63 }
 0x4d5   : > { %v2901_v62 = vpop.f32.mrf.mxu1 }
 0x4d6   : > { %v3053_v3 = vsel %vm2858_vm4, %v2901_v62, -inf }
 0x4d7   : > { %v3061_v48 = vsel %vm1640_vm2, %v3053_v3, -inf  ;;  %v4023_v46 = vpop.f32.mrf.mxu1 }
 0x4d8   : > { %3062 = vmax.xlane.f32.xlu0 %v3061_v48 }
 0x4d9   : > { %v2904_v50 = vpop.f32.mrf.mxu1 }
 0x4da   : > { %v3054_v34 = vsel %vm2859_vm5, %v2904_v50, -inf }
 0x4db   : > { %v3064_v56 = vsel %vm1640_vm2, %v3054_v34, -inf  ;;  %v4024_v8 = vpop.f32.mrf.mxu1 }
 0x4dc   : > { %3065 = vmax.xlane.f32.xlu1 %v3064_v56 }
 0x4dd   : > { %v2948_v47 = vpop.f32.mrf.mxu1 }
 0x4de   : > { %v3055_v57 = vsel %vm2858_vm4, %v2948_v47, -inf }
 0x4df   : > { %v3067_v52 = vsel %vm1640_vm2, %v3055_v57, -inf  ;;  %v4029_v17 = vpop.f32.mrf.mxu1 }
 0x4e0   : > { %3068 = vmax.xlane.f32.xlu0 %v3067_v52 }
 0x4e1   : > { %v2951_v21 = vpop.f32.mrf.mxu1 }
 0x4e2   : > { %v6096_v30 = vsel %vm2859_vm5, %v2951_v21, -inf }
 0x4e3   : > { %v3070_v7 = vsel %vm1640_vm2, %v6096_v30, -inf  ;;  %v4030_v0 = vpop.f32.mrf.mxu1 }
 0x4e4   : > { %3071 = vmax.xlane.f32.xlu0 %v3070_v7  ;;  %v2305_v0 = vrot.slane %v2297_v37, %v6513_v63 }
 0x4e5   : > { %v2995_v40 = vpop.f32.mrf.mxu1 }
 0x4e6   : > { %v6111_v55 = vsel %vm2858_vm4, %v2995_v40, -inf }
 0x4e7   : > { %v4035_v14 = vpop.f32.mrf.mxu1  ;;  %v3073_v33 = vsel %vm1640_vm2, %v6111_v55, -inf }
 0x4e9   : > { %v2998_v38 = vpop.f32.mrf.mxu1 }
 0x4ea   : > { %v6105_v6 = vsel %vm2859_vm5, %v2998_v38, -inf }
 0x4eb   : > { %v4036_v16 = vpop.f32.mrf.mxu1  ;;  %v3076_v25 = vsel %vm1640_vm2, %v6105_v6, -inf }
 0x4ed   : > { %2293 = vrot.lane.b32.xlu1 %v5938_v20, %s4571_s28  ;;  %v3042_v39 = vpop.f32.mrf.mxu1 }
 0x4ee   : > { %v6117_v61 = vsel %vm2858_vm4, %v3042_v39, -inf }
 0x4ef   : > { %v4041_v31 = vpop.f32.mrf.mxu1  ;;  %v3079_v53 = vsel %vm1640_vm2, %v6117_v61, -inf }
 0x4f1   : > { %v3045_v11 = vpop.f32.mrf.mxu1 }
 0x4f2   : > { %v6122_v44 = vsel %vm2859_vm5, %v3045_v11, -inf }
 0x4f3   : > { %v4042_v54 = vpop.f32.mrf.mxu1  ;;  %v3082_v28 = vsel %vm1640_vm2, %v6122_v44, -inf }
 0x4fa   : > { %2291 = vrot.lane.b32.xlu0 %v5932_v1, %s4571_s28 }
 0x511   : > { %3077 = vmax.xlane.f32.xlu1 %v3076_v25 }
 0x519   : > { %3074 = vmax.xlane.f32.xlu0 %v3073_v33 }
 0x51d   : > { %3080 = vmax.xlane.f32.xlu0 %v3079_v53 }
 0x521   : > { %3083 = vmax.xlane.f32.xlu0 %v3082_v28 }
 0x561   : > { %v3063_v19 = vpop.xlane.xlu0 %3062 }
 0x562   : > { %v3085_v51 = vsub.f32 %v3053_v3, %v3063_v19 }
 0x564   : > { %v3093_v2 = vmul.f32 1.442695, %v3085_v51 }
 0x565   : > { %v3066_v12 = vpop.xlane.xlu1 %3065 }
 0x566   : > { %4320 = vpow2.f32 %v3093_v2  ;;  %v3086_v45 = vsub.f32 %v3054_v34, %v3066_v12  ;;  %v2298_v34 = vcombine.high %v5932_v1, %v2286_v35 }
 0x568   : > { %v3095_v42 = vmul.f32 1.442695, %v3086_v45  ;;  %v2312_v40 = vrot.slane %v2298_v34, %v6513_v63 }
 0x569   : > { %v2294_v9 = vpop.permute.xlu1 %2293  ;;  %v3069_v60 = vpop.xlane.xlu0 %3068 }
 0x56a   : > { %4322 = vpow2.f32 %v3095_v42  ;;  %v2381_v5 = vcombine.low %v2282_v23, %v2294_v9  ;;  %v2382_v49 = vcombine.high %v2282_v23, %v2294_v9  ;;  %v3087_v15 = vsub.f32 %v3055_v57, %v3069_v60 }
 0x56c   : > { %v2389_v10 = vrot.slane %v2381_v5, %v6513_v63  ;;  %v2396_v22 = vrot.slane %v2382_v49, %v6513_v63  ;;  %v3097_v59 = vmul.f32 1.442695, %v3087_v15 }
 0x56d   : > { %v3072_v36 = vpop.xlane.xlu0 %3071 }
 0x56e   : > { %v2397_v13 = vcombine.low %v2373_v18, %v2389_v10  ;;  %v2398_v29 = vcombine.high %v2373_v18, %v2389_v10  ;;  %v2413_v20 = vcombine.low %v2380_v32, %v2396_v22  ;;  %v2414_v4 = vcombine.high %v2380_v32, %v2396_v22 }
 0x56f   : > { %4324 = vpow2.f32 %v3097_v59  ;;  %v3088_v62 = vsub.f32 %v6096_v30, %v3072_v36 }
 0x570   : > { %v2405_v3 = vrot.slane %v2397_v13, %v6516_v58  ;;  %v2412_v48 = vrot.slane %v2398_v29, %v6516_v58  ;;  %v2421_v46 = vrot.slane %v2413_v20, %v6516_v58  ;;  %v2428_v50 = vrot.slane %v2414_v4, %v6516_v58 }
 0x571   : > { %v3099_v56 = vmul.f32 1.442695, %v3088_v62  ;;  %v2292_v8 = vpop.permute.xlu0 %2291 }
 0x572   : > { %v2781_v47 = vcombine.low %v2405_v3, %v2412_v48  ;;  %v3910_v57 = vcombine.high %v2405_v3, %v2412_v48  ;;  %v2797_v52 = vcombine.low %v2421_v46, %v2428_v50  ;;  %v3911_v17 = vcombine.high %v2421_v46, %v2428_v50 }
 0x573   : > { %v6139_v21 = vpop.eup %4320  ;;  %4326 = vpow2.f32 %v3099_v56  ;;  %v2313_v30 = vcombine.low %v2280_v43, %v2292_v8  ;;  %v2314_v7 = vcombine.high %v2280_v43, %v2292_v8 }
 0x574   : > { %v3109_v1 = vsel %vm1640_vm2, %v6139_v21, 0.0  ;;  %v2788_v16 = vrot.slane %v2781_v47, %v6513_v63  ;;  %v2796_v39 = vrot.slane %v3910_v57, %v6513_v63  ;;  %v2804_v31 = vrot.slane %v2797_v52, %v6513_v63 }
 0x575   : > { %v2321_v14 = vrot.slane %v2313_v30, %v6513_v63  ;;  %v2328_v38 = vrot.slane %v2314_v7, %v6513_v63  ;;  %v2812_v11 = vrot.slane %v3911_v17, %v6513_v63  ;;  %3110 = vadd.xlane.f32.xlu1 %v3109_v1 }
 0x576   : > { %v2813_v51 = vcombine.low %v2788_v16, %v2796_v39  ;;  %v2814_v50 = vcombine.high %v2788_v16, %v2796_v39 }
 0x577   : > { %v4323_v54 = vpop.eup %4322  ;;  %v2329_v25 = vcombine.low %v2305_v0, %v2321_v14  ;;  %v2330_v33 = vcombine.high %v2305_v0, %v2321_v14  ;;  %v2345_v53 = vcombine.low %v2312_v40, %v2328_v38  ;;  %v2346_v28 = vcombine.high %v2312_v40, %v2328_v38 }
 0x578   : > { %v3112_v43 = vsel %vm1640_vm2, %v4323_v54, 0.0  ;;  %v2829_v2 = vcombine.low %v2804_v31, %v2812_v11  ;;  %v2821_v10 = vrot.slane %v2813_v51, %v6516_v58  ;;  %v2830_v34 = vcombine.high %v2804_v31, %v2812_v11 }
 0x579   : > { %v2337_v35 = vrot.slane %v2329_v25, %v6516_v58  ;;  %v2344_v23 = vrot.slane %v2330_v33, %v6516_v58  ;;  %v2353_v26 = vrot.slane %v2345_v53, %v6516_v58  ;;  %v2360_v19 = vrot.slane %v2346_v28, %v6516_v58  ;;  %3113 = vadd.xlane.f32.xlu0 %v3112_v43 }
 0x57a   : > { %v2837_v22 = vrot.slane %v2829_v2, %v6516_v58  ;;  %v3133_v56 = vpack.c.bf16 %v4323_v54, %v6139_v21  ;;  %v2828_v52 = vrot.slane %v2814_v50, %v6516_v58  ;;  %v2844_v17 = vrot.slane %v2830_v34, %v6516_v58 }
 0x57b   : > { %v2713_v12 = vcombine.low %v2337_v35, %v2344_v23  ;;  %v3908_v45 = vcombine.high %v2337_v35, %v2344_v23  ;;  %v2729_v41 = vcombine.low %v2353_v26, %v2360_v19  ;;  %v3909_v24 = vcombine.high %v2353_v26, %v2360_v19 }
 0x57c   : > { %v4325_v42 = vpop.eup %4324  ;;  %v2845_v4 = vcombine.low %v2821_v10, %v2837_v22  ;;  %v2846_v46 = vcombine.high %v2821_v10, %v2837_v22  ;;  %v2847_v30 = vcombine.low %v2828_v52, %v2844_v17  ;;  %v2848_v23 = vcombine.high %v2828_v52, %v2844_v17 }
 0x57d   : > { %v2720_v9 = vrot.slane %v2713_v12, %v6513_v63  ;;  %v2728_v60 = vrot.slane %v3908_v45, %v6513_v63  ;;  %v2736_v5 = vrot.slane %v2729_v41, %v6513_v63  ;;  %v2744_v49 = vrot.slane %v3909_v24, %v6513_v63  ;;  %v4248_v45 = vld [vmem:[#allocation7 + $0x38] sm:$0xff]   ;;  %v4249_v41 = vld [vmem:[#allocation7 + $0x30] sm:$0xff]   ;;  %v4250_v24 = vld [vmem:[#allocation7 + $0x28] sm:$0xff]  }
 0x57e   : > { %v3115_v15 = vsel %vm1640_vm2, %v4325_v42, 0.0  ;;  %4068 = vmatpush3.bf16.xpose.msra.mxu0 %v4248_v45 }
 0x57f   : > { %3116 = vadd.xlane.f32.xlu1 %v3115_v15  ;;  %v2745_v18 = vcombine.low %v2720_v9, %v2728_v60  ;;  %v2761_v32 = vcombine.low %v2736_v5, %v2744_v49  ;;  %v2746_v3 = vcombine.high %v2720_v9, %v2728_v60  ;;  %v2762_v48 = vcombine.high %v2736_v5, %v2744_v49  ;;  %v4252_v9 = vld [vmem:[#allocation7 + $0x18] sm:$0xff]   ;;  %v4253_v60 = vld [vmem:[#allocation7 + $0x10] sm:$0xff]   ;;  %v4254_v15 = vld [vmem:[#allocation7 + $0x8] sm:$0xff]  }
 0x580   : > { %v4327_v59 = vpop.eup %4326  ;;  %4069 = vmatprep.subr.bf16.mxu0 %v6533_v27 }
 0x581   : > { %v3118_v36 = vsel %vm1640_vm2, %v4327_v59, 0.0  ;;  %v2753_v13 = vrot.slane %v2745_v18, %v6516_v58  ;;  %v2769_v29 = vrot.slane %v2761_v32, %v6516_v58  ;;  %v2760_v47 = vrot.slane %v2746_v3, %v6516_v58 }
 0x582   : > { %3119 = vadd.xlane.f32.xlu0 %v3118_v36  ;;  %v2776_v57 = vrot.slane %v2762_v48, %v6516_v58  ;;  %v3134_v7 = vpack.c.bf16 %v4327_v59, %v4325_v42  ;;  %v4251_v42 = vld [vmem:[#allocation7 + $0x20] sm:$0xff]  }
 0x583   : > { %v2777_v20 = vcombine.low %v2753_v13, %v2769_v29  ;;  %v2778_v62 = vcombine.high %v2753_v13, %v2769_v29 }
 0x584   : > { %v2779_v21 = vcombine.low %v2760_v47, %v2776_v57 }
 0x585   : > { %v2849_v37 = vpack.c.bf16 %v2845_v4, %v2777_v20  ;;  %v2850_v8 = vpack.c.bf16 %v2846_v46, %v2778_v62 }
 0x586   : > { %v2851_v0 = vpack.c.bf16 %v2847_v30, %v2779_v21  ;;  %4070 = vmatpush3.bf16.xpose.msra.mxu0 %v4249_v41 }
 0x587   : > { %4044 = vmatpush3.bf16.msra.mxu1 %v2849_v37  ;;  %4071 = vmatprep.subr.bf16.mxu0 %v6533_v27 }
 0x588   : > { %4049 = vmatprep.subr.bf16.mxu1 %v6533_v27 }
 0x58a   : > { %4046 = vmatmul.mubr.msk.bf16.vlgmr.msra.gmra.mxu1 %vm1640_vm2, %v3133_v56 }
 0x58b   : > { %4050 = vmatpush3.bf16.msra.mxu1 %v2850_v8  ;;  %4051 = vmatprep.mubr.msk.bf16.mxu1 %vm4575_vm1, %v6533_v27 }
 0x58c   : > { %4055 = vmatprep.subr.bf16.mxu1 %v6533_v27 }
 0x58e   : > { %4072 = vmatpush3.bf16.xpose.msra.mxu0 %v4250_v24 }
 0x58f   : > { %4073 = vmatprep.subr.bf16.mxu0 %v6533_v27 }
 0x592   : > { %4052 = vmatmul.mubr.msk.bf16.vlgmr.msra.gmra.mxu1 %vm1640_vm2, %v3134_v7 }
 0x593   : > { %4056 = vmatpush3.bf16.msra.mxu1 %v2851_v0  ;;  %4057 = vmatprep.mubr.msk.bf16.mxu1 %vm4575_vm1, %v6533_v27 }
 0x594   : > { %4061 = vmatprep.subr.bf16.mxu1 %v6533_v27 }
 0x596   : > { %4074 = vmatpush3.bf16.xpose.msra.mxu0 %v4251_v42 }
 0x597   : > { %4075 = vmatprep.subr.bf16.mxu0 %v6533_v27 }
 0x59a   : > { %v3078_v40 = vpop.xlane.xlu1 %3077 }
 0x59b   : > { %v3090_v14 = vsub.f32 %v6105_v6, %v3078_v40  ;;  %v2780_v6 = vcombine.high %v2760_v47, %v2776_v57 }
 0x59d   : > { %v3103_v38 = vmul.f32 1.442695, %v3090_v14  ;;  %v2852_v19 = vpack.c.bf16 %v2848_v23, %v2780_v6 }
 0x59e   : > { %4076 = vmatpush3.bf16.xpose.msra.mxu0 %v4252_v9 }
 0x59f   : > { %4328 = vpow2.f32 %v3103_v38  ;;  %4077 = vmatprep.subr.bf16.mxu0 %v6533_v27 }
 0x5a2   : > { %v3075_v1 = vpop.xlane.xlu0 %3074 }
 0x5a3   : > { %v3089_v16 = vsub.f32 %v6111_v55, %v3075_v1 }
 0x5a5   : > { %v3101_v39 = vmul.f32 1.442695, %v3089_v16 }
 0x5a6   : > { %v3081_v31 = vpop.xlane.xlu0 %3080  ;;  %4078 = vmatpush3.bf16.xpose.msra.mxu0 %v4253_v60 }
 0x5a7   : > { %4330 = vpow2.f32 %v3101_v39  ;;  %v3091_v11 = vsub.f32 %v6117_v61, %v3081_v31  ;;  %4079 = vmatprep.subr.bf16.mxu0 %v6533_v27 }
 0x5a9   : > { %v3105_v54 = vmul.f32 1.442695, %v3091_v11 }
 0x5aa   : > { %v3084_v25 = vpop.xlane.xlu0 %3083 }
 0x5ab   : > { %4332 = vpow2.f32 %v3105_v54  ;;  %v3092_v33 = vsub.f32 %v6122_v44, %v3084_v25 }
 0x5ac   : > { %v4329_v53 = vpop.eup %4328 }
 0x5ad   : > { %v3107_v28 = vmul.f32 1.442695, %v3092_v33  ;;  %v3124_v43 = vsel %vm1640_vm2, %v4329_v53, 0.0 }
 0x5ae   : > { %3125 = vadd.xlane.f32.xlu0 %v3124_v43  ;;  %4080 = vmatpush3.bf16.xpose.msra.mxu0 %v4254_v15 }
 0x5af   : > { %4334 = vpow2.f32 %v3107_v28  ;;  %4081 = vmatprep.subr.bf16.mxu0 %v6533_v27 }
 0x5b4   : > { %v4331_v35 = vpop.eup %4330 }
 0x5b5   : > { %v3121_v55 = vsel %vm1640_vm2, %v4331_v35, 0.0  ;;  %v3135_v26 = vpack.c.bf16 %v4329_v53, %v4331_v35 }
 0x5b6   : > { %3122 = vadd.xlane.f32.xlu1 %v3121_v55 }
 0x5b7   : > { %4058 = vmatmul.mubr.msk.bf16.vlgmr.msra.gmra.mxu1 %vm1640_vm2, %v3135_v26 }
 0x5b8   : > { %v4333_v61 = vpop.eup %4332  ;;  %4062 = vmatpush3.bf16.msra.mxu1 %v2852_v19  ;;  %4063 = vmatprep.mubr.msk.bf16.mxu1 %vm4575_vm1, %v6533_v27 }
 0x5b9   : > { %v3127_v44 = vsel %vm1640_vm2, %v4333_v61, 0.0 }
 0x5ba   : > { %3128 = vadd.xlane.f32.xlu1 %v3127_v44 }
 0x5bc   : > { %v4335_v51 = vpop.eup %4334 }
 0x5bd   : > { %v3130_v2 = vsel %vm1640_vm2, %v4335_v51, 0.0  ;;  %v3136_v12 = vpack.c.bf16 %v4335_v51, %v4333_v61 }
 0x5be   : > { %3131 = vadd.xlane.f32.xlu0 %v3130_v2 }
 0x5bf   : > { %4064 = vmatmul.mubr.msk.bf16.vlgmr.msra.gmra.mxu1 %vm1640_vm2, %v3136_v12 }
 0x5fe   : > { %v3111_v13 = vpop.xlane.xlu1 %3110 }
 0x602   : > { %v3114_v20 = vpop.xlane.xlu0 %3113 }
 0x608   : > { %v3117_v29 = vpop.xlane.xlu1 %3116 }
 0x60b   : > { %v3120_v37 = vpop.xlane.xlu0 %3119 }
 0x637   : > { %v3126_v62 = vpop.xlane.xlu0 %3125 }
 0x63f   : > { %v3123_v4 = vpop.xlane.xlu1 %3122 }
 0x640   : > { %4336 = vrcp.f32 %v3123_v4 }
 0x641   : > { %4338 = vrcp.f32 %v3111_v13 }
 0x642   : > { %4340 = vrcp.f32 %v3117_v29 }
 0x643   : > { %v3129_v3 = vpop.xlane.xlu1 %3128 }
 0x644   : > { %4342 = vrcp.f32 %v3129_v3 }
 0x645   : > { %4344 = vrcp.f32 %v3126_v62 }
 0x646   : > { %4346 = vrcp.f32 %v3114_v20 }
 0x647   : > { %v3132_v48 = vpop.xlane.xlu0 %3131 }
 0x648   : > { %4348 = vrcp.f32 %v3132_v48 }
 0x649   : > { %4350 = vrcp.f32 %v3120_v37 }
 0x64a   : > { %v3174_v5 = vpop.f32.mrf.mxu1 }
 0x64c   : > { %v4047_v49 = vpop.f32.mrf.mxu1 }
 0x64d   : > { %v4337_v50 = vpop.eup %4336 }
 0x64e   : > { %v3177_v18 = vpop.f32.mrf.mxu1  ;;  %v4339_v8 = vpop.eup %4338 }
 0x64f   : > { %v3321_v47 = vmul.f32 %v4339_v8, %v3174_v5  ;;  %v4341_v52 = vpop.eup %4340 }
 0x650   : > { %v4048_v32 = vpop.f32.mrf.mxu1 }
 0x651   : > { %v4343_v17 = vpop.eup %4342 }
 0x652   : > { %v3218_v10 = vpop.f32.mrf.mxu1  ;;  %v4345_v7 = vpop.eup %4344 }
 0x653   : > { %v3323_v0 = vmul.f32 %v4341_v52, %v3218_v10  ;;  %v4347_v16 = vpop.eup %4346 }
 0x654   : > { %v4053_v22 = vpop.f32.mrf.mxu1  ;;  %v3322_v54 = vmul.f32 %v4347_v16, %v3177_v18 }
 0x655   : > { %v4349_v11 = vpop.eup %4348 }
 0x656   : > { %v3221_v59 = vpop.f32.mrf.mxu1  ;;  %v4351_v53 = vpop.eup %4350 }
 0x657   : > { %v3324_v23 = vmul.f32 %v4351_v53, %v3221_v59 }
 0x658   : > { %v4054_v36 = vpop.f32.mrf.mxu1 }
 0x677   : > { %v3262_v27 = vpop.f32.mrf.mxu1 }
 0x678   : > { %v3325_v34 = vmul.f32 %v4337_v50, %v3262_v27 }
 0x679   : > { %v4059_v46 = vpop.f32.mrf.mxu1 }
 0x67a   : > { %v3329_v21 = vcombine.low %v3321_v47, %v3325_v34  ;;  %v3330_v40 = vcombine.high %v3321_v47, %v3325_v34 }
 0x67b   : > { %v3265_v56 = vpop.f32.mrf.mxu1 }
 0x67c   : > { %v3326_v38 = vmul.f32 %v4345_v7, %v3265_v56  ;;  %v3337_v25 = vrot.slane %v3329_v21, %v6513_v63  ;;  %v3344_v28 = vrot.slane %v3330_v40, %v6513_v63  ;;  %v4255_v7 = vld [vmem:[#allocation7] sm:$0xff]  }
 0x67d   : > { %v4060_v57 = vpop.f32.mrf.mxu1  ;;  %4082 = vmatpush3.bf16.xpose.msra.mxu0 %v4255_v7 }
 0x67e   : > { %v3397_v55 = vcombine.low %v3322_v54, %v3326_v38  ;;  %v3398_v26 = vcombine.high %v3322_v54, %v3326_v38 }
 0x67f   : > { %v3306_v30 = vpop.f32.mrf.mxu1 }
 0x680   : > { %v3327_v14 = vmul.f32 %v4343_v17, %v3306_v30  ;;  %v3405_v60 = vrot.slane %v3397_v55, %v6513_v63  ;;  %v3412_v5 = vrot.slane %v3398_v26, %v6513_v63 }
 0x681   : > { %v4065_v1 = vpop.f32.mrf.mxu1 }
 0x682   : > { %v3345_v39 = vcombine.low %v3323_v0, %v3327_v14  ;;  %v3346_v31 = vcombine.high %v3323_v0, %v3327_v14 }
 0x683   : > { %v3309_v33 = vpop.f32.mrf.mxu1 }
 0x684   : > { %v3353_v43 = vrot.slane %v3345_v39, %v6513_v63  ;;  %v3360_v6 = vrot.slane %v3346_v31, %v6513_v63  ;;  %v3328_v35 = vmul.f32 %v4349_v11, %v3309_v33 }
 0x685   : > { %v4066_v19 = vpop.f32.mrf.mxu1 }
 0x686   : > { %v3361_v61 = vcombine.low %v3337_v25, %v3353_v43  ;;  %v3362_v44 = vcombine.high %v3337_v25, %v3353_v43  ;;  %v3377_v51 = vcombine.low %v3344_v28, %v3360_v6  ;;  %v3378_v2 = vcombine.high %v3344_v28, %v3360_v6 }
 0x687   : > { %v3413_v12 = vcombine.low %v3324_v23, %v3328_v35  ;;  %v3414_v45 = vcombine.high %v3324_v23, %v3328_v35 }
 0x688   : > { %v3369_v41 = vrot.slane %v3361_v61, %v6516_v58  ;;  %v3376_v24 = vrot.slane %v3362_v44, %v6516_v58  ;;  %v3385_v42 = vrot.slane %v3377_v51, %v6516_v58  ;;  %v3392_v9 = vrot.slane %v3378_v2, %v6516_v58 }
 0x689   : > { %v3421_v49 = vrot.slane %v3413_v12, %v6513_v63  ;;  %v3428_v15 = vrot.slane %v3414_v45, %v6513_v63 }
 0x68a   : > { %v3465_v18 = vcombine.low %v3369_v41, %v3376_v24  ;;  %v3920_v32 = vcombine.high %v3369_v41, %v3376_v24  ;;  %v3481_v10 = vcombine.low %v3385_v42, %v3392_v9  ;;  %v3921_v22 = vcombine.high %v3385_v42, %v3392_v9 }
 0x68b   : > { %v3429_v59 = vcombine.low %v3405_v60, %v3421_v49  ;;  %v3430_v36 = vcombine.high %v3405_v60, %v3421_v49  ;;  %v3445_v13 = vcombine.low %v3412_v5, %v3428_v15  ;;  %v3446_v29 = vcombine.high %v3412_v5, %v3428_v15 }
 0x68c   : > { %v3472_v20 = vrot.slane %v3465_v18, %v6513_v63  ;;  %v3480_v4 = vrot.slane %v3920_v32, %v6513_v63  ;;  %v3488_v37 = vrot.slane %v3481_v10, %v6513_v63  ;;  %v3496_v62 = vrot.slane %v3921_v22, %v6513_v63 }
 0x68d   : > { %v3437_v3 = vrot.slane %v3429_v59, %v6516_v58  ;;  %v3444_v48 = vrot.slane %v3430_v36, %v6516_v58  ;;  %v3453_v27 = vrot.slane %v3445_v13, %v6516_v58  ;;  %v3460_v46 = vrot.slane %v3446_v29, %v6516_v58 }
 0x68e   : > { %v3498_v50 = vcombine.high %v3472_v20, %v3480_v4  ;;  %v3514_v34 = vcombine.high %v3488_v37, %v3496_v62  ;;  %v3497_v56 = vcombine.low %v3472_v20, %v3480_v4  ;;  %v3513_v8 = vcombine.low %v3488_v37, %v3496_v62 }
 0x68f   : > { %v3533_v47 = vcombine.low %v3437_v3, %v3444_v48  ;;  %v3922_v57 = vcombine.high %v3437_v3, %v3444_v48  ;;  %v3549_v52 = vcombine.low %v3453_v27, %v3460_v46  ;;  %v3923_v17 = vcombine.high %v3453_v27, %v3460_v46 }
 0x690   : > { %v3505_v21 = vrot.slane %v3497_v56, %v6516_v58  ;;  %v3521_v30 = vrot.slane %v3513_v8, %v6516_v58  ;;  %v3512_v1 = vrot.slane %v3498_v50, %v6516_v58  ;;  %v3528_v16 = vrot.slane %v3514_v34, %v6516_v58 }
 0x691   : > { %v3540_v0 = vrot.slane %v3533_v47, %v6513_v63  ;;  %v3548_v40 = vrot.slane %v3922_v57, %v6513_v63  ;;  %v3556_v14 = vrot.slane %v3549_v52, %v6513_v63  ;;  %v3564_v38 = vrot.slane %v3923_v17, %v6513_v63 }
 0x692   : > { %v3529_v39 = vcombine.low %v3505_v21, %v3521_v30  ;;  %v3531_v6 = vcombine.low %v3512_v1, %v3528_v16  ;;  %v3530_v35 = vcombine.high %v3505_v21, %v3521_v30  ;;  %v3532_v44 = vcombine.high %v3512_v1, %v3528_v16 }
 0x693   : > { %v3566_v31 = vcombine.high %v3540_v0, %v3548_v40  ;;  %v3582_v11 = vcombine.high %v3556_v14, %v3564_v38  ;;  %v3565_v54 = vcombine.low %v3540_v0, %v3548_v40  ;;  %v3581_v25 = vcombine.low %v3556_v14, %v3564_v38 }
 0x695   : > { %v3580_v33 = vrot.slane %v3566_v31, %v6516_v58  ;;  %v3596_v53 = vrot.slane %v3582_v11, %v6516_v58  ;;  %v3573_v28 = vrot.slane %v3565_v54, %v6516_v58  ;;  %v3589_v43 = vrot.slane %v3581_v25, %v6516_v58 }
 0x697   : > { %v3599_v63 = vcombine.low %v3580_v33, %v3596_v53  ;;  %v3598_v23 = vcombine.high %v3573_v28, %v3589_v43  ;;  %v3597_v55 = vcombine.low %v3573_v28, %v3589_v43  ;;  %v3600_v61 = vcombine.high %v3580_v33, %v3596_v53 }
 0x699   : > { %v4213_v26 = vpack.i.bf16 %v3599_v63, %v3531_v6  ;;  %v4208_v19 = vpack.i.bf16 %v3598_v23, %v3530_v35  ;;  %v4218_v51 = vpack.i.bf16 %v3600_v61, %v3532_v44 }
 0x69b   : > { %4214 = vrot.lane.b32.xlu0 %v4213_v26, %s4569_s11  ;;  %4209 = vrot.lane.b32.xlu1 %v4208_v19, %s4571_s28 }
 0x69f   : > { %4219 = vrot.lane.b32.xlu1 %v4218_v51, %s4568_s26 }
 0x70d   : > { %v4215_v2 = vpop.permute.xlu0 %4214  ;;  %v4210_v12 = vpop.permute.xlu1 %4209 }
 0x70e   : > { %v4212_v45 = vunpack.i.h.bf16 %v4210_v12  ;;  %v4211_v58 = vunpack.i.l.bf16 %v4210_v12  ;;  %v4217_v41 = vunpack.i.h.bf16 %v4215_v2  ;;  %v4216_v24 = vunpack.i.l.bf16 %v4215_v2 }
 0x710   : > { %v3625_v42 = vsel %vm2860_vm3, %v3529_v39, %v4211_v58  ;;  %v3626_v9 = vsel %vm2860_vm3, %v3597_v55, %v4212_v45 }
 0x711   : > { %v4220_v60 = vpop.permute.xlu1 %4219  ;;  %v3628_v15 = vsel %vm3627_vm6, %v3625_v42, %v4216_v24  ;;  %v3629_v18 = vsel %vm3627_vm6, %v3626_v9, %v4217_v41 }
 0x712   : > { %v4222_v5 = vunpack.i.h.bf16 %v4220_v60  ;;  %v4221_v49 = vunpack.i.l.bf16 %v4220_v60 }
 0x714   : > { %v3631_v32 = vsel %vm3630_vm7, %v3628_v15, %v4221_v49  ;;  %v3632_v10 = vsel %vm3630_vm7, %v3629_v18, %v4222_v5 }
 0x715   : > { %v3633_v22 = vpack.c.bf16 %v3632_v10, %v3631_v32 }
 0x717   : > { %4084 = vmatmul.mubr.bf16.vlgmr.msra.gmra.mxu0 %v3633_v22 }
 0x7d7   : > { %v3732_v59 = vpop.f32.mrf.mxu0 }
 0x7d8   : > { %3739 = vst [vmem:[%s300_s8] sm:$0xff] %v3732_v59 }
 0x7d9   : > { %v4085_v36 = vpop.f32.mrf.mxu0 }
 0x7db   : > { %v3735_v13 = vpop.f32.mrf.mxu0 }
 0x7dc   : > { %3740 = vst [vmem:[%s300_s8 + $0x8] sm:$0xff] %v3735_v13 }
 0x7dd   : > { %v4086_v29 = vpop.f32.mrf.mxu0 }
 0x7de   : > { %4498 = shalt.err (!%p4495_p5)
}
 0x7df   : > { %s4499_s26 = scalar_lea.hbm %s6243_s29, 256  ;;  %s4503_s6 = scalar_lea.hbm %s6291_s5, 512 }
 0x7e0   : > { %p4500_p6 = scmp.ne.s32.totalorder %s6243_s29, %s4499_s26  ;;  %p4504_p9 = scmp.lt.s32.totalorder %s6243_s29, %s6291_s5 }
 0x7e1   : > { %p4505_p2 = scmp.lt.s32.totalorder %s4503_s6, %s4499_s26 }
 0x7e2   : > { %p4501_p4 = pnand %p4500_p6, %p6536_p12 }
 0x7e3   : > { %p4506_p3 = por %p4505_p2, %p4504_p9 }
 0x7e4   : > { %p4502_p8 = pneg %p4501_p4 }
 0x7e6   : > { %p4507_p10 = pnand %p4506_p3, %p4502_p8 }
 0x7e8   : > { %4510 = shalt.err (!%p4507_p10)
}
 0x7e9   : > { %s4577_s15 = smov 128   ;;  %s4578_s30 = smov 8  }
 0x7ea   : > { %4105 = dma.vmem_to_hbm [thread:$0]  (%p6536_p12), %s6238_s27, 256, %s6243_s29, %s3742_s10, %s4577_s15, %s4577_s15, %s4578_s30  }
 0x7eb PF: > { %s3770_s12 = sand.u32 1, %s4545_s18   ;;  %p6537_p7 = scmp.ne.s32.totalorder %s6390_s25, 0 }
 0x7ec   : > { %p6538_p1 = scmp.ge.s32.totalorder %s4557_s21, 2  ;;  %s3771_s16 = scalar_lea.sflag [#allocation4], %s3770_s12 }
 0x7ee   : > { %p4125_p13 = pnand %p6538_p1, %p6537_p7 }
 0x7f0   : > { %p4126_p0 = pneg %p4125_p13 }
 0x7f2   : > { %4540 = dma.done.wait (%p4126_p0), %s3771_s16, 256  }
 0x7f3   : > { %4542 = vsyncadd (%p4126_p0), %s3771_s16, 4294967040  ;;  %p20_p11 = scmp.ge.s32.totalorder %s4709_s9, 4   ;;  %s6539_s18 = smov %s4549_s19 }
 0x7f4   : > { %s6540_s19 = smov %s4553_s20  ;;  %s6541_s20 = smov %s4725_s14 }
 0x7f5   : > { %s6542_s21 = smov %s4709_s9  ;;  %22 = sbr.rel (!%p20_p11) target bundleno = 7 (0x7), region = 101 }
 0x7fa   :  { %3776 = vsyncpa [#allocation3], 1 }
 0x7fb   :  { %3778 = vsyncpa [#allocation3 + $0x1], 1 }
 0x7fc   :  { %3779 = vsyncpa [#allocation6], 1 }
 0x7fd   :  { %3780 = vsyncpa [#allocation9], 1 }
 0x7fe   :  { %3781 = vsyncpa [#allocation4], 1 }
 0x7ff   :  { %3783 = vsyncpa [#allocation4 + $0x1], 1 }

</bundles_post_ra>
